<compile_context>
chip_gen: v7x
topology: tpu7x:2x2x1
jax: 0.10.0
libtpu: 0.0.40
codegen_flags: <defaults>
</compile_context>

<pallas_src>
import functools

import jax
import jax.numpy as jnp
from jax.experimental import pallas as pl
from jax.experimental.pallas import tpu as pltpu

LN_EPS = 1e-5
_MiB = 1024 * 1024


def _layer_norm(x, gamma, beta):
    # LayerNorm over the last (feature) axis, matching torch.nn.LayerNorm(d_model).
    mean = jnp.mean(x, axis=-1, keepdims=True)
    var = jnp.mean(jnp.square(x - mean), axis=-1, keepdims=True)
    inv = jax.lax.rsqrt(var + LN_EPS)
    return (x - mean) * inv * gamma + beta


def encoder_stack_kernel(nhead, nums, bt,
                         x_ref,
                         wqkv_ref, bqkv_ref, wo_ref, bo_ref,
                         g1_ref, be1_ref, w1_ref, b1_ref, w2_ref, b2_ref,
                         g2_ref, be2_ref,
                         out_ref,
                         attn_sc):
    S, D = x_ref.shape[1], x_ref.shape[2]
    hd = D // nhead
    rows = bt * S
    mm = wqkv_ref.dtype                      # bf16 MXU operand dtype

    def one_layer(x):                        # x: (rows, D) f32
        # ---- fused QKV projection over the whole row block (weights read at use) ----
        qkv = jnp.dot(x.astype(mm), wqkv_ref[...],
                      preferred_element_type=jnp.float32) + bqkv_ref[...]   # (rows, 3D)
        qkv = qkv.astype(mm).reshape(bt, S, 3 * D)                          # (bt, S, 3D)

        # ---- multi-head attention: heads statically unrolled, each head batched
        # over the bt sequences; head results go straight into VMEM scratch
        # (no lane-axis concatenate). Q slice is pre-scaled by 1/sqrt(hd) on host.
        for h in range(nhead):
            lo = h * hd
            qh = qkv[:, :, lo:lo + hd]                                      # (bt, S, hd)
            kh = qkv[:, :, D + lo:D + lo + hd]
            vh = qkv[:, :, 2 * D + lo:2 * D + lo + hd]
            s = jnp.einsum('bqe,bke->bqk', qh, kh,
                           preferred_element_type=jnp.float32)              # (bt, S, S)
            s = s - jnp.max(s, axis=-1, keepdims=True)
            p = jnp.exp(s)
            p = p * pl.reciprocal(jnp.sum(p, axis=-1, keepdims=True), approx=True)
            attn_sc[:, :, lo:lo + hd] = jnp.einsum(
                'bqk,bke->bqe', p.astype(mm), vh,
                preferred_element_type=jnp.float32)                         # (bt, S, hd)

        # ---- single full-D contraction output projection over all heads ----
        attn = attn_sc[...].reshape(rows, D)
        attn = jnp.dot(attn.astype(mm), wo_ref[...],
                       preferred_element_type=jnp.float32) + bo_ref[...]

        # ---- residual + LayerNorm 1 (f32) ----
        h1 = _layer_norm(x + attn, g1_ref[...], be1_ref[...])

        # ---- feed-forward (relu) ----
        ff = jnp.dot(h1.astype(mm), w1_ref[...],
                     preferred_element_type=jnp.float32) + b1_ref[...]
        ff = jnp.maximum(ff, 0.0)
        ff = jnp.dot(ff.astype(mm), w2_ref[...],
                     preferred_element_type=jnp.float32) + b2_ref[...]

        # ---- residual + LayerNorm 2 ----
        return _layer_norm(h1 + ff, g2_ref[...], be2_ref[...])

    x = x_ref[...].reshape(rows, D).astype(jnp.float32)
    if nums <= 8:
        # Statically unroll the shared-weight layer stack (LLO scheduler visibility).
        for _ in range(nums):
            x = one_layer(x)
    else:
        x = jax.lax.fori_loop(0, nums, lambda _, v: one_layer(v), x)
    out_ref[...] = x.reshape(bt, S, D).astype(out_ref.dtype)


def _choose_batch_tile(B, S, target_rows=512):
    """Largest divisor of B with bt*S <= target_rows, keeping >=2 grid steps
    when B allows (so the parallel grid axis can use both v7x TensorCores)."""
    bt = 1
    for d in range(1, B + 1):
        if B % d == 0 and d * S <= target_rows:
            bt = d
    if B // bt < 2 and B >= 2:
        for d in range(bt, 0, -1):
            if B % d == 0 and B // d >= 2:
                bt = d
                break
    return bt


def _vmem_limit_bytes(bt, S, D, F, x_itemsize, packed):
    """Single-buffered weights + per-layer activation working set, +50% headroom."""
    rows = bt * S
    weight_bytes = sum(int(p.size) * p.dtype.itemsize for p in packed)
    io_bytes = 2 * 2 * rows * D * x_itemsize          # double-buffered in/out act blocks
    scratch_bytes = rows * D * 4                      # attention head scratch (f32)
    work_bytes = (rows * 3 * D * (4 + 2)              # qkv f32 + bf16 copies
                  + 3 * rows * D * 4                  # x, attn-out, h1 (f32)
                  + rows * F * 4                      # FFN hidden (f32)
                  + 2 * bt * S * S * 4)               # per-head scores / probs (f32)
    need = weight_bytes + io_bytes + scratch_bytes + work_bytes
    return int(min(max(need * 3 // 2, 32 * _MiB), 100 * _MiB))


def pack_params(params, nhead, compute_dtype=jnp.bfloat16):
    """Host-side one-time packing: fuse Wq/Wk/Wv, pre-transpose torch (out,in)
    weights to (in,out), fold the 1/sqrt(head_dim) scale into the Q weight/bias,
    cast MXU operands to bf16 (biases / LN params stay f32)."""
    D = params['wq'].shape[0]
    hd = D // nhead
    scale = 1.0 / float(hd) ** 0.5
    wqkv = jnp.concatenate(
        [(params['wq'] * scale).T, params['wk'].T, params['wv'].T], axis=1)   # (D, 3D)
    bqkv = jnp.concatenate(
        [params['bq'] * scale, params['bk'], params['bv']], axis=1)           # (1, 3D)
    return [
        wqkv.astype(compute_dtype),
        bqkv.astype(jnp.float32),
        params['wo'].T.astype(compute_dtype),     # (D, D)
        params['bo'].astype(jnp.float32),
        params['ln1_g'].astype(jnp.float32),
        params['ln1_b'].astype(jnp.float32),
        params['w1'].T.astype(compute_dtype),     # (D, F)
        params['b1'].astype(jnp.float32),
        params['w2'].T.astype(compute_dtype),     # (F, D)
        params['b2'].astype(jnp.float32),
        params['ln2_g'].astype(jnp.float32),
        params['ln2_b'].astype(jnp.float32),
    ]


def transformer_encoder(x, packed, nhead, nums, *, single_buffer_weights=True):
    """Full shared-weight encoder stack as ONE pallas_call (layer loop inside kernel)."""
    B, S, D = x.shape
    bt = _choose_batch_tile(B, S)
    grid = (B // bt,)
    F = packed[6].shape[1]

    kernel = functools.partial(encoder_stack_kernel, nhead, nums, bt)
    x_spec = pl.BlockSpec((bt, S, D), lambda b: (b, 0, 0))
    if single_buffer_weights:
        # Constant index_map -> never re-fetched; single buffer halves weight VMEM.
        w_specs = [pl.BlockSpec(p.shape, lambda b: (0, 0),
                                pipeline_mode=pl.Buffered(1)) for p in packed]
    else:
        w_specs = [pl.BlockSpec(p.shape, lambda b: (0, 0)) for p in packed]

    return pl.pallas_call(
        kernel,
        out_shape=jax.ShapeDtypeStruct(x.shape, x.dtype),
        grid=grid,
        in_specs=[x_spec] + w_specs,
        out_specs=pl.BlockSpec((bt, S, D), lambda b: (b, 0, 0)),
        scratch_shapes=[pltpu.VMEM((bt, S, D), jnp.float32)],
        compiler_params=pltpu.CompilerParams(
            dimension_semantics=("parallel",),
            vmem_limit_bytes=_vmem_limit_bytes(bt, S, D, F, x.dtype.itemsize, packed)),
    )(x, *packed)


def reference_encoder(x, packed, nhead, nums):
    """Pure-JAX reference. With bf16 packing it mirrors the kernel's mixed precision;
    with f32 packing it is an exact f32 forward (exact softmax)."""
    (wqkv, bqkv, wo, bo, g1, be1, w1, b1, w2, b2, g2, be2) = packed
    B, S, D = x.shape
    hd = D // nhead
    mm = wqkv.dtype

    def layer(x):
        qkv = jnp.einsum('bsd,de->bse', x.astype(mm), wqkv,
                         preferred_element_type=jnp.float32) + bqkv
        qkv = qkv.astype(mm)
        q, k, v = qkv[..., :D], qkv[..., D:2 * D], qkv[..., 2 * D:]
        qh = q.reshape(B, S, nhead, hd)
        kh = k.reshape(B, S, nhead, hd)
        vh = v.reshape(B, S, nhead, hd)
        s = jnp.einsum('bqhe,bkhe->bhqk', qh, kh, preferred_element_type=jnp.float32)
        p = jax.nn.softmax(s, axis=-1)
        o = jnp.einsum('bhqk,bkhe->bqhe', p.astype(mm), vh,
                       preferred_element_type=jnp.float32).reshape(B, S, D)
        attn = jnp.einsum('bsd,de->bse', o.astype(mm), wo,
                          preferred_element_type=jnp.float32) + bo
        h1 = _layer_norm(x + attn, g1, be1)
        ff = jnp.einsum('bsd,df->bsf', h1.astype(mm), w1,
                        preferred_element_type=jnp.float32) + b1
        ff = jnp.maximum(ff, 0.0)
        ff = jnp.einsum('bsf,fd->bsd', ff.astype(mm), w2,
                        preferred_element_type=jnp.float32) + b2
        return _layer_norm(h1 + ff, g2, be2)

    x = x.astype(jnp.float32)
    for _ in range(nums):
        x = layer(x)
    return x


def init_params(key, d_model, dim_ff):
    """Deterministic synthetic parameter init (torch Linear layout: weight = (out, in))."""
    ks = jax.random.split(key, 8)
    s = 0.05
    return {
        'wq': s * jax.random.normal(ks[0], (d_model, d_model), jnp.float32),
        'wk': s * jax.random.normal(ks[1], (d_model, d_model), jnp.float32),
        'wv': s * jax.random.normal(ks[2], (d_model, d_model), jnp.float32),
        'bq': s * jax.random.normal(ks[3], (1, d_model), jnp.float32),
        'bk': jnp.zeros((1, d_model), jnp.float32),
        'bv': jnp.zeros((1, d_model), jnp.float32),
        'wo': s * jax.random.normal(ks[4], (d_model, d_model), jnp.float32),
        'bo': jnp.zeros((1, d_model), jnp.float32),
        'ln1_g': jnp.ones((1, d_model), jnp.float32),
        'ln1_b': jnp.zeros((1, d_model), jnp.float32),
        'w1': s * jax.random.normal(ks[5], (dim_ff, d_model), jnp.float32),
        'b1': s * jax.random.normal(ks[6], (1, dim_ff), jnp.float32),
        'w2': s * jax.random.normal(ks[7], (d_model, dim_ff), jnp.float32),
        'b2': jnp.zeros((1, d_model), jnp.float32),
        'ln2_g': jnp.ones((1, d_model), jnp.float32),
        'ln2_b': jnp.zeros((1, d_model), jnp.float32),
    }


if __name__ == "__main__":
    # Small shapes consistent with a TransformerEncoderLayer forward (batch-first).
    B, S, D = 2, 8, 32          # batch, seq, d_model
    NHEAD = 4
    DIM_FF = 64
    NUMS = 2                    # number of (shared) layers

    key = jax.random.PRNGKey(0)
    kx, kp = jax.random.split(key)
    x = jax.random.normal(kx, (B, S, D), jnp.float32)
    params = init_params(kp, D, DIM_FF)
    packed = pack_params(params, NHEAD)

    try:
        out = jax.block_until_ready(transformer_encoder(x, packed, NHEAD, NUMS))
    except Exception:
        # Safety net: if single-buffered (pl.Buffered(1)) weight specs are rejected
        # on this JAX build, retry with default (double-buffered) weight BlockSpecs.
        out = jax.block_until_ready(
            transformer_encoder(x, packed, NHEAD, NUMS, single_buffer_weights=False))

    assert out.shape == (B, S, D)
    assert bool(jnp.all(jnp.isfinite(out)))

    # Check vs a reference that mirrors the kernel's mixed precision (tight).
    ref = reference_encoder(x, packed, NHEAD, NUMS)
    max_err = float(jnp.max(jnp.abs(out.astype(jnp.float32) - ref.astype(jnp.float32))))
    assert max_err < 5e-2, f"max abs error vs mixed-precision reference: {max_err}"

    # One-off validation against a full-f32, exact-softmax reference (loose).
    packed_f32 = pack_params(params, NHEAD, compute_dtype=jnp.float32)
    ref32 = reference_encoder(x, packed_f32, NHEAD, NUMS)
    max_err32 = float(jnp.max(jnp.abs(out.astype(jnp.float32) - ref32)))
    assert max_err32 < 3e-1, f"max abs error vs f32 reference: {max_err32}"

    print("KERNEL_OK")
</pallas_src>

<mosaic_0001>
module attributes {stable_mosaic.version = 11 : i64} {
  func.func @encoder_stack_kernel(%arg0: i32, %arg1: memref<1x8x32xf32, #tpu.memory_space<vmem>>, %arg2: memref<32x96xbf16, #tpu.memory_space<vmem>>, %arg3: memref<1x96xf32, #tpu.memory_space<vmem>>, %arg4: memref<32x32xbf16, #tpu.memory_space<vmem>>, %arg5: memref<1x32xf32, #tpu.memory_space<vmem>>, %arg6: memref<1x32xf32, #tpu.memory_space<vmem>>, %arg7: memref<1x32xf32, #tpu.memory_space<vmem>>, %arg8: memref<32x64xbf16, #tpu.memory_space<vmem>>, %arg9: memref<1x64xf32, #tpu.memory_space<vmem>>, %arg10: memref<64x32xbf16, #tpu.memory_space<vmem>>, %arg11: memref<1x32xf32, #tpu.memory_space<vmem>>, %arg12: memref<1x32xf32, #tpu.memory_space<vmem>>, %arg13: memref<1x32xf32, #tpu.memory_space<vmem>>, %arg14: memref<1x8x32xf32, #tpu.memory_space<vmem>>, %arg15: memref<1x8x32xf32, #tpu.memory_space<vmem>>) attributes {dimension_semantics = [#tpu.dimension_semantics<parallel>], iteration_bounds = array<i64: 2>, scalar_prefetch = 0 : i64, scratch_operands = 1 : i64, tpu.core_type = #tpu.core_type<tc>, window_params = [{transform_indices = @transform_0, window_bounds = array<i64: 1, 8, 32>}, {pipeline_mode = #tpu.pipeline_mode<synchronous>, transform_indices = @transform_1, window_bounds = array<i64: 32, 96>}, {pipeline_mode = #tpu.pipeline_mode<synchronous>, transform_indices = @transform_2, window_bounds = array<i64: 1, 96>}, {pipeline_mode = #tpu.pipeline_mode<synchronous>, transform_indices = @transform_3, window_bounds = array<i64: 32, 32>}, {pipeline_mode = #tpu.pipeline_mode<synchronous>, transform_indices = @transform_4, window_bounds = array<i64: 1, 32>}, {pipeline_mode = #tpu.pipeline_mode<synchronous>, transform_indices = @transform_5, window_bounds = array<i64: 1, 32>}, {pipeline_mode = #tpu.pipeline_mode<synchronous>, transform_indices = @transform_6, window_bounds = array<i64: 1, 32>}, {pipeline_mode = #tpu.pipeline_mode<synchronous>, transform_indices = @transform_7, window_bounds = array<i64: 32, 64>}, {pipeline_mode = #tpu.pipeline_mode<synchronous>, transform_indices = @transform_8, window_bounds = array<i64: 1, 64>}, {pipeline_mode = #tpu.pipeline_mode<synchronous>, transform_indices = @transform_9, window_bounds = array<i64: 64, 32>}, {pipeline_mode = #tpu.pipeline_mode<synchronous>, transform_indices = @transform_10, window_bounds = array<i64: 1, 32>}, {pipeline_mode = #tpu.pipeline_mode<synchronous>, transform_indices = @transform_11, window_bounds = array<i64: 1, 32>}, {pipeline_mode = #tpu.pipeline_mode<synchronous>, transform_indices = @transform_12, window_bounds = array<i64: 1, 32>}, {transform_indices = @transform_13, window_bounds = array<i64: 1, 8, 32>}]} {
    %c0 = arith.constant 0 : index
    %c0_0 = arith.constant 0 : index
    %c0_1 = arith.constant 0 : index
    %0 = vector.load %arg1[%c0, %c0_0, %c0_1] : memref<1x8x32xf32, #tpu.memory_space<vmem>>, vector<1x8x32xf32>
    %1 = vector.shape_cast %0 : vector<1x8x32xf32> to vector<8x32xf32>
    %2 = arith.truncf %1 : vector<8x32xf32> to vector<8x32xbf16>
    %c0_2 = arith.constant 0 : index
    %c0_3 = arith.constant 0 : index
    %3 = vector.load %arg2[%c0_2, %c0_3] : memref<32x96xbf16, #tpu.memory_space<vmem>>, vector<32x96xbf16>
    %cst = arith.constant dense<0.000000e+00> : vector<8x96xf32>
    %4 = tpu.matmul %2, %3, %cst {dimension_numbers = #tpu.dot_dimension_numbers<[1], [0], [0], [1], [0, 0, 1, 1], [], []>} : vector<8x32xbf16>, vector<32x96xbf16>, vector<8x96xf32> -> vector<8x96xf32>
    %c0_4 = arith.constant 0 : index
    %c0_5 = arith.constant 0 : index
    %5 = vector.load %arg3[%c0_4, %c0_5] : memref<1x96xf32, #tpu.memory_space<vmem>>, vector<1x96xf32>
    %6 = vector.broadcast %5 : vector<1x96xf32> to vector<8x96xf32>
    %7 = arith.addf %4, %6 : vector<8x96xf32>
    %8 = arith.truncf %7 : vector<8x96xf32> to vector<8x96xbf16>
    %9 = vector.shape_cast %8 : vector<8x96xbf16> to vector<1x8x96xbf16>
    %10 = vector.extract_strided_slice %9 {offsets = [0, 0, 0], sizes = [1, 8, 8], strides = [1, 1, 1]} : vector<1x8x96xbf16> to vector<1x8x8xbf16>
    %11 = vector.extract_strided_slice %9 {offsets = [0, 0, 32], sizes = [1, 8, 8], strides = [1, 1, 1]} : vector<1x8x96xbf16> to vector<1x8x8xbf16>
    %12 = vector.extract_strided_slice %9 {offsets = [0, 0, 64], sizes = [1, 8, 8], strides = [1, 1, 1]} : vector<1x8x96xbf16> to vector<1x8x8xbf16>
    "tpu.trace_start"() <{level = 10 : i32, message = "bqe,bke->bqk"}> : () -> ()
    %cst_6 = arith.constant dense<0.000000e+00> : vector<1x8x8xf32>
    %13 = tpu.matmul %10, %11, %cst_6 {dimension_numbers = #tpu.dot_dimension_numbers<[2], [2], [1], [1], [0, 0, 0, 1, 1, 1], [0], [0]>} : vector<1x8x8xbf16>, vector<1x8x8xbf16>, vector<1x8x8xf32> -> vector<1x8x8xf32>
    "tpu.trace_stop"() : () -> ()
    %cst_7 = arith.constant dense<0xFF800000> : vector<1x8xf32>
    %14 = vector.multi_reduction <maximumf>, %13, %cst_7 [2] : vector<1x8x8xf32> to vector<1x8xf32>
    %15 = vector.shape_cast %14 : vector<1x8xf32> to vector<1x8x1xf32>
    %16 = vector.broadcast %15 : vector<1x8x1xf32> to vector<1x8x8xf32>
    %17 = arith.subf %13, %16 : vector<1x8x8xf32>
    %18 = math.exp %17 : vector<1x8x8xf32>
    %cst_8 = arith.constant dense<0.000000e+00> : vector<1x8xf32>
    %19 = vector.multi_reduction <add>, %18, %cst_8 [2] : vector<1x8x8xf32> to vector<1x8xf32>
    %20 = vector.shape_cast %19 : vector<1x8xf32> to vector<1x8x1xf32>
    %21 = tpu.reciprocal %20 {approx = true} : vector<1x8x1xf32> -> vector<1x8x1xf32>
    %22 = vector.broadcast %21 : vector<1x8x1xf32> to vector<1x8x8xf32>
    %23 = arith.mulf %18, %22 : vector<1x8x8xf32>
    %24 = arith.truncf %23 : vector<1x8x8xf32> to vector<1x8x8xbf16>
    "tpu.trace_start"() <{level = 10 : i32, message = "bqk,bke->bqe"}> : () -> ()
    %cst_9 = arith.constant dense<0.000000e+00> : vector<1x8x8xf32>
    %25 = tpu.matmul %24, %12, %cst_9 {dimension_numbers = #tpu.dot_dimension_numbers<[2], [1], [1], [2], [0, 0, 0, 1, 1, 2], [0], [0]>} : vector<1x8x8xbf16>, vector<1x8x8xbf16>, vector<1x8x8xf32> -> vector<1x8x8xf32>
    "tpu.trace_stop"() : () -> ()
    %c0_10 = arith.constant 0 : index
    %c0_11 = arith.constant 0 : index
    %c0_12 = arith.constant 0 : index
    %26 = vector.load %arg15[%c0_10, %c0_11, %c0_12] : memref<1x8x32xf32, #tpu.memory_space<vmem>>, vector<1x8x8xf32>
    tpu.vector_store %arg15[%c0_10, %c0_11, %c0_12], %25 {strides = array<i32>} : memref<1x8x32xf32, #tpu.memory_space<vmem>>, vector<1x8x8xf32>,
    %27 = vector.extract_strided_slice %9 {offsets = [0, 0, 8], sizes = [1, 8, 8], strides = [1, 1, 1]} : vector<1x8x96xbf16> to vector<1x8x8xbf16>
    %28 = vector.extract_strided_slice %9 {offsets = [0, 0, 40], sizes = [1, 8, 8], strides = [1, 1, 1]} : vector<1x8x96xbf16> to vector<1x8x8xbf16>
    %29 = vector.extract_strided_slice %9 {offsets = [0, 0, 72], sizes = [1, 8, 8], strides = [1, 1, 1]} : vector<1x8x96xbf16> to vector<1x8x8xbf16>
    "tpu.trace_start"() <{level = 10 : i32, message = "bqe,bke->bqk"}> : () -> ()
    %cst_13 = arith.constant dense<0.000000e+00> : vector<1x8x8xf32>
    %30 = tpu.matmul %27, %28, %cst_13 {dimension_numbers = #tpu.dot_dimension_numbers<[2], [2], [1], [1], [0, 0, 0, 1, 1, 1], [0], [0]>} : vector<1x8x8xbf16>, vector<1x8x8xbf16>, vector<1x8x8xf32> -> vector<1x8x8xf32>
    "tpu.trace_stop"() : () -> ()
    %cst_14 = arith.constant dense<0xFF800000> : vector<1x8xf32>
    %31 = vector.multi_reduction <maximumf>, %30, %cst_14 [2] : vector<1x8x8xf32> to vector<1x8xf32>
    %32 = vector.shape_cast %31 : vector<1x8xf32> to vector<1x8x1xf32>
    %33 = vector.broadcast %32 : vector<1x8x1xf32> to vector<1x8x8xf32>
    %34 = arith.subf %30, %33 : vector<1x8x8xf32>
    %35 = math.exp %34 : vector<1x8x8xf32>
    %cst_15 = arith.constant dense<0.000000e+00> : vector<1x8xf32>
    %36 = vector.multi_reduction <add>, %35, %cst_15 [2] : vector<1x8x8xf32> to vector<1x8xf32>
    %37 = vector.shape_cast %36 : vector<1x8xf32> to vector<1x8x1xf32>
    %38 = tpu.reciprocal %37 {approx = true} : vector<1x8x1xf32> -> vector<1x8x1xf32>
    %39 = vector.broadcast %38 : vector<1x8x1xf32> to vector<1x8x8xf32>
    %40 = arith.mulf %35, %39 : vector<1x8x8xf32>
    %41 = arith.truncf %40 : vector<1x8x8xf32> to vector<1x8x8xbf16>
    "tpu.trace_start"() <{level = 10 : i32, message = "bqk,bke->bqe"}> : () -> ()
    %cst_16 = arith.constant dense<0.000000e+00> : vector<1x8x8xf32>
    %42 = tpu.matmul %41, %29, %cst_16 {dimension_numbers = #tpu.dot_dimension_numbers<[2], [1], [1], [2], [0, 0, 0, 1, 1, 2], [0], [0]>} : vector<1x8x8xbf16>, vector<1x8x8xbf16>, vector<1x8x8xf32> -> vector<1x8x8xf32>
    "tpu.trace_stop"() : () -> ()
    %c0_17 = arith.constant 0 : index
    %c0_18 = arith.constant 0 : index
    %c8 = arith.constant 8 : index
    %43 = vector.load %arg15[%c0_17, %c0_18, %c8] : memref<1x8x32xf32, #tpu.memory_space<vmem>>, vector<1x8x8xf32>
    tpu.vector_store %arg15[%c0_17, %c0_18, %c8], %42 {strides = array<i32>} : memref<1x8x32xf32, #tpu.memory_space<vmem>>, vector<1x8x8xf32>,
    %44 = vector.extract_strided_slice %9 {offsets = [0, 0, 16], sizes = [1, 8, 8], strides = [1, 1, 1]} : vector<1x8x96xbf16> to vector<1x8x8xbf16>
    %45 = vector.extract_strided_slice %9 {offsets = [0, 0, 48], sizes = [1, 8, 8], strides = [1, 1, 1]} : vector<1x8x96xbf16> to vector<1x8x8xbf16>
    %46 = vector.extract_strided_slice %9 {offsets = [0, 0, 80], sizes = [1, 8, 8], strides = [1, 1, 1]} : vector<1x8x96xbf16> to vector<1x8x8xbf16>
    "tpu.trace_start"() <{level = 10 : i32, message = "bqe,bke->bqk"}> : () -> ()
    %cst_19 = arith.constant dense<0.000000e+00> : vector<1x8x8xf32>
    %47 = tpu.matmul %44, %45, %cst_19 {dimension_numbers = #tpu.dot_dimension_numbers<[2], [2], [1], [1], [0, 0, 0, 1, 1, 1], [0], [0]>} : vector<1x8x8xbf16>, vector<1x8x8xbf16>, vector<1x8x8xf32> -> vector<1x8x8xf32>
    "tpu.trace_stop"() : () -> ()
    %cst_20 = arith.constant dense<0xFF800000> : vector<1x8xf32>
    %48 = vector.multi_reduction <maximumf>, %47, %cst_20 [2] : vector<1x8x8xf32> to vector<1x8xf32>
    %49 = vector.shape_cast %48 : vector<1x8xf32> to vector<1x8x1xf32>
    %50 = vector.broadcast %49 : vector<1x8x1xf32> to vector<1x8x8xf32>
    %51 = arith.subf %47, %50 : vector<1x8x8xf32>
    %52 = math.exp %51 : vector<1x8x8xf32>
    %cst_21 = arith.constant dense<0.000000e+00> : vector<1x8xf32>
    %53 = vector.multi_reduction <add>, %52, %cst_21 [2] : vector<1x8x8xf32> to vector<1x8xf32>
    %54 = vector.shape_cast %53 : vector<1x8xf32> to vector<1x8x1xf32>
    %55 = tpu.reciprocal %54 {approx = true} : vector<1x8x1xf32> -> vector<1x8x1xf32>
    %56 = vector.broadcast %55 : vector<1x8x1xf32> to vector<1x8x8xf32>
    %57 = arith.mulf %52, %56 : vector<1x8x8xf32>
    %58 = arith.truncf %57 : vector<1x8x8xf32> to vector<1x8x8xbf16>
    "tpu.trace_start"() <{level = 10 : i32, message = "bqk,bke->bqe"}> : () -> ()
    %cst_22 = arith.constant dense<0.000000e+00> : vector<1x8x8xf32>
    %59 = tpu.matmul %58, %46, %cst_22 {dimension_numbers = #tpu.dot_dimension_numbers<[2], [1], [1], [2], [0, 0, 0, 1, 1, 2], [0], [0]>} : vector<1x8x8xbf16>, vector<1x8x8xbf16>, vector<1x8x8xf32> -> vector<1x8x8xf32>
    "tpu.trace_stop"() : () -> ()
    %c0_23 = arith.constant 0 : index
    %c0_24 = arith.constant 0 : index
    %c16 = arith.constant 16 : index
    %60 = vector.load %arg15[%c0_23, %c0_24, %c16] : memref<1x8x32xf32, #tpu.memory_space<vmem>>, vector<1x8x8xf32>
    tpu.vector_store %arg15[%c0_23, %c0_24, %c16], %59 {strides = array<i32>} : memref<1x8x32xf32, #tpu.memory_space<vmem>>, vector<1x8x8xf32>,
    %61 = vector.extract_strided_slice %9 {offsets = [0, 0, 24], sizes = [1, 8, 8], strides = [1, 1, 1]} : vector<1x8x96xbf16> to vector<1x8x8xbf16>
    %62 = vector.extract_strided_slice %9 {offsets = [0, 0, 56], sizes = [1, 8, 8], strides = [1, 1, 1]} : vector<1x8x96xbf16> to vector<1x8x8xbf16>
    %63 = vector.extract_strided_slice %9 {offsets = [0, 0, 88], sizes = [1, 8, 8], strides = [1, 1, 1]} : vector<1x8x96xbf16> to vector<1x8x8xbf16>
    "tpu.trace_start"() <{level = 10 : i32, message = "bqe,bke->bqk"}> : () -> ()
    %cst_25 = arith.constant dense<0.000000e+00> : vector<1x8x8xf32>
    %64 = tpu.matmul %61, %62, %cst_25 {dimension_numbers = #tpu.dot_dimension_numbers<[2], [2], [1], [1], [0, 0, 0, 1, 1, 1], [0], [0]>} : vector<1x8x8xbf16>, vector<1x8x8xbf16>, vector<1x8x8xf32> -> vector<1x8x8xf32>
    "tpu.trace_stop"() : () -> ()
    %cst_26 = arith.constant dense<0xFF800000> : vector<1x8xf32>
    %65 = vector.multi_reduction <maximumf>, %64, %cst_26 [2] : vector<1x8x8xf32> to vector<1x8xf32>
    %66 = vector.shape_cast %65 : vector<1x8xf32> to vector<1x8x1xf32>
    %67 = vector.broadcast %66 : vector<1x8x1xf32> to vector<1x8x8xf32>
    %68 = arith.subf %64, %67 : vector<1x8x8xf32>
    %69 = math.exp %68 : vector<1x8x8xf32>
    %cst_27 = arith.constant dense<0.000000e+00> : vector<1x8xf32>
    %70 = vector.multi_reduction <add>, %69, %cst_27 [2] : vector<1x8x8xf32> to vector<1x8xf32>
    %71 = vector.shape_cast %70 : vector<1x8xf32> to vector<1x8x1xf32>
    %72 = tpu.reciprocal %71 {approx = true} : vector<1x8x1xf32> -> vector<1x8x1xf32>
    %73 = vector.broadcast %72 : vector<1x8x1xf32> to vector<1x8x8xf32>
    %74 = arith.mulf %69, %73 : vector<1x8x8xf32>
    %75 = arith.truncf %74 : vector<1x8x8xf32> to vector<1x8x8xbf16>
    "tpu.trace_start"() <{level = 10 : i32, message = "bqk,bke->bqe"}> : () -> ()
    %cst_28 = arith.constant dense<0.000000e+00> : vector<1x8x8xf32>
    %76 = tpu.matmul %75, %63, %cst_28 {dimension_numbers = #tpu.dot_dimension_numbers<[2], [1], [1], [2], [0, 0, 0, 1, 1, 2], [0], [0]>} : vector<1x8x8xbf16>, vector<1x8x8xbf16>, vector<1x8x8xf32> -> vector<1x8x8xf32>
    "tpu.trace_stop"() : () -> ()
    %c0_29 = arith.constant 0 : index
    %c0_30 = arith.constant 0 : index
    %c24 = arith.constant 24 : index
    %77 = vector.load %arg15[%c0_29, %c0_30, %c24] : memref<1x8x32xf32, #tpu.memory_space<vmem>>, vector<1x8x8xf32>
    tpu.vector_store %arg15[%c0_29, %c0_30, %c24], %76 {strides = array<i32>} : memref<1x8x32xf32, #tpu.memory_space<vmem>>, vector<1x8x8xf32>,
    %c0_31 = arith.constant 0 : index
    %c0_32 = arith.constant 0 : index
    %c0_33 = arith.constant 0 : index
    %78 = vector.load %arg15[%c0_31, %c0_32, %c0_33] : memref<1x8x32xf32, #tpu.memory_space<vmem>>, vector<1x8x32xf32>
    %79 = vector.shape_cast %78 : vector<1x8x32xf32> to vector<8x32xf32>
    %80 = arith.truncf %79 : vector<8x32xf32> to vector<8x32xbf16>
    %c0_34 = arith.constant 0 : index
    %c0_35 = arith.constant 0 : index
    %81 = vector.load %arg4[%c0_34, %c0_35] : memref<32x32xbf16, #tpu.memory_space<vmem>>, vector<32x32xbf16>
    %cst_36 = arith.constant dense<0.000000e+00> : vector<8x32xf32>
    %82 = tpu.matmul %80, %81, %cst_36 {dimension_numbers = #tpu.dot_dimension_numbers<[1], [0], [0], [1], [0, 0, 1, 1], [], []>} : vector<8x32xbf16>, vector<32x32xbf16>, vector<8x32xf32> -> vector<8x32xf32>
    %c0_37 = arith.constant 0 : index
    %c0_38 = arith.constant 0 : index
    %83 = vector.load %arg5[%c0_37, %c0_38] : memref<1x32xf32, #tpu.memory_space<vmem>>, vector<1x32xf32>
    %84 = vector.broadcast %83 : vector<1x32xf32> to vector<8x32xf32>
    %85 = arith.addf %82, %84 : vector<8x32xf32>
    %86 = arith.addf %1, %85 : vector<8x32xf32>
    %c0_39 = arith.constant 0 : index
    %c0_40 = arith.constant 0 : index
    %87 = vector.load %arg6[%c0_39, %c0_40] : memref<1x32xf32, #tpu.memory_space<vmem>>, vector<1x32xf32>
    %c0_41 = arith.constant 0 : index
    %c0_42 = arith.constant 0 : index
    %88 = vector.load %arg7[%c0_41, %c0_42] : memref<1x32xf32, #tpu.memory_space<vmem>>, vector<1x32xf32>
    %cst_43 = arith.constant dense<0.000000e+00> : vector<8xf32>
    %89 = vector.multi_reduction <add>, %86, %cst_43 [1] : vector<8x32xf32> to vector<8xf32>
    %90 = vector.shape_cast %89 : vector<8xf32> to vector<8x1xf32>
    %cst_44 = arith.constant 3.200000e+01 : f32
    %91 = vector.broadcast %cst_44 : f32 to vector<8x1xf32>
    %92 = arith.divf %90, %91 : vector<8x1xf32>
    %93 = vector.broadcast %92 : vector<8x1xf32> to vector<8x32xf32>
    %94 = arith.subf %86, %93 : vector<8x32xf32>
    %95 = arith.mulf %94, %94 : vector<8x32xf32>
    %cst_45 = arith.constant dense<0.000000e+00> : vector<8xf32>
    %96 = vector.multi_reduction <add>, %95, %cst_45 [1] : vector<8x32xf32> to vector<8xf32>
    %97 = vector.shape_cast %96 : vector<8xf32> to vector<8x1xf32>
    %cst_46 = arith.constant 3.200000e+01 : f32
    %98 = vector.broadcast %cst_46 : f32 to vector<8x1xf32>
    %99 = arith.divf %97, %98 : vector<8x1xf32>
    %cst_47 = arith.constant 9.99999974E-6 : f32
    %100 = vector.broadcast %cst_47 : f32 to vector<8x1xf32>
    %101 = arith.addf %99, %100 : vector<8x1xf32>
    %102 = math.rsqrt %101 : vector<8x1xf32>
    %103 = vector.broadcast %92 : vector<8x1xf32> to vector<8x32xf32>
    %104 = arith.subf %86, %103 : vector<8x32xf32>
    %105 = vector.broadcast %102 : vector<8x1xf32> to vector<8x32xf32>
    %106 = arith.mulf %104, %105 : vector<8x32xf32>
    %107 = vector.broadcast %87 : vector<1x32xf32> to vector<8x32xf32>
    %108 = arith.mulf %106, %107 : vector<8x32xf32>
    %109 = vector.broadcast %88 : vector<1x32xf32> to vector<8x32xf32>
    %110 = arith.addf %108, %109 : vector<8x32xf32>
    %111 = arith.truncf %110 : vector<8x32xf32> to vector<8x32xbf16>
    %c0_48 = arith.constant 0 : index
    %c0_49 = arith.constant 0 : index
    %112 = vector.load %arg8[%c0_48, %c0_49] : memref<32x64xbf16, #tpu.memory_space<vmem>>, vector<32x64xbf16>
    %cst_50 = arith.constant dense<0.000000e+00> : vector<8x64xf32>
    %113 = tpu.matmul %111, %112, %cst_50 {dimension_numbers = #tpu.dot_dimension_numbers<[1], [0], [0], [1], [0, 0, 1, 1], [], []>} : vector<8x32xbf16>, vector<32x64xbf16>, vector<8x64xf32> -> vector<8x64xf32>
    %c0_51 = arith.constant 0 : index
    %c0_52 = arith.constant 0 : index
    %114 = vector.load %arg9[%c0_51, %c0_52] : memref<1x64xf32, #tpu.memory_space<vmem>>, vector<1x64xf32>
    %115 = vector.broadcast %114 : vector<1x64xf32> to vector<8x64xf32>
    %116 = arith.addf %113, %115 : vector<8x64xf32>
    %cst_53 = arith.constant 0.000000e+00 : f32
    %117 = vector.broadcast %cst_53 : f32 to vector<8x64xf32>
    %118 = arith.maximumf %116, %117 : vector<8x64xf32>
    %119 = arith.truncf %118 : vector<8x64xf32> to vector<8x64xbf16>
    %c0_54 = arith.constant 0 : index
    %c0_55 = arith.constant 0 : index
    %120 = vector.load %arg10[%c0_54, %c0_55] : memref<64x32xbf16, #tpu.memory_space<vmem>>, vector<64x32xbf16>
    %cst_56 = arith.constant dense<0.000000e+00> : vector<8x32xf32>
    %121 = tpu.matmul %119, %120, %cst_56 {dimension_numbers = #tpu.dot_dimension_numbers<[1], [0], [0], [1], [0, 0, 1, 1], [], []>} : vector<8x64xbf16>, vector<64x32xbf16>, vector<8x32xf32> -> vector<8x32xf32>
    %c0_57 = arith.constant 0 : index
    %c0_58 = arith.constant 0 : index
    %122 = vector.load %arg11[%c0_57, %c0_58] : memref<1x32xf32, #tpu.memory_space<vmem>>, vector<1x32xf32>
    %123 = vector.broadcast %122 : vector<1x32xf32> to vector<8x32xf32>
    %124 = arith.addf %121, %123 : vector<8x32xf32>
    %125 = arith.addf %110, %124 : vector<8x32xf32>
    %c0_59 = arith.constant 0 : index
    %c0_60 = arith.constant 0 : index
    %126 = vector.load %arg12[%c0_59, %c0_60] : memref<1x32xf32, #tpu.memory_space<vmem>>, vector<1x32xf32>
    %c0_61 = arith.constant 0 : index
    %c0_62 = arith.constant 0 : index
    %127 = vector.load %arg13[%c0_61, %c0_62] : memref<1x32xf32, #tpu.memory_space<vmem>>, vector<1x32xf32>
    %cst_63 = arith.constant dense<0.000000e+00> : vector<8xf32>
    %128 = vector.multi_reduction <add>, %125, %cst_63 [1] : vector<8x32xf32> to vector<8xf32>
    %129 = vector.shape_cast %128 : vector<8xf32> to vector<8x1xf32>
    %cst_64 = arith.constant 3.200000e+01 : f32
    %130 = vector.broadcast %cst_64 : f32 to vector<8x1xf32>
    %131 = arith.divf %129, %130 : vector<8x1xf32>
    %132 = vector.broadcast %131 : vector<8x1xf32> to vector<8x32xf32>
    %133 = arith.subf %125, %132 : vector<8x32xf32>
    %134 = arith.mulf %133, %133 : vector<8x32xf32>
    %cst_65 = arith.constant dense<0.000000e+00> : vector<8xf32>
    %135 = vector.multi_reduction <add>, %134, %cst_65 [1] : vector<8x32xf32> to vector<8xf32>
    %136 = vector.shape_cast %135 : vector<8xf32> to vector<8x1xf32>
    %cst_66 = arith.constant 3.200000e+01 : f32
    %137 = vector.broadcast %cst_66 : f32 to vector<8x1xf32>
    %138 = arith.divf %136, %137 : vector<8x1xf32>
    %cst_67 = arith.constant 9.99999974E-6 : f32
    %139 = vector.broadcast %cst_67 : f32 to vector<8x1xf32>
    %140 = arith.addf %138, %139 : vector<8x1xf32>
    %141 = math.rsqrt %140 : vector<8x1xf32>
    %142 = vector.broadcast %131 : vector<8x1xf32> to vector<8x32xf32>
    %143 = arith.subf %125, %142 : vector<8x32xf32>
    %144 = vector.broadcast %141 : vector<8x1xf32> to vector<8x32xf32>
    %145 = arith.mulf %143, %144 : vector<8x32xf32>
    %146 = vector.broadcast %126 : vector<1x32xf32> to vector<8x32xf32>
    %147 = arith.mulf %145, %146 : vector<8x32xf32>
    %148 = vector.broadcast %127 : vector<1x32xf32> to vector<8x32xf32>
    %149 = arith.addf %147, %148 : vector<8x32xf32>
    %150 = arith.truncf %149 : vector<8x32xf32> to vector<8x32xbf16>
    %c0_68 = arith.constant 0 : index
    %c0_69 = arith.constant 0 : index
    %151 = vector.load %arg2[%c0_68, %c0_69] : memref<32x96xbf16, #tpu.memory_space<vmem>>, vector<32x96xbf16>
    %cst_70 = arith.constant dense<0.000000e+00> : vector<8x96xf32>
    %152 = tpu.matmul %150, %151, %cst_70 {dimension_numbers = #tpu.dot_dimension_numbers<[1], [0], [0], [1], [0, 0, 1, 1], [], []>} : vector<8x32xbf16>, vector<32x96xbf16>, vector<8x96xf32> -> vector<8x96xf32>
    %c0_71 = arith.constant 0 : index
    %c0_72 = arith.constant 0 : index
    %153 = vector.load %arg3[%c0_71, %c0_72] : memref<1x96xf32, #tpu.memory_space<vmem>>, vector<1x96xf32>
    %154 = vector.broadcast %153 : vector<1x96xf32> to vector<8x96xf32>
    %155 = arith.addf %152, %154 : vector<8x96xf32>
    %156 = arith.truncf %155 : vector<8x96xf32> to vector<8x96xbf16>
    %157 = vector.shape_cast %156 : vector<8x96xbf16> to vector<1x8x96xbf16>
    %158 = vector.extract_strided_slice %157 {offsets = [0, 0, 0], sizes = [1, 8, 8], strides = [1, 1, 1]} : vector<1x8x96xbf16> to vector<1x8x8xbf16>
    %159 = vector.extract_strided_slice %157 {offsets = [0, 0, 32], sizes = [1, 8, 8], strides = [1, 1, 1]} : vector<1x8x96xbf16> to vector<1x8x8xbf16>
    %160 = vector.extract_strided_slice %157 {offsets = [0, 0, 64], sizes = [1, 8, 8], strides = [1, 1, 1]} : vector<1x8x96xbf16> to vector<1x8x8xbf16>
    "tpu.trace_start"() <{level = 10 : i32, message = "bqe,bke->bqk"}> : () -> ()
    %cst_73 = arith.constant dense<0.000000e+00> : vector<1x8x8xf32>
    %161 = tpu.matmul %158, %159, %cst_73 {dimension_numbers = #tpu.dot_dimension_numbers<[2], [2], [1], [1], [0, 0, 0, 1, 1, 1], [0], [0]>} : vector<1x8x8xbf16>, vector<1x8x8xbf16>, vector<1x8x8xf32> -> vector<1x8x8xf32>
    "tpu.trace_stop"() : () -> ()
    %cst_74 = arith.constant dense<0xFF800000> : vector<1x8xf32>
    %162 = vector.multi_reduction <maximumf>, %161, %cst_74 [2] : vector<1x8x8xf32> to vector<1x8xf32>
    %163 = vector.shape_cast %162 : vector<1x8xf32> to vector<1x8x1xf32>
    %164 = vector.broadcast %163 : vector<1x8x1xf32> to vector<1x8x8xf32>
    %165 = arith.subf %161, %164 : vector<1x8x8xf32>
    %166 = math.exp %165 : vector<1x8x8xf32>
    %cst_75 = arith.constant dense<0.000000e+00> : vector<1x8xf32>
    %167 = vector.multi_reduction <add>, %166, %cst_75 [2] : vector<1x8x8xf32> to vector<1x8xf32>
    %168 = vector.shape_cast %167 : vector<1x8xf32> to vector<1x8x1xf32>
    %169 = tpu.reciprocal %168 {approx = true} : vector<1x8x1xf32> -> vector<1x8x1xf32>
    %170 = vector.broadcast %169 : vector<1x8x1xf32> to vector<1x8x8xf32>
    %171 = arith.mulf %166, %170 : vector<1x8x8xf32>
    %172 = arith.truncf %171 : vector<1x8x8xf32> to vector<1x8x8xbf16>
    "tpu.trace_start"() <{level = 10 : i32, message = "bqk,bke->bqe"}> : () -> ()
    %cst_76 = arith.constant dense<0.000000e+00> : vector<1x8x8xf32>
    %173 = tpu.matmul %172, %160, %cst_76 {dimension_numbers = #tpu.dot_dimension_numbers<[2], [1], [1], [2], [0, 0, 0, 1, 1, 2], [0], [0]>} : vector<1x8x8xbf16>, vector<1x8x8xbf16>, vector<1x8x8xf32> -> vector<1x8x8xf32>
    "tpu.trace_stop"() : () -> ()
    %c0_77 = arith.constant 0 : index
    %c0_78 = arith.constant 0 : index
    %c0_79 = arith.constant 0 : index
    %174 = vector.load %arg15[%c0_77, %c0_78, %c0_79] : memref<1x8x32xf32, #tpu.memory_space<vmem>>, vector<1x8x8xf32>
    tpu.vector_store %arg15[%c0_77, %c0_78, %c0_79], %173 {strides = array<i32>} : memref<1x8x32xf32, #tpu.memory_space<vmem>>, vector<1x8x8xf32>,
    %175 = vector.extract_strided_slice %157 {offsets = [0, 0, 8], sizes = [1, 8, 8], strides = [1, 1, 1]} : vector<1x8x96xbf16> to vector<1x8x8xbf16>
    %176 = vector.extract_strided_slice %157 {offsets = [0, 0, 40], sizes = [1, 8, 8], strides = [1, 1, 1]} : vector<1x8x96xbf16> to vector<1x8x8xbf16>
    %177 = vector.extract_strided_slice %157 {offsets = [0, 0, 72], sizes = [1, 8, 8], strides = [1, 1, 1]} : vector<1x8x96xbf16> to vector<1x8x8xbf16>
    "tpu.trace_start"() <{level = 10 : i32, message = "bqe,bke->bqk"}> : () -> ()
    %cst_80 = arith.constant dense<0.000000e+00> : vector<1x8x8xf32>
    %178 = tpu.matmul %175, %176, %cst_80 {dimension_numbers = #tpu.dot_dimension_numbers<[2], [2], [1], [1], [0, 0, 0, 1, 1, 1], [0], [0]>} : vector<1x8x8xbf16>, vector<1x8x8xbf16>, vector<1x8x8xf32> -> vector<1x8x8xf32>
    "tpu.trace_stop"() : () -> ()
    %cst_81 = arith.constant dense<0xFF800000> : vector<1x8xf32>
    %179 = vector.multi_reduction <maximumf>, %178, %cst_81 [2] : vector<1x8x8xf32> to vector<1x8xf32>
    %180 = vector.shape_cast %179 : vector<1x8xf32> to vector<1x8x1xf32>
    %181 = vector.broadcast %180 : vector<1x8x1xf32> to vector<1x8x8xf32>
    %182 = arith.subf %178, %181 : vector<1x8x8xf32>
    %183 = math.exp %182 : vector<1x8x8xf32>
    %cst_82 = arith.constant dense<0.000000e+00> : vector<1x8xf32>
    %184 = vector.multi_reduction <add>, %183, %cst_82 [2] : vector<1x8x8xf32> to vector<1x8xf32>
    %185 = vector.shape_cast %184 : vector<1x8xf32> to vector<1x8x1xf32>
    %186 = tpu.reciprocal %185 {approx = true} : vector<1x8x1xf32> -> vector<1x8x1xf32>
    %187 = vector.broadcast %186 : vector<1x8x1xf32> to vector<1x8x8xf32>
    %188 = arith.mulf %183, %187 : vector<1x8x8xf32>
    %189 = arith.truncf %188 : vector<1x8x8xf32> to vector<1x8x8xbf16>
    "tpu.trace_start"() <{level = 10 : i32, message = "bqk,bke->bqe"}> : () -> ()
    %cst_83 = arith.constant dense<0.000000e+00> : vector<1x8x8xf32>
    %190 = tpu.matmul %189, %177, %cst_83 {dimension_numbers = #tpu.dot_dimension_numbers<[2], [1], [1], [2], [0, 0, 0, 1, 1, 2], [0], [0]>} : vector<1x8x8xbf16>, vector<1x8x8xbf16>, vector<1x8x8xf32> -> vector<1x8x8xf32>
    "tpu.trace_stop"() : () -> ()
    %c0_84 = arith.constant 0 : index
    %c0_85 = arith.constant 0 : index
    %c8_86 = arith.constant 8 : index
    %191 = vector.load %arg15[%c0_84, %c0_85, %c8_86] : memref<1x8x32xf32, #tpu.memory_space<vmem>>, vector<1x8x8xf32>
    tpu.vector_store %arg15[%c0_84, %c0_85, %c8_86], %190 {strides = array<i32>} : memref<1x8x32xf32, #tpu.memory_space<vmem>>, vector<1x8x8xf32>,
    %192 = vector.extract_strided_slice %157 {offsets = [0, 0, 16], sizes = [1, 8, 8], strides = [1, 1, 1]} : vector<1x8x96xbf16> to vector<1x8x8xbf16>
    %193 = vector.extract_strided_slice %157 {offsets = [0, 0, 48], sizes = [1, 8, 8], strides = [1, 1, 1]} : vector<1x8x96xbf16> to vector<1x8x8xbf16>
    %194 = vector.extract_strided_slice %157 {offsets = [0, 0, 80], sizes = [1, 8, 8], strides = [1, 1, 1]} : vector<1x8x96xbf16> to vector<1x8x8xbf16>
    "tpu.trace_start"() <{level = 10 : i32, message = "bqe,bke->bqk"}> : () -> ()
    %cst_87 = arith.constant dense<0.000000e+00> : vector<1x8x8xf32>
    %195 = tpu.matmul %192, %193, %cst_87 {dimension_numbers = #tpu.dot_dimension_numbers<[2], [2], [1], [1], [0, 0, 0, 1, 1, 1], [0], [0]>} : vector<1x8x8xbf16>, vector<1x8x8xbf16>, vector<1x8x8xf32> -> vector<1x8x8xf32>
    "tpu.trace_stop"() : () -> ()
    %cst_88 = arith.constant dense<0xFF800000> : vector<1x8xf32>
    %196 = vector.multi_reduction <maximumf>, %195, %cst_88 [2] : vector<1x8x8xf32> to vector<1x8xf32>
    %197 = vector.shape_cast %196 : vector<1x8xf32> to vector<1x8x1xf32>
    %198 = vector.broadcast %197 : vector<1x8x1xf32> to vector<1x8x8xf32>
    %199 = arith.subf %195, %198 : vector<1x8x8xf32>
    %200 = math.exp %199 : vector<1x8x8xf32>
    %cst_89 = arith.constant dense<0.000000e+00> : vector<1x8xf32>
    %201 = vector.multi_reduction <add>, %200, %cst_89 [2] : vector<1x8x8xf32> to vector<1x8xf32>
    %202 = vector.shape_cast %201 : vector<1x8xf32> to vector<1x8x1xf32>
    %203 = tpu.reciprocal %202 {approx = true} : vector<1x8x1xf32> -> vector<1x8x1xf32>
    %204 = vector.broadcast %203 : vector<1x8x1xf32> to vector<1x8x8xf32>
    %205 = arith.mulf %200, %204 : vector<1x8x8xf32>
    %206 = arith.truncf %205 : vector<1x8x8xf32> to vector<1x8x8xbf16>
    "tpu.trace_start"() <{level = 10 : i32, message = "bqk,bke->bqe"}> : () -> ()
    %cst_90 = arith.constant dense<0.000000e+00> : vector<1x8x8xf32>
    %207 = tpu.matmul %206, %194, %cst_90 {dimension_numbers = #tpu.dot_dimension_numbers<[2], [1], [1], [2], [0, 0, 0, 1, 1, 2], [0], [0]>} : vector<1x8x8xbf16>, vector<1x8x8xbf16>, vector<1x8x8xf32> -> vector<1x8x8xf32>
    "tpu.trace_stop"() : () -> ()
    %c0_91 = arith.constant 0 : index
    %c0_92 = arith.constant 0 : index
    %c16_93 = arith.constant 16 : index
    %208 = vector.load %arg15[%c0_91, %c0_92, %c16_93] : memref<1x8x32xf32, #tpu.memory_space<vmem>>, vector<1x8x8xf32>
    tpu.vector_store %arg15[%c0_91, %c0_92, %c16_93], %207 {strides = array<i32>} : memref<1x8x32xf32, #tpu.memory_space<vmem>>, vector<1x8x8xf32>,
    %209 = vector.extract_strided_slice %157 {offsets = [0, 0, 24], sizes = [1, 8, 8], strides = [1, 1, 1]} : vector<1x8x96xbf16> to vector<1x8x8xbf16>
    %210 = vector.extract_strided_slice %157 {offsets = [0, 0, 56], sizes = [1, 8, 8], strides = [1, 1, 1]} : vector<1x8x96xbf16> to vector<1x8x8xbf16>
    %211 = vector.extract_strided_slice %157 {offsets = [0, 0, 88], sizes = [1, 8, 8], strides = [1, 1, 1]} : vector<1x8x96xbf16> to vector<1x8x8xbf16>
    "tpu.trace_start"() <{level = 10 : i32, message = "bqe,bke->bqk"}> : () -> ()
    %cst_94 = arith.constant dense<0.000000e+00> : vector<1x8x8xf32>
    %212 = tpu.matmul %209, %210, %cst_94 {dimension_numbers = #tpu.dot_dimension_numbers<[2], [2], [1], [1], [0, 0, 0, 1, 1, 1], [0], [0]>} : vector<1x8x8xbf16>, vector<1x8x8xbf16>, vector<1x8x8xf32> -> vector<1x8x8xf32>
    "tpu.trace_stop"() : () -> ()
    %cst_95 = arith.constant dense<0xFF800000> : vector<1x8xf32>
    %213 = vector.multi_reduction <maximumf>, %212, %cst_95 [2] : vector<1x8x8xf32> to vector<1x8xf32>
    %214 = vector.shape_cast %213 : vector<1x8xf32> to vector<1x8x1xf32>
    %215 = vector.broadcast %214 : vector<1x8x1xf32> to vector<1x8x8xf32>
    %216 = arith.subf %212, %215 : vector<1x8x8xf32>
    %217 = math.exp %216 : vector<1x8x8xf32>
    %cst_96 = arith.constant dense<0.000000e+00> : vector<1x8xf32>
    %218 = vector.multi_reduction <add>, %217, %cst_96 [2] : vector<1x8x8xf32> to vector<1x8xf32>
    %219 = vector.shape_cast %218 : vector<1x8xf32> to vector<1x8x1xf32>
    %220 = tpu.reciprocal %219 {approx = true} : vector<1x8x1xf32> -> vector<1x8x1xf32>
    %221 = vector.broadcast %220 : vector<1x8x1xf32> to vector<1x8x8xf32>
    %222 = arith.mulf %217, %221 : vector<1x8x8xf32>
    %223 = arith.truncf %222 : vector<1x8x8xf32> to vector<1x8x8xbf16>
    "tpu.trace_start"() <{level = 10 : i32, message = "bqk,bke->bqe"}> : () -> ()
    %cst_97 = arith.constant dense<0.000000e+00> : vector<1x8x8xf32>
    %224 = tpu.matmul %223, %211, %cst_97 {dimension_numbers = #tpu.dot_dimension_numbers<[2], [1], [1], [2], [0, 0, 0, 1, 1, 2], [0], [0]>} : vector<1x8x8xbf16>, vector<1x8x8xbf16>, vector<1x8x8xf32> -> vector<1x8x8xf32>
    "tpu.trace_stop"() : () -> ()
    %c0_98 = arith.constant 0 : index
    %c0_99 = arith.constant 0 : index
    %c24_100 = arith.constant 24 : index
    %225 = vector.load %arg15[%c0_98, %c0_99, %c24_100] : memref<1x8x32xf32, #tpu.memory_space<vmem>>, vector<1x8x8xf32>
    tpu.vector_store %arg15[%c0_98, %c0_99, %c24_100], %224 {strides = array<i32>} : memref<1x8x32xf32, #tpu.memory_space<vmem>>, vector<1x8x8xf32>,
    %c0_101 = arith.constant 0 : index
    %c0_102 = arith.constant 0 : index
    %c0_103 = arith.constant 0 : index
    %226 = vector.load %arg15[%c0_101, %c0_102, %c0_103] : memref<1x8x32xf32, #tpu.memory_space<vmem>>, vector<1x8x32xf32>
    %227 = vector.shape_cast %226 : vector<1x8x32xf32> to vector<8x32xf32>
    %228 = arith.truncf %227 : vector<8x32xf32> to vector<8x32xbf16>
    %c0_104 = arith.constant 0 : index
    %c0_105 = arith.constant 0 : index
    %229 = vector.load %arg4[%c0_104, %c0_105] : memref<32x32xbf16, #tpu.memory_space<vmem>>, vector<32x32xbf16>
    %cst_106 = arith.constant dense<0.000000e+00> : vector<8x32xf32>
    %230 = tpu.matmul %228, %229, %cst_106 {dimension_numbers = #tpu.dot_dimension_numbers<[1], [0], [0], [1], [0, 0, 1, 1], [], []>} : vector<8x32xbf16>, vector<32x32xbf16>, vector<8x32xf32> -> vector<8x32xf32>
    %c0_107 = arith.constant 0 : index
    %c0_108 = arith.constant 0 : index
    %231 = vector.load %arg5[%c0_107, %c0_108] : memref<1x32xf32, #tpu.memory_space<vmem>>, vector<1x32xf32>
    %232 = vector.broadcast %231 : vector<1x32xf32> to vector<8x32xf32>
    %233 = arith.addf %230, %232 : vector<8x32xf32>
    %234 = arith.addf %149, %233 : vector<8x32xf32>
    %c0_109 = arith.constant 0 : index
    %c0_110 = arith.constant 0 : index
    %235 = vector.load %arg6[%c0_109, %c0_110] : memref<1x32xf32, #tpu.memory_space<vmem>>, vector<1x32xf32>
    %c0_111 = arith.constant 0 : index
    %c0_112 = arith.constant 0 : index
    %236 = vector.load %arg7[%c0_111, %c0_112] : memref<1x32xf32, #tpu.memory_space<vmem>>, vector<1x32xf32>
    %cst_113 = arith.constant dense<0.000000e+00> : vector<8xf32>
    %237 = vector.multi_reduction <add>, %234, %cst_113 [1] : vector<8x32xf32> to vector<8xf32>
    %238 = vector.shape_cast %237 : vector<8xf32> to vector<8x1xf32>
    %cst_114 = arith.constant 3.200000e+01 : f32
    %239 = vector.broadcast %cst_114 : f32 to vector<8x1xf32>
    %240 = arith.divf %238, %239 : vector<8x1xf32>
    %241 = vector.broadcast %240 : vector<8x1xf32> to vector<8x32xf32>
    %242 = arith.subf %234, %241 : vector<8x32xf32>
    %243 = arith.mulf %242, %242 : vector<8x32xf32>
    %cst_115 = arith.constant dense<0.000000e+00> : vector<8xf32>
    %244 = vector.multi_reduction <add>, %243, %cst_115 [1] : vector<8x32xf32> to vector<8xf32>
    %245 = vector.shape_cast %244 : vector<8xf32> to vector<8x1xf32>
    %cst_116 = arith.constant 3.200000e+01 : f32
    %246 = vector.broadcast %cst_116 : f32 to vector<8x1xf32>
    %247 = arith.divf %245, %246 : vector<8x1xf32>
    %cst_117 = arith.constant 9.99999974E-6 : f32
    %248 = vector.broadcast %cst_117 : f32 to vector<8x1xf32>
    %249 = arith.addf %247, %248 : vector<8x1xf32>
    %250 = math.rsqrt %249 : vector<8x1xf32>
    %251 = vector.broadcast %240 : vector<8x1xf32> to vector<8x32xf32>
    %252 = arith.subf %234, %251 : vector<8x32xf32>
    %253 = vector.broadcast %250 : vector<8x1xf32> to vector<8x32xf32>
    %254 = arith.mulf %252, %253 : vector<8x32xf32>
    %255 = vector.broadcast %235 : vector<1x32xf32> to vector<8x32xf32>
    %256 = arith.mulf %254, %255 : vector<8x32xf32>
    %257 = vector.broadcast %236 : vector<1x32xf32> to vector<8x32xf32>
    %258 = arith.addf %256, %257 : vector<8x32xf32>
    %259 = arith.truncf %258 : vector<8x32xf32> to vector<8x32xbf16>
    %c0_118 = arith.constant 0 : index
    %c0_119 = arith.constant 0 : index
    %260 = vector.load %arg8[%c0_118, %c0_119] : memref<32x64xbf16, #tpu.memory_space<vmem>>, vector<32x64xbf16>
    %cst_120 = arith.constant dense<0.000000e+00> : vector<8x64xf32>
    %261 = tpu.matmul %259, %260, %cst_120 {dimension_numbers = #tpu.dot_dimension_numbers<[1], [0], [0], [1], [0, 0, 1, 1], [], []>} : vector<8x32xbf16>, vector<32x64xbf16>, vector<8x64xf32> -> vector<8x64xf32>
    %c0_121 = arith.constant 0 : index
    %c0_122 = arith.constant 0 : index
    %262 = vector.load %arg9[%c0_121, %c0_122] : memref<1x64xf32, #tpu.memory_space<vmem>>, vector<1x64xf32>
    %263 = vector.broadcast %262 : vector<1x64xf32> to vector<8x64xf32>
    %264 = arith.addf %261, %263 : vector<8x64xf32>
    %cst_123 = arith.constant 0.000000e+00 : f32
    %265 = vector.broadcast %cst_123 : f32 to vector<8x64xf32>
    %266 = arith.maximumf %264, %265 : vector<8x64xf32>
    %267 = arith.truncf %266 : vector<8x64xf32> to vector<8x64xbf16>
    %c0_124 = arith.constant 0 : index
    %c0_125 = arith.constant 0 : index
    %268 = vector.load %arg10[%c0_124, %c0_125] : memref<64x32xbf16, #tpu.memory_space<vmem>>, vector<64x32xbf16>
    %cst_126 = arith.constant dense<0.000000e+00> : vector<8x32xf32>
    %269 = tpu.matmul %267, %268, %cst_126 {dimension_numbers = #tpu.dot_dimension_numbers<[1], [0], [0], [1], [0, 0, 1, 1], [], []>} : vector<8x64xbf16>, vector<64x32xbf16>, vector<8x32xf32> -> vector<8x32xf32>
    %c0_127 = arith.constant 0 : index
    %c0_128 = arith.constant 0 : index
    %270 = vector.load %arg11[%c0_127, %c0_128] : memref<1x32xf32, #tpu.memory_space<vmem>>, vector<1x32xf32>
    %271 = vector.broadcast %270 : vector<1x32xf32> to vector<8x32xf32>
    %272 = arith.addf %269, %271 : vector<8x32xf32>
    %273 = arith.addf %258, %272 : vector<8x32xf32>
    %c0_129 = arith.constant 0 : index
    %c0_130 = arith.constant 0 : index
    %274 = vector.load %arg12[%c0_129, %c0_130] : memref<1x32xf32, #tpu.memory_space<vmem>>, vector<1x32xf32>
    %c0_131 = arith.constant 0 : index
    %c0_132 = arith.constant 0 : index
    %275 = vector.load %arg13[%c0_131, %c0_132] : memref<1x32xf32, #tpu.memory_space<vmem>>, vector<1x32xf32>
    %cst_133 = arith.constant dense<0.000000e+00> : vector<8xf32>
    %276 = vector.multi_reduction <add>, %273, %cst_133 [1] : vector<8x32xf32> to vector<8xf32>
    %277 = vector.shape_cast %276 : vector<8xf32> to vector<8x1xf32>
    %cst_134 = arith.constant 3.200000e+01 : f32
    %278 = vector.broadcast %cst_134 : f32 to vector<8x1xf32>
    %279 = arith.divf %277, %278 : vector<8x1xf32>
    %280 = vector.broadcast %279 : vector<8x1xf32> to vector<8x32xf32>
    %281 = arith.subf %273, %280 : vector<8x32xf32>
    %282 = arith.mulf %281, %281 : vector<8x32xf32>
    %cst_135 = arith.constant dense<0.000000e+00> : vector<8xf32>
    %283 = vector.multi_reduction <add>, %282, %cst_135 [1] : vector<8x32xf32> to vector<8xf32>
    %284 = vector.shape_cast %283 : vector<8xf32> to vector<8x1xf32>
    %cst_136 = arith.constant 3.200000e+01 : f32
    %285 = vector.broadcast %cst_136 : f32 to vector<8x1xf32>
    %286 = arith.divf %284, %285 : vector<8x1xf32>
    %cst_137 = arith.constant 9.99999974E-6 : f32
    %287 = vector.broadcast %cst_137 : f32 to vector<8x1xf32>
    %288 = arith.addf %286, %287 : vector<8x1xf32>
    %289 = math.rsqrt %288 : vector<8x1xf32>
    %290 = vector.broadcast %279 : vector<8x1xf32> to vector<8x32xf32>
    %291 = arith.subf %273, %290 : vector<8x32xf32>
    %292 = vector.broadcast %289 : vector<8x1xf32> to vector<8x32xf32>
    %293 = arith.mulf %291, %292 : vector<8x32xf32>
    %294 = vector.broadcast %274 : vector<1x32xf32> to vector<8x32xf32>
    %295 = arith.mulf %293, %294 : vector<8x32xf32>
    %296 = vector.broadcast %275 : vector<1x32xf32> to vector<8x32xf32>
    %297 = arith.addf %295, %296 : vector<8x32xf32>
    %298 = vector.shape_cast %297 : vector<8x32xf32> to vector<1x8x32xf32>
    %c0_138 = arith.constant 0 : index
    %c0_139 = arith.constant 0 : index
    %c0_140 = arith.constant 0 : index
    %299 = vector.load %arg14[%c0_138, %c0_139, %c0_140] : memref<1x8x32xf32, #tpu.memory_space<vmem>>, vector<1x8x32xf32>
    tpu.vector_store %arg14[%c0_138, %c0_139, %c0_140], %298 {strides = array<i32>} : memref<1x8x32xf32, #tpu.memory_space<vmem>>, vector<1x8x32xf32>,
    return
  }
  func.func @transform_0(%arg0: i32) -> (i32, i32, i32) {
    %c0_i32 = arith.constant 0 : i32
    %c0_i32_0 = arith.constant 0 : i32
    %c0_i32_1 = arith.constant 0 : i32
    return %arg0, %c0_i32, %c0_i32_0 : i32, i32, i32
  }
  func.func @transform_1(%arg0: i32) -> (i32, i32) {
    %c0_i32 = arith.constant 0 : i32
    %c0_i32_0 = arith.constant 0 : i32
    %c0_i32_1 = arith.constant 0 : i32
    return %c0_i32, %c0_i32_0 : i32, i32
  }
  func.func @transform_2(%arg0: i32) -> (i32, i32) {
    %c0_i32 = arith.constant 0 : i32
    %c0_i32_0 = arith.constant 0 : i32
    %c0_i32_1 = arith.constant 0 : i32
    return %c0_i32, %c0_i32_0 : i32, i32
  }
  func.func @transform_3(%arg0: i32) -> (i32, i32) {
    %c0_i32 = arith.constant 0 : i32
    %c0_i32_0 = arith.constant 0 : i32
    %c0_i32_1 = arith.constant 0 : i32
    return %c0_i32, %c0_i32_0 : i32, i32
  }
  func.func @transform_4(%arg0: i32) -> (i32, i32) {
    %c0_i32 = arith.constant 0 : i32
    %c0_i32_0 = arith.constant 0 : i32
    %c0_i32_1 = arith.constant 0 : i32
    return %c0_i32, %c0_i32_0 : i32, i32
  }
  func.func @transform_5(%arg0: i32) -> (i32, i32) {
    %c0_i32 = arith.constant 0 : i32
    %c0_i32_0 = arith.constant 0 : i32
    %c0_i32_1 = arith.constant 0 : i32
    return %c0_i32, %c0_i32_0 : i32, i32
  }
  func.func @transform_6(%arg0: i32) -> (i32, i32) {
    %c0_i32 = arith.constant 0 : i32
    %c0_i32_0 = arith.constant 0 : i32
    %c0_i32_1 = arith.constant 0 : i32
    return %c0_i32, %c0_i32_0 : i32, i32
  }
  func.func @transform_7(%arg0: i32) -> (i32, i32) {
    %c0_i32 = arith.constant 0 : i32
    %c0_i32_0 = arith.constant 0 : i32
    %c0_i32_1 = arith.constant 0 : i32
    return %c0_i32, %c0_i32_0 : i32, i32
  }
  func.func @transform_8(%arg0: i32) -> (i32, i32) {
    %c0_i32 = arith.constant 0 : i32
    %c0_i32_0 = arith.constant 0 : i32
    %c0_i32_1 = arith.constant 0 : i32
    return %c0_i32, %c0_i32_0 : i32, i32
  }
  func.func @transform_9(%arg0: i32) -> (i32, i32) {
    %c0_i32 = arith.constant 0 : i32
    %c0_i32_0 = arith.constant 0 : i32
    %c0_i32_1 = arith.constant 0 : i32
    return %c0_i32, %c0_i32_0 : i32, i32
  }
  func.func @transform_10(%arg0: i32) -> (i32, i32) {
    %c0_i32 = arith.constant 0 : i32
    %c0_i32_0 = arith.constant 0 : i32
    %c0_i32_1 = arith.constant 0 : i32
    return %c0_i32, %c0_i32_0 : i32, i32
  }
  func.func @transform_11(%arg0: i32) -> (i32, i32) {
    %c0_i32 = arith.constant 0 : i32
    %c0_i32_0 = arith.constant 0 : i32
    %c0_i32_1 = arith.constant 0 : i32
    return %c0_i32, %c0_i32_0 : i32, i32
  }
  func.func @transform_12(%arg0: i32) -> (i32, i32) {
    %c0_i32 = arith.constant 0 : i32
    %c0_i32_0 = arith.constant 0 : i32
    %c0_i32_1 = arith.constant 0 : i32
    return %c0_i32, %c0_i32_0 : i32, i32
  }
  func.func @transform_13(%arg0: i32) -> (i32, i32, i32) {
    %c0_i32 = arith.constant 0 : i32
    %c0_i32_0 = arith.constant 0 : i32
    %c0_i32_1 = arith.constant 0 : i32
    return %arg0, %c0_i32, %c0_i32_0 : i32, i32, i32
  }
}

module attributes {stable_mosaic.version = 11 : i64} {
  func.func @encoder_stack_kernel(%arg0: i32, %arg1: memref<1x8x32xf32, #tpu.memory_space<vmem>>, %arg2: memref<32x96xbf16, #tpu.memory_space<vmem>>, %arg3: memref<1x96xf32, #tpu.memory_space<vmem>>, %arg4: memref<32x32xbf16, #tpu.memory_space<vmem>>, %arg5: memref<1x32xf32, #tpu.memory_space<vmem>>, %arg6: memref<1x32xf32, #tpu.memory_space<vmem>>, %arg7: memref<1x32xf32, #tpu.memory_space<vmem>>, %arg8: memref<32x64xbf16, #tpu.memory_space<vmem>>, %arg9: memref<1x64xf32, #tpu.memory_space<vmem>>, %arg10: memref<64x32xbf16, #tpu.memory_space<vmem>>, %arg11: memref<1x32xf32, #tpu.memory_space<vmem>>, %arg12: memref<1x32xf32, #tpu.memory_space<vmem>>, %arg13: memref<1x32xf32, #tpu.memory_space<vmem>>, %arg14: memref<1x8x32xf32, #tpu.memory_space<vmem>>, %arg15: memref<1x8x32xf32, #tpu.memory_space<vmem>>) attributes {dimension_semantics = [#tpu.dimension_semantics<parallel>], iteration_bounds = array<i64: 2>, scalar_prefetch = 0 : i64, scratch_operands = 1 : i64, tpu.core_type = #tpu.core_type<tc>, window_params = [{transform_indices = @transform_0, window_bounds = array<i64: 1, 8, 32>}, {pipeline_mode = #tpu.pipeline_mode<synchronous>, transform_indices = @transform_1, window_bounds = array<i64: 32, 96>}, {pipeline_mode = #tpu.pipeline_mode<synchronous>, transform_indices = @transform_2, window_bounds = array<i64: 1, 96>}, {pipeline_mode = #tpu.pipeline_mode<synchronous>, transform_indices = @transform_3, window_bounds = array<i64: 32, 32>}, {pipeline_mode = #tpu.pipeline_mode<synchronous>, transform_indices = @transform_4, window_bounds = array<i64: 1, 32>}, {pipeline_mode = #tpu.pipeline_mode<synchronous>, transform_indices = @transform_5, window_bounds = array<i64: 1, 32>}, {pipeline_mode = #tpu.pipeline_mode<synchronous>, transform_indices = @transform_6, window_bounds = array<i64: 1, 32>}, {pipeline_mode = #tpu.pipeline_mode<synchronous>, transform_indices = @transform_7, window_bounds = array<i64: 32, 64>}, {pipeline_mode = #tpu.pipeline_mode<synchronous>, transform_indices = @transform_8, window_bounds = array<i64: 1, 64>}, {pipeline_mode = #tpu.pipeline_mode<synchronous>, transform_indices = @transform_9, window_bounds = array<i64: 64, 32>}, {pipeline_mode = #tpu.pipeline_mode<synchronous>, transform_indices = @transform_10, window_bounds = array<i64: 1, 32>}, {pipeline_mode = #tpu.pipeline_mode<synchronous>, transform_indices = @transform_11, window_bounds = array<i64: 1, 32>}, {pipeline_mode = #tpu.pipeline_mode<synchronous>, transform_indices = @transform_12, window_bounds = array<i64: 1, 32>}, {transform_indices = @transform_13, window_bounds = array<i64: 1, 8, 32>}]} {
    %c0 = arith.constant 0 : index
    %c0_0 = arith.constant 0 : index
    %c0_1 = arith.constant 0 : index
    %0 = vector.load %arg1[%c0, %c0_0, %c0_1] : memref<1x8x32xf32, #tpu.memory_space<vmem>>, vector<1x8x32xf32>
    %1 = vector.shape_cast %0 : vector<1x8x32xf32> to vector<8x32xf32>
    %2 = arith.truncf %1 : vector<8x32xf32> to vector<8x32xbf16>
    %c0_2 = arith.constant 0 : index
    %c0_3 = arith.constant 0 : index
    %3 = vector.load %arg2[%c0_2, %c0_3] : memref<32x96xbf16, #tpu.memory_space<vmem>>, vector<32x96xbf16>
    %cst = arith.constant dense<0.000000e+00> : vector<8x96xf32>
    %4 = tpu.matmul %2, %3, %cst {dimension_numbers = #tpu.dot_dimension_numbers<[1], [0], [0], [1], [0, 0, 1, 1], [], []>} : vector<8x32xbf16>, vector<32x96xbf16>, vector<8x96xf32> -> vector<8x96xf32>
    %c0_4 = arith.constant 0 : index
    %c0_5 = arith.constant 0 : index
    %5 = vector.load %arg3[%c0_4, %c0_5] : memref<1x96xf32, #tpu.memory_space<vmem>>, vector<1x96xf32>
    %6 = vector.broadcast %5 : vector<1x96xf32> to vector<8x96xf32>
    %7 = arith.addf %4, %6 : vector<8x96xf32>
    %8 = arith.truncf %7 : vector<8x96xf32> to vector<8x96xbf16>
    %9 = vector.shape_cast %8 : vector<8x96xbf16> to vector<1x8x96xbf16>
    %10 = vector.extract_strided_slice %9 {offsets = [0, 0, 0], sizes = [1, 8, 8], strides = [1, 1, 1]} : vector<1x8x96xbf16> to vector<1x8x8xbf16>
    %11 = vector.extract_strided_slice %9 {offsets = [0, 0, 32], sizes = [1, 8, 8], strides = [1, 1, 1]} : vector<1x8x96xbf16> to vector<1x8x8xbf16>
    %12 = vector.extract_strided_slice %9 {offsets = [0, 0, 64], sizes = [1, 8, 8], strides = [1, 1, 1]} : vector<1x8x96xbf16> to vector<1x8x8xbf16>
    "tpu.trace_start"() <{level = 10 : i32, message = "bqe,bke->bqk"}> : () -> ()
    %cst_6 = arith.constant dense<0.000000e+00> : vector<1x8x8xf32>
    %13 = tpu.matmul %10, %11, %cst_6 {dimension_numbers = #tpu.dot_dimension_numbers<[2], [2], [1], [1], [0, 0, 0, 1, 1, 1], [0], [0]>} : vector<1x8x8xbf16>, vector<1x8x8xbf16>, vector<1x8x8xf32> -> vector<1x8x8xf32>
    "tpu.trace_stop"() : () -> ()
    %cst_7 = arith.constant dense<0xFF800000> : vector<1x8xf32>
    %14 = vector.multi_reduction <maximumf>, %13, %cst_7 [2] : vector<1x8x8xf32> to vector<1x8xf32>
    %15 = vector.shape_cast %14 : vector<1x8xf32> to vector<1x8x1xf32>
    %16 = vector.broadcast %15 : vector<1x8x1xf32> to vector<1x8x8xf32>
    %17 = arith.subf %13, %16 : vector<1x8x8xf32>
    %18 = math.exp %17 : vector<1x8x8xf32>
    %cst_8 = arith.constant dense<0.000000e+00> : vector<1x8xf32>
    %19 = vector.multi_reduction <add>, %18, %cst_8 [2] : vector<1x8x8xf32> to vector<1x8xf32>
    %20 = vector.shape_cast %19 : vector<1x8xf32> to vector<1x8x1xf32>
    %21 = tpu.reciprocal %20 {approx = true} : vector<1x8x1xf32> -> vector<1x8x1xf32>
    %22 = vector.broadcast %21 : vector<1x8x1xf32> to vector<1x8x8xf32>
    %23 = arith.mulf %18, %22 : vector<1x8x8xf32>
    %24 = arith.truncf %23 : vector<1x8x8xf32> to vector<1x8x8xbf16>
    "tpu.trace_start"() <{level = 10 : i32, message = "bqk,bke->bqe"}> : () -> ()
    %cst_9 = arith.constant dense<0.000000e+00> : vector<1x8x8xf32>
    %25 = tpu.matmul %24, %12, %cst_9 {dimension_numbers = #tpu.dot_dimension_numbers<[2], [1], [1], [2], [0, 0, 0, 1, 1, 2], [0], [0]>} : vector<1x8x8xbf16>, vector<1x8x8xbf16>, vector<1x8x8xf32> -> vector<1x8x8xf32>
    "tpu.trace_stop"() : () -> ()
    %c0_10 = arith.constant 0 : index
    %c0_11 = arith.constant 0 : index
    %c0_12 = arith.constant 0 : index
    %26 = vector.load %arg15[%c0_10, %c0_11, %c0_12] : memref<1x8x32xf32, #tpu.memory_space<vmem>>, vector<1x8x8xf32>
    tpu.vector_store %arg15[%c0_10, %c0_11, %c0_12], %25 {strides = array<i32>} : memref<1x8x32xf32, #tpu.memory_space<vmem>>, vector<1x8x8xf32>,
    %27 = vector.extract_strided_slice %9 {offsets = [0, 0, 8], sizes = [1, 8, 8], strides = [1, 1, 1]} : vector<1x8x96xbf16> to vector<1x8x8xbf16>
    %28 = vector.extract_strided_slice %9 {offsets = [0, 0, 40], sizes = [1, 8, 8], strides = [1, 1, 1]} : vector<1x8x96xbf16> to vector<1x8x8xbf16>
    %29 = vector.extract_strided_slice %9 {offsets = [0, 0, 72], sizes = [1, 8, 8], strides = [1, 1, 1]} : vector<1x8x96xbf16> to vector<1x8x8xbf16>
    "tpu.trace_start"() <{level = 10 : i32, message = "bqe,bke->bqk"}> : () -> ()
    %cst_13 = arith.constant dense<0.000000e+00> : vector<1x8x8xf32>
    %30 = tpu.matmul %27, %28, %cst_13 {dimension_numbers = #tpu.dot_dimension_numbers<[2], [2], [1], [1], [0, 0, 0, 1, 1, 1], [0], [0]>} : vector<1x8x8xbf16>, vector<1x8x8xbf16>, vector<1x8x8xf32> -> vector<1x8x8xf32>
    "tpu.trace_stop"() : () -> ()
    %cst_14 = arith.constant dense<0xFF800000> : vector<1x8xf32>
    %31 = vector.multi_reduction <maximumf>, %30, %cst_14 [2] : vector<1x8x8xf32> to vector<1x8xf32>
    %32 = vector.shape_cast %31 : vector<1x8xf32> to vector<1x8x1xf32>
    %33 = vector.broadcast %32 : vector<1x8x1xf32> to vector<1x8x8xf32>
    %34 = arith.subf %30, %33 : vector<1x8x8xf32>
    %35 = math.exp %34 : vector<1x8x8xf32>
    %cst_15 = arith.constant dense<0.000000e+00> : vector<1x8xf32>
    %36 = vector.multi_reduction <add>, %35, %cst_15 [2] : vector<1x8x8xf32> to vector<1x8xf32>
    %37 = vector.shape_cast %36 : vector<1x8xf32> to vector<1x8x1xf32>
    %38 = tpu.reciprocal %37 {approx = true} : vector<1x8x1xf32> -> vector<1x8x1xf32>
    %39 = vector.broadcast %38 : vector<1x8x1xf32> to vector<1x8x8xf32>
    %40 = arith.mulf %35, %39 : vector<1x8x8xf32>
    %41 = arith.truncf %40 : vector<1x8x8xf32> to vector<1x8x8xbf16>
    "tpu.trace_start"() <{level = 10 : i32, message = "bqk,bke->bqe"}> : () -> ()
    %cst_16 = arith.constant dense<0.000000e+00> : vector<1x8x8xf32>
    %42 = tpu.matmul %41, %29, %cst_16 {dimension_numbers = #tpu.dot_dimension_numbers<[2], [1], [1], [2], [0, 0, 0, 1, 1, 2], [0], [0]>} : vector<1x8x8xbf16>, vector<1x8x8xbf16>, vector<1x8x8xf32> -> vector<1x8x8xf32>
    "tpu.trace_stop"() : () -> ()
    %c0_17 = arith.constant 0 : index
    %c0_18 = arith.constant 0 : index
    %c8 = arith.constant 8 : index
    %43 = vector.load %arg15[%c0_17, %c0_18, %c8] : memref<1x8x32xf32, #tpu.memory_space<vmem>>, vector<1x8x8xf32>
    tpu.vector_store %arg15[%c0_17, %c0_18, %c8], %42 {strides = array<i32>} : memref<1x8x32xf32, #tpu.memory_space<vmem>>, vector<1x8x8xf32>,
    %44 = vector.extract_strided_slice %9 {offsets = [0, 0, 16], sizes = [1, 8, 8], strides = [1, 1, 1]} : vector<1x8x96xbf16> to vector<1x8x8xbf16>
    %45 = vector.extract_strided_slice %9 {offsets = [0, 0, 48], sizes = [1, 8, 8], strides = [1, 1, 1]} : vector<1x8x96xbf16> to vector<1x8x8xbf16>
    %46 = vector.extract_strided_slice %9 {offsets = [0, 0, 80], sizes = [1, 8, 8], strides = [1, 1, 1]} : vector<1x8x96xbf16> to vector<1x8x8xbf16>
    "tpu.trace_start"() <{level = 10 : i32, message = "bqe,bke->bqk"}> : () -> ()
    %cst_19 = arith.constant dense<0.000000e+00> : vector<1x8x8xf32>
    %47 = tpu.matmul %44, %45, %cst_19 {dimension_numbers = #tpu.dot_dimension_numbers<[2], [2], [1], [1], [0, 0, 0, 1, 1, 1], [0], [0]>} : vector<1x8x8xbf16>, vector<1x8x8xbf16>, vector<1x8x8xf32> -> vector<1x8x8xf32>
    "tpu.trace_stop"() : () -> ()
    %cst_20 = arith.constant dense<0xFF800000> : vector<1x8xf32>
    %48 = vector.multi_reduction <maximumf>, %47, %cst_20 [2] : vector<1x8x8xf32> to vector<1x8xf32>
    %49 = vector.shape_cast %48 : vector<1x8xf32> to vector<1x8x1xf32>
    %50 = vector.broadcast %49 : vector<1x8x1xf32> to vector<1x8x8xf32>
    %51 = arith.subf %47, %50 : vector<1x8x8xf32>
    %52 = math.exp %51 : vector<1x8x8xf32>
    %cst_21 = arith.constant dense<0.000000e+00> : vector<1x8xf32>
    %53 = vector.multi_reduction <add>, %52, %cst_21 [2] : vector<1x8x8xf32> to vector<1x8xf32>
    %54 = vector.shape_cast %53 : vector<1x8xf32> to vector<1x8x1xf32>
    %55 = tpu.reciprocal %54 {approx = true} : vector<1x8x1xf32> -> vector<1x8x1xf32>
    %56 = vector.broadcast %55 : vector<1x8x1xf32> to vector<1x8x8xf32>
    %57 = arith.mulf %52, %56 : vector<1x8x8xf32>
    %58 = arith.truncf %57 : vector<1x8x8xf32> to vector<1x8x8xbf16>
    "tpu.trace_start"() <{level = 10 : i32, message = "bqk,bke->bqe"}> : () -> ()
    %cst_22 = arith.constant dense<0.000000e+00> : vector<1x8x8xf32>
    %59 = tpu.matmul %58, %46, %cst_22 {dimension_numbers = #tpu.dot_dimension_numbers<[2], [1], [1], [2], [0, 0, 0, 1, 1, 2], [0], [0]>} : vector<1x8x8xbf16>, vector<1x8x8xbf16>, vector<1x8x8xf32> -> vector<1x8x8xf32>
    "tpu.trace_stop"() : () -> ()
    %c0_23 = arith.constant 0 : index
    %c0_24 = arith.constant 0 : index
    %c16 = arith.constant 16 : index
    %60 = vector.load %arg15[%c0_23, %c0_24, %c16] : memref<1x8x32xf32, #tpu.memory_space<vmem>>, vector<1x8x8xf32>
    tpu.vector_store %arg15[%c0_23, %c0_24, %c16], %59 {strides = array<i32>} : memref<1x8x32xf32, #tpu.memory_space<vmem>>, vector<1x8x8xf32>,
    %61 = vector.extract_strided_slice %9 {offsets = [0, 0, 24], sizes = [1, 8, 8], strides = [1, 1, 1]} : vector<1x8x96xbf16> to vector<1x8x8xbf16>
    %62 = vector.extract_strided_slice %9 {offsets = [0, 0, 56], sizes = [1, 8, 8], strides = [1, 1, 1]} : vector<1x8x96xbf16> to vector<1x8x8xbf16>
    %63 = vector.extract_strided_slice %9 {offsets = [0, 0, 88], sizes = [1, 8, 8], strides = [1, 1, 1]} : vector<1x8x96xbf16> to vector<1x8x8xbf16>
    "tpu.trace_start"() <{level = 10 : i32, message = "bqe,bke->bqk"}> : () -> ()
    %cst_25 = arith.constant dense<0.000000e+00> : vector<1x8x8xf32>
    %64 = tpu.matmul %61, %62, %cst_25 {dimension_numbers = #tpu.dot_dimension_numbers<[2], [2], [1], [1], [0, 0, 0, 1, 1, 1], [0], [0]>} : vector<1x8x8xbf16>, vector<1x8x8xbf16>, vector<1x8x8xf32> -> vector<1x8x8xf32>
    "tpu.trace_stop"() : () -> ()
    %cst_26 = arith.constant dense<0xFF800000> : vector<1x8xf32>
    %65 = vector.multi_reduction <maximumf>, %64, %cst_26 [2] : vector<1x8x8xf32> to vector<1x8xf32>
    %66 = vector.shape_cast %65 : vector<1x8xf32> to vector<1x8x1xf32>
    %67 = vector.broadcast %66 : vector<1x8x1xf32> to vector<1x8x8xf32>
    %68 = arith.subf %64, %67 : vector<1x8x8xf32>
    %69 = math.exp %68 : vector<1x8x8xf32>
    %cst_27 = arith.constant dense<0.000000e+00> : vector<1x8xf32>
    %70 = vector.multi_reduction <add>, %69, %cst_27 [2] : vector<1x8x8xf32> to vector<1x8xf32>
    %71 = vector.shape_cast %70 : vector<1x8xf32> to vector<1x8x1xf32>
    %72 = tpu.reciprocal %71 {approx = true} : vector<1x8x1xf32> -> vector<1x8x1xf32>
    %73 = vector.broadcast %72 : vector<1x8x1xf32> to vector<1x8x8xf32>
    %74 = arith.mulf %69, %73 : vector<1x8x8xf32>
    %75 = arith.truncf %74 : vector<1x8x8xf32> to vector<1x8x8xbf16>
    "tpu.trace_start"() <{level = 10 : i32, message = "bqk,bke->bqe"}> : () -> ()
    %cst_28 = arith.constant dense<0.000000e+00> : vector<1x8x8xf32>
    %76 = tpu.matmul %75, %63, %cst_28 {dimension_numbers = #tpu.dot_dimension_numbers<[2], [1], [1], [2], [0, 0, 0, 1, 1, 2], [0], [0]>} : vector<1x8x8xbf16>, vector<1x8x8xbf16>, vector<1x8x8xf32> -> vector<1x8x8xf32>
    "tpu.trace_stop"() : () -> ()
    %c0_29 = arith.constant 0 : index
    %c0_30 = arith.constant 0 : index
    %c24 = arith.constant 24 : index
    %77 = vector.load %arg15[%c0_29, %c0_30, %c24] : memref<1x8x32xf32, #tpu.memory_space<vmem>>, vector<1x8x8xf32>
    tpu.vector_store %arg15[%c0_29, %c0_30, %c24], %76 {strides = array<i32>} : memref<1x8x32xf32, #tpu.memory_space<vmem>>, vector<1x8x8xf32>,
    %c0_31 = arith.constant 0 : index
    %c0_32 = arith.constant 0 : index
    %c0_33 = arith.constant 0 : index
    %78 = vector.load %arg15[%c0_31, %c0_32, %c0_33] : memref<1x8x32xf32, #tpu.memory_space<vmem>>, vector<1x8x32xf32>
    %79 = vector.shape_cast %78 : vector<1x8x32xf32> to vector<8x32xf32>
    %80 = arith.truncf %79 : vector<8x32xf32> to vector<8x32xbf16>
    %c0_34 = arith.constant 0 : index
    %c0_35 = arith.constant 0 : index
    %81 = vector.load %arg4[%c0_34, %c0_35] : memref<32x32xbf16, #tpu.memory_space<vmem>>, vector<32x32xbf16>
    %cst_36 = arith.constant dense<0.000000e+00> : vector<8x32xf32>
    %82 = tpu.matmul %80, %81, %cst_36 {dimension_numbers = #tpu.dot_dimension_numbers<[1], [0], [0], [1], [0, 0, 1, 1], [], []>} : vector<8x32xbf16>, vector<32x32xbf16>, vector<8x32xf32> -> vector<8x32xf32>
    %c0_37 = arith.constant 0 : index
    %c0_38 = arith.constant 0 : index
    %83 = vector.load %arg5[%c0_37, %c0_38] : memref<1x32xf32, #tpu.memory_space<vmem>>, vector<1x32xf32>
    %84 = vector.broadcast %83 : vector<1x32xf32> to vector<8x32xf32>
    %85 = arith.addf %82, %84 : vector<8x32xf32>
    %86 = arith.addf %1, %85 : vector<8x32xf32>
    %c0_39 = arith.constant 0 : index
    %c0_40 = arith.constant 0 : index
    %87 = vector.load %arg6[%c0_39, %c0_40] : memref<1x32xf32, #tpu.memory_space<vmem>>, vector<1x32xf32>
    %c0_41 = arith.constant 0 : index
    %c0_42 = arith.constant 0 : index
    %88 = vector.load %arg7[%c0_41, %c0_42] : memref<1x32xf32, #tpu.memory_space<vmem>>, vector<1x32xf32>
    %cst_43 = arith.constant dense<0.000000e+00> : vector<8xf32>
    %89 = vector.multi_reduction <add>, %86, %cst_43 [1] : vector<8x32xf32> to vector<8xf32>
    %90 = vector.shape_cast %89 : vector<8xf32> to vector<8x1xf32>
    %cst_44 = arith.constant 3.200000e+01 : f32
    %91 = vector.broadcast %cst_44 : f32 to vector<8x1xf32>
    %92 = arith.divf %90, %91 : vector<8x1xf32>
    %93 = vector.broadcast %92 : vector<8x1xf32> to vector<8x32xf32>
    %94 = arith.subf %86, %93 : vector<8x32xf32>
    %95 = arith.mulf %94, %94 : vector<8x32xf32>
    %cst_45 = arith.constant dense<0.000000e+00> : vector<8xf32>
    %96 = vector.multi_reduction <add>, %95, %cst_45 [1] : vector<8x32xf32> to vector<8xf32>
    %97 = vector.shape_cast %96 : vector<8xf32> to vector<8x1xf32>
    %cst_46 = arith.constant 3.200000e+01 : f32
    %98 = vector.broadcast %cst_46 : f32 to vector<8x1xf32>
    %99 = arith.divf %97, %98 : vector<8x1xf32>
    %cst_47 = arith.constant 9.99999974E-6 : f32
    %100 = vector.broadcast %cst_47 : f32 to vector<8x1xf32>
    %101 = arith.addf %99, %100 : vector<8x1xf32>
    %102 = math.rsqrt %101 : vector<8x1xf32>
    %103 = vector.broadcast %92 : vector<8x1xf32> to vector<8x32xf32>
    %104 = arith.subf %86, %103 : vector<8x32xf32>
    %105 = vector.broadcast %102 : vector<8x1xf32> to vector<8x32xf32>
    %106 = arith.mulf %104, %105 : vector<8x32xf32>
    %107 = vector.broadcast %87 : vector<1x32xf32> to vector<8x32xf32>
    %108 = arith.mulf %106, %107 : vector<8x32xf32>
    %109 = vector.broadcast %88 : vector<1x32xf32> to vector<8x32xf32>
    %110 = arith.addf %108, %109 : vector<8x32xf32>
    %111 = arith.truncf %110 : vector<8x32xf32> to vector<8x32xbf16>
    %c0_48 = arith.constant 0 : index
    %c0_49 = arith.constant 0 : index
    %112 = vector.load %arg8[%c0_48, %c0_49] : memref<32x64xbf16, #tpu.memory_space<vmem>>, vector<32x64xbf16>
    %cst_50 = arith.constant dense<0.000000e+00> : vector<8x64xf32>
    %113 = tpu.matmul %111, %112, %cst_50 {dimension_numbers = #tpu.dot_dimension_numbers<[1], [0], [0], [1], [0, 0, 1, 1], [], []>} : vector<8x32xbf16>, vector<32x64xbf16>, vector<8x64xf32> -> vector<8x64xf32>
    %c0_51 = arith.constant 0 : index
    %c0_52 = arith.constant 0 : index
    %114 = vector.load %arg9[%c0_51, %c0_52] : memref<1x64xf32, #tpu.memory_space<vmem>>, vector<1x64xf32>
    %115 = vector.broadcast %114 : vector<1x64xf32> to vector<8x64xf32>
    %116 = arith.addf %113, %115 : vector<8x64xf32>
    %cst_53 = arith.constant 0.000000e+00 : f32
    %117 = vector.broadcast %cst_53 : f32 to vector<8x64xf32>
    %118 = arith.maximumf %116, %117 : vector<8x64xf32>
    %119 = arith.truncf %118 : vector<8x64xf32> to vector<8x64xbf16>
    %c0_54 = arith.constant 0 : index
    %c0_55 = arith.constant 0 : index
    %120 = vector.load %arg10[%c0_54, %c0_55] : memref<64x32xbf16, #tpu.memory_space<vmem>>, vector<64x32xbf16>
    %cst_56 = arith.constant dense<0.000000e+00> : vector<8x32xf32>
    %121 = tpu.matmul %119, %120, %cst_56 {dimension_numbers = #tpu.dot_dimension_numbers<[1], [0], [0], [1], [0, 0, 1, 1], [], []>} : vector<8x64xbf16>, vector<64x32xbf16>, vector<8x32xf32> -> vector<8x32xf32>
    %c0_57 = arith.constant 0 : index
    %c0_58 = arith.constant 0 : index
    %122 = vector.load %arg11[%c0_57, %c0_58] : memref<1x32xf32, #tpu.memory_space<vmem>>, vector<1x32xf32>
    %123 = vector.broadcast %122 : vector<1x32xf32> to vector<8x32xf32>
    %124 = arith.addf %121, %123 : vector<8x32xf32>
    %125 = arith.addf %110, %124 : vector<8x32xf32>
    %c0_59 = arith.constant 0 : index
    %c0_60 = arith.constant 0 : index
    %126 = vector.load %arg12[%c0_59, %c0_60] : memref<1x32xf32, #tpu.memory_space<vmem>>, vector<1x32xf32>
    %c0_61 = arith.constant 0 : index
    %c0_62 = arith.constant 0 : index
    %127 = vector.load %arg13[%c0_61, %c0_62] : memref<1x32xf32, #tpu.memory_space<vmem>>, vector<1x32xf32>
    %cst_63 = arith.constant dense<0.000000e+00> : vector<8xf32>
    %128 = vector.multi_reduction <add>, %125, %cst_63 [1] : vector<8x32xf32> to vector<8xf32>
    %129 = vector.shape_cast %128 : vector<8xf32> to vector<8x1xf32>
    %cst_64 = arith.constant 3.200000e+01 : f32
    %130 = vector.broadcast %cst_64 : f32 to vector<8x1xf32>
    %131 = arith.divf %129, %130 : vector<8x1xf32>
    %132 = vector.broadcast %131 : vector<8x1xf32> to vector<8x32xf32>
    %133 = arith.subf %125, %132 : vector<8x32xf32>
    %134 = arith.mulf %133, %133 : vector<8x32xf32>
    %cst_65 = arith.constant dense<0.000000e+00> : vector<8xf32>
    %135 = vector.multi_reduction <add>, %134, %cst_65 [1] : vector<8x32xf32> to vector<8xf32>
    %136 = vector.shape_cast %135 : vector<8xf32> to vector<8x1xf32>
    %cst_66 = arith.constant 3.200000e+01 : f32
    %137 = vector.broadcast %cst_66 : f32 to vector<8x1xf32>
    %138 = arith.divf %136, %137 : vector<8x1xf32>
    %cst_67 = arith.constant 9.99999974E-6 : f32
    %139 = vector.broadcast %cst_67 : f32 to vector<8x1xf32>
    %140 = arith.addf %138, %139 : vector<8x1xf32>
    %141 = math.rsqrt %140 : vector<8x1xf32>
    %142 = vector.broadcast %131 : vector<8x1xf32> to vector<8x32xf32>
    %143 = arith.subf %125, %142 : vector<8x32xf32>
    %144 = vector.broadcast %141 : vector<8x1xf32> to vector<8x32xf32>
    %145 = arith.mulf %143, %144 : vector<8x32xf32>
    %146 = vector.broadcast %126 : vector<1x32xf32> to vector<8x32xf32>
    %147 = arith.mulf %145, %146 : vector<8x32xf32>
    %148 = vector.broadcast %127 : vector<1x32xf32> to vector<8x32xf32>
    %149 = arith.addf %147, %148 : vector<8x32xf32>
    %150 = arith.truncf %149 : vector<8x32xf32> to vector<8x32xbf16>
    %c0_68 = arith.constant 0 : index
    %c0_69 = arith.constant 0 : index
    %151 = vector.load %arg2[%c0_68, %c0_69] : memref<32x96xbf16, #tpu.memory_space<vmem>>, vector<32x96xbf16>
    %cst_70 = arith.constant dense<0.000000e+00> : vector<8x96xf32>
    %152 = tpu.matmul %150, %151, %cst_70 {dimension_numbers = #tpu.dot_dimension_numbers<[1], [0], [0], [1], [0, 0, 1, 1], [], []>} : vector<8x32xbf16>, vector<32x96xbf16>, vector<8x96xf32> -> vector<8x96xf32>
    %c0_71 = arith.constant 0 : index
    %c0_72 = arith.constant 0 : index
    %153 = vector.load %arg3[%c0_71, %c0_72] : memref<1x96xf32, #tpu.memory_space<vmem>>, vector<1x96xf32>
    %154 = vector.broadcast %153 : vector<1x96xf32> to vector<8x96xf32>
    %155 = arith.addf %152, %154 : vector<8x96xf32>
    %156 = arith.truncf %155 : vector<8x96xf32> to vector<8x96xbf16>
    %157 = vector.shape_cast %156 : vector<8x96xbf16> to vector<1x8x96xbf16>
    %158 = vector.extract_strided_slice %157 {offsets = [0, 0, 0], sizes = [1, 8, 8], strides = [1, 1, 1]} : vector<1x8x96xbf16> to vector<1x8x8xbf16>
    %159 = vector.extract_strided_slice %157 {offsets = [0, 0, 32], sizes = [1, 8, 8], strides = [1, 1, 1]} : vector<1x8x96xbf16> to vector<1x8x8xbf16>
    %160 = vector.extract_strided_slice %157 {offsets = [0, 0, 64], sizes = [1, 8, 8], strides = [1, 1, 1]} : vector<1x8x96xbf16> to vector<1x8x8xbf16>
    "tpu.trace_start"() <{level = 10 : i32, message = "bqe,bke->bqk"}> : () -> ()
    %cst_73 = arith.constant dense<0.000000e+00> : vector<1x8x8xf32>
    %161 = tpu.matmul %158, %159, %cst_73 {dimension_numbers = #tpu.dot_dimension_numbers<[2], [2], [1], [1], [0, 0, 0, 1, 1, 1], [0], [0]>} : vector<1x8x8xbf16>, vector<1x8x8xbf16>, vector<1x8x8xf32> -> vector<1x8x8xf32>
    "tpu.trace_stop"() : () -> ()
    %cst_74 = arith.constant dense<0xFF800000> : vector<1x8xf32>
    %162 = vector.multi_reduction <maximumf>, %161, %cst_74 [2] : vector<1x8x8xf32> to vector<1x8xf32>
    %163 = vector.shape_cast %162 : vector<1x8xf32> to vector<1x8x1xf32>
    %164 = vector.broadcast %163 : vector<1x8x1xf32> to vector<1x8x8xf32>
    %165 = arith.subf %161, %164 : vector<1x8x8xf32>
    %166 = math.exp %165 : vector<1x8x8xf32>
    %cst_75 = arith.constant dense<0.000000e+00> : vector<1x8xf32>
    %167 = vector.multi_reduction <add>, %166, %cst_75 [2] : vector<1x8x8xf32> to vector<1x8xf32>
    %168 = vector.shape_cast %167 : vector<1x8xf32> to vector<1x8x1xf32>
    %169 = tpu.reciprocal %168 {approx = true} : vector<1x8x1xf32> -> vector<1x8x1xf32>
    %170 = vector.broadcast %169 : vector<1x8x1xf32> to vector<1x8x8xf32>
    %171 = arith.mulf %166, %170 : vector<1x8x8xf32>
    %172 = arith.truncf %171 : vector<1x8x8xf32> to vector<1x8x8xbf16>
    "tpu.trace_start"() <{level = 10 : i32, message = "bqk,bke->bqe"}> : () -> ()
    %cst_76 = arith.constant dense<0.000000e+00> : vector<1x8x8xf32>
    %173 = tpu.matmul %172, %160, %cst_76 {dimension_numbers = #tpu.dot_dimension_numbers<[2], [1], [1], [2], [0, 0, 0, 1, 1, 2], [0], [0]>} : vector<1x8x8xbf16>, vector<1x8x8xbf16>, vector<1x8x8xf32> -> vector<1x8x8xf32>
    "tpu.trace_stop"() : () -> ()
    %c0_77 = arith.constant 0 : index
    %c0_78 = arith.constant 0 : index
    %c0_79 = arith.constant 0 : index
    %174 = vector.load %arg15[%c0_77, %c0_78, %c0_79] : memref<1x8x32xf32, #tpu.memory_space<vmem>>, vector<1x8x8xf32>
    tpu.vector_store %arg15[%c0_77, %c0_78, %c0_79], %173 {strides = array<i32>} : memref<1x8x32xf32, #tpu.memory_space<vmem>>, vector<1x8x8xf32>,
    %175 = vector.extract_strided_slice %157 {offsets = [0, 0, 8], sizes = [1, 8, 8], strides = [1, 1, 1]} : vector<1x8x96xbf16> to vector<1x8x8xbf16>
    %176 = vector.extract_strided_slice %157 {offsets = [0, 0, 40], sizes = [1, 8, 8], strides = [1, 1, 1]} : vector<1x8x96xbf16> to vector<1x8x8xbf16>
    %177 = vector.extract_strided_slice %157 {offsets = [0, 0, 72], sizes = [1, 8, 8], strides = [1, 1, 1]} : vector<1x8x96xbf16> to vector<1x8x8xbf16>
    "tpu.trace_start"() <{level = 10 : i32, message = "bqe,bke->bqk"}> : () -> ()
    %cst_80 = arith.constant dense<0.000000e+00> : vector<1x8x8xf32>
    %178 = tpu.matmul %175, %176, %cst_80 {dimension_numbers = #tpu.dot_dimension_numbers<[2], [2], [1], [1], [0, 0, 0, 1, 1, 1], [0], [0]>} : vector<1x8x8xbf16>, vector<1x8x8xbf16>, vector<1x8x8xf32> -> vector<1x8x8xf32>
    "tpu.trace_stop"() : () -> ()
    %cst_81 = arith.constant dense<0xFF800000> : vector<1x8xf32>
    %179 = vector.multi_reduction <maximumf>, %178, %cst_81 [2] : vector<1x8x8xf32> to vector<1x8xf32>
    %180 = vector.shape_cast %179 : vector<1x8xf32> to vector<1x8x1xf32>
    %181 = vector.broadcast %180 : vector<1x8x1xf32> to vector<1x8x8xf32>
    %182 = arith.subf %178, %181 : vector<1x8x8xf32>
    %183 = math.exp %182 : vector<1x8x8xf32>
    %cst_82 = arith.constant dense<0.000000e+00> : vector<1x8xf32>
    %184 = vector.multi_reduction <add>, %183, %cst_82 [2] : vector<1x8x8xf32> to vector<1x8xf32>
    %185 = vector.shape_cast %184 : vector<1x8xf32> to vector<1x8x1xf32>
    %186 = tpu.reciprocal %185 {approx = true} : vector<1x8x1xf32> -> vector<1x8x1xf32>
    %187 = vector.broadcast %186 : vector<1x8x1xf32> to vector<1x8x8xf32>
    %188 = arith.mulf %183, %187 : vector<1x8x8xf32>
    %189 = arith.truncf %188 : vector<1x8x8xf32> to vector<1x8x8xbf16>
    "tpu.trace_start"() <{level = 10 : i32, message = "bqk,bke->bqe"}> : () -> ()
    %cst_83 = arith.constant dense<0.000000e+00> : vector<1x8x8xf32>
    %190 = tpu.matmul %189, %177, %cst_83 {dimension_numbers = #tpu.dot_dimension_numbers<[2], [1], [1], [2], [0, 0, 0, 1, 1, 2], [0], [0]>} : vector<1x8x8xbf16>, vector<1x8x8xbf16>, vector<1x8x8xf32> -> vector<1x8x8xf32>
    "tpu.trace_stop"() : () -> ()
    %c0_84 = arith.constant 0 : index
    %c0_85 = arith.constant 0 : index
    %c8_86 = arith.constant 8 : index
    %191 = vector.load %arg15[%c0_84, %c0_85, %c8_86] : memref<1x8x32xf32, #tpu.memory_space<vmem>>, vector<1x8x8xf32>
    tpu.vector_store %arg15[%c0_84, %c0_85, %c8_86], %190 {strides = array<i32>} : memref<1x8x32xf32, #tpu.memory_space<vmem>>, vector<1x8x8xf32>,
    %192 = vector.extract_strided_slice %157 {offsets = [0, 0, 16], sizes = [1, 8, 8], strides = [1, 1, 1]} : vector<1x8x96xbf16> to vector<1x8x8xbf16>
    %193 = vector.extract_strided_slice %157 {offsets = [0, 0, 48], sizes = [1, 8, 8], strides = [1, 1, 1]} : vector<1x8x96xbf16> to vector<1x8x8xbf16>
    %194 = vector.extract_strided_slice %157 {offsets = [0, 0, 80], sizes = [1, 8, 8], strides = [1, 1, 1]} : vector<1x8x96xbf16> to vector<1x8x8xbf16>
    "tpu.trace_start"() <{level = 10 : i32, message = "bqe,bke->bqk"}> : () -> ()
    %cst_87 = arith.constant dense<0.000000e+00> : vector<1x8x8xf32>
    %195 = tpu.matmul %192, %193, %cst_87 {dimension_numbers = #tpu.dot_dimension_numbers<[2], [2], [1], [1], [0, 0, 0, 1, 1, 1], [0], [0]>} : vector<1x8x8xbf16>, vector<1x8x8xbf16>, vector<1x8x8xf32> -> vector<1x8x8xf32>
    "tpu.trace_stop"() : () -> ()
    %cst_88 = arith.constant dense<0xFF800000> : vector<1x8xf32>
    %196 = vector.multi_reduction <maximumf>, %195, %cst_88 [2] : vector<1x8x8xf32> to vector<1x8xf32>
    %197 = vector.shape_cast %196 : vector<1x8xf32> to vector<1x8x1xf32>
    %198 = vector.broadcast %197 : vector<1x8x1xf32> to vector<1x8x8xf32>
    %199 = arith.subf %195, %198 : vector<1x8x8xf32>
    %200 = math.exp %199 : vector<1x8x8xf32>
    %cst_89 = arith.constant dense<0.000000e+00> : vector<1x8xf32>
    %201 = vector.multi_reduction <add>, %200, %cst_89 [2] : vector<1x8x8xf32> to vector<1x8xf32>
    %202 = vector.shape_cast %201 : vector<1x8xf32> to vector<1x8x1xf32>
    %203 = tpu.reciprocal %202 {approx = true} : vector<1x8x1xf32> -> vector<1x8x1xf32>
    %204 = vector.broadcast %203 : vector<1x8x1xf32> to vector<1x8x8xf32>
    %205 = arith.mulf %200, %204 : vector<1x8x8xf32>
    %206 = arith.truncf %205 : vector<1x8x8xf32> to vector<1x8x8xbf16>
    "tpu.trace_start"() <{level = 10 : i32, message = "bqk,bke->bqe"}> : () -> ()
    %cst_90 = arith.constant dense<0.000000e+00> : vector<1x8x8xf32>
    %207 = tpu.matmul %206, %194, %cst_90 {dimension_numbers = #tpu.dot_dimension_numbers<[2], [1], [1], [2], [0, 0, 0, 1, 1, 2], [0], [0]>} : vector<1x8x8xbf16>, vector<1x8x8xbf16>, vector<1x8x8xf32> -> vector<1x8x8xf32>
    "tpu.trace_stop"() : () -> ()
    %c0_91 = arith.constant 0 : index
    %c0_92 = arith.constant 0 : index
    %c16_93 = arith.constant 16 : index
    %208 = vector.load %arg15[%c0_91, %c0_92, %c16_93] : memref<1x8x32xf32, #tpu.memory_space<vmem>>, vector<1x8x8xf32>
    tpu.vector_store %arg15[%c0_91, %c0_92, %c16_93], %207 {strides = array<i32>} : memref<1x8x32xf32, #tpu.memory_space<vmem>>, vector<1x8x8xf32>,
    %209 = vector.extract_strided_slice %157 {offsets = [0, 0, 24], sizes = [1, 8, 8], strides = [1, 1, 1]} : vector<1x8x96xbf16> to vector<1x8x8xbf16>
    %210 = vector.extract_strided_slice %157 {offsets = [0, 0, 56], sizes = [1, 8, 8], strides = [1, 1, 1]} : vector<1x8x96xbf16> to vector<1x8x8xbf16>
    %211 = vector.extract_strided_slice %157 {offsets = [0, 0, 88], sizes = [1, 8, 8], strides = [1, 1, 1]} : vector<1x8x96xbf16> to vector<1x8x8xbf16>
    "tpu.trace_start"() <{level = 10 : i32, message = "bqe,bke->bqk"}> : () -> ()
    %cst_94 = arith.constant dense<0.000000e+00> : vector<1x8x8xf32>
    %212 = tpu.matmul %209, %210, %cst_94 {dimension_numbers = #tpu.dot_dimension_numbers<[2], [2], [1], [1], [0, 0, 0, 1, 1, 1], [0], [0]>} : vector<1x8x8xbf16>, vector<1x8x8xbf16>, vector<1x8x8xf32> -> vector<1x8x8xf32>
    "tpu.trace_stop"() : () -> ()
    %cst_95 = arith.constant dense<0xFF800000> : vector<1x8xf32>
    %213 = vector.multi_reduction <maximumf>, %212, %cst_95 [2] : vector<1x8x8xf32> to vector<1x8xf32>
    %214 = vector.shape_cast %213 : vector<1x8xf32> to vector<1x8x1xf32>
    %215 = vector.broadcast %214 : vector<1x8x1xf32> to vector<1x8x8xf32>
    %216 = arith.subf %212, %215 : vector<1x8x8xf32>
    %217 = math.exp %216 : vector<1x8x8xf32>
    %cst_96 = arith.constant dense<0.000000e+00> : vector<1x8xf32>
    %218 = vector.multi_reduction <add>, %217, %cst_96 [2] : vector<1x8x8xf32> to vector<1x8xf32>
    %219 = vector.shape_cast %218 : vector<1x8xf32> to vector<1x8x1xf32>
    %220 = tpu.reciprocal %219 {approx = true} : vector<1x8x1xf32> -> vector<1x8x1xf32>
    %221 = vector.broadcast %220 : vector<1x8x1xf32> to vector<1x8x8xf32>
    %222 = arith.mulf %217, %221 : vector<1x8x8xf32>
    %223 = arith.truncf %222 : vector<1x8x8xf32> to vector<1x8x8xbf16>
    "tpu.trace_start"() <{level = 10 : i32, message = "bqk,bke->bqe"}> : () -> ()
    %cst_97 = arith.constant dense<0.000000e+00> : vector<1x8x8xf32>
    %224 = tpu.matmul %223, %211, %cst_97 {dimension_numbers = #tpu.dot_dimension_numbers<[2], [1], [1], [2], [0, 0, 0, 1, 1, 2], [0], [0]>} : vector<1x8x8xbf16>, vector<1x8x8xbf16>, vector<1x8x8xf32> -> vector<1x8x8xf32>
    "tpu.trace_stop"() : () -> ()
    %c0_98 = arith.constant 0 : index
    %c0_99 = arith.constant 0 : index
    %c24_100 = arith.constant 24 : index
    %225 = vector.load %arg15[%c0_98, %c0_99, %c24_100] : memref<1x8x32xf32, #tpu.memory_space<vmem>>, vector<1x8x8xf32>
    tpu.vector_store %arg15[%c0_98, %c0_99, %c24_100], %224 {strides = array<i32>} : memref<1x8x32xf32, #tpu.memory_space<vmem>>, vector<1x8x8xf32>,
    %c0_101 = arith.constant 0 : index
    %c0_102 = arith.constant 0 : index
    %c0_103 = arith.constant 0 : index
    %226 = vector.load %arg15[%c0_101, %c0_102, %c0_103] : memref<1x8x32xf32, #tpu.memory_space<vmem>>, vector<1x8x32xf32>
    %227 = vector.shape_cast %226 : vector<1x8x32xf32> to vector<8x32xf32>
    %228 = arith.truncf %227 : vector<8x32xf32> to vector<8x32xbf16>
    %c0_104 = arith.constant 0 : index
    %c0_105 = arith.constant 0 : index
    %229 = vector.load %arg4[%c0_104, %c0_105] : memref<32x32xbf16, #tpu.memory_space<vmem>>, vector<32x32xbf16>
    %cst_106 = arith.constant dense<0.000000e+00> : vector<8x32xf32>
    %230 = tpu.matmul %228, %229, %cst_106 {dimension_numbers = #tpu.dot_dimension_numbers<[1], [0], [0], [1], [0, 0, 1, 1], [], []>} : vector<8x32xbf16>, vector<32x32xbf16>, vector<8x32xf32> -> vector<8x32xf32>
    %c0_107 = arith.constant 0 : index
    %c0_108 = arith.constant 0 : index
    %231 = vector.load %arg5[%c0_107, %c0_108] : memref<1x32xf32, #tpu.memory_space<vmem>>, vector<1x32xf32>
    %232 = vector.broadcast %231 : vector<1x32xf32> to vector<8x32xf32>
    %233 = arith.addf %230, %232 : vector<8x32xf32>
    %234 = arith.addf %149, %233 : vector<8x32xf32>
    %c0_109 = arith.constant 0 : index
    %c0_110 = arith.constant 0 : index
    %235 = vector.load %arg6[%c0_109, %c0_110] : memref<1x32xf32, #tpu.memory_space<vmem>>, vector<1x32xf32>
    %c0_111 = arith.constant 0 : index
    %c0_112 = arith.constant 0 : index
    %236 = vector.load %arg7[%c0_111, %c0_112] : memref<1x32xf32, #tpu.memory_space<vmem>>, vector<1x32xf32>
    %cst_113 = arith.constant dense<0.000000e+00> : vector<8xf32>
    %237 = vector.multi_reduction <add>, %234, %cst_113 [1] : vector<8x32xf32> to vector<8xf32>
    %238 = vector.shape_cast %237 : vector<8xf32> to vector<8x1xf32>
    %cst_114 = arith.constant 3.200000e+01 : f32
    %239 = vector.broadcast %cst_114 : f32 to vector<8x1xf32>
    %240 = arith.divf %238, %239 : vector<8x1xf32>
    %241 = vector.broadcast %240 : vector<8x1xf32> to vector<8x32xf32>
    %242 = arith.subf %234, %241 : vector<8x32xf32>
    %243 = arith.mulf %242, %242 : vector<8x32xf32>
    %cst_115 = arith.constant dense<0.000000e+00> : vector<8xf32>
    %244 = vector.multi_reduction <add>, %243, %cst_115 [1] : vector<8x32xf32> to vector<8xf32>
    %245 = vector.shape_cast %244 : vector<8xf32> to vector<8x1xf32>
    %cst_116 = arith.constant 3.200000e+01 : f32
    %246 = vector.broadcast %cst_116 : f32 to vector<8x1xf32>
    %247 = arith.divf %245, %246 : vector<8x1xf32>
    %cst_117 = arith.constant 9.99999974E-6 : f32
    %248 = vector.broadcast %cst_117 : f32 to vector<8x1xf32>
    %249 = arith.addf %247, %248 : vector<8x1xf32>
    %250 = math.rsqrt %249 : vector<8x1xf32>
    %251 = vector.broadcast %240 : vector<8x1xf32> to vector<8x32xf32>
    %252 = arith.subf %234, %251 : vector<8x32xf32>
    %253 = vector.broadcast %250 : vector<8x1xf32> to vector<8x32xf32>
    %254 = arith.mulf %252, %253 : vector<8x32xf32>
    %255 = vector.broadcast %235 : vector<1x32xf32> to vector<8x32xf32>
    %256 = arith.mulf %254, %255 : vector<8x32xf32>
    %257 = vector.broadcast %236 : vector<1x32xf32> to vector<8x32xf32>
    %258 = arith.addf %256, %257 : vector<8x32xf32>
    %259 = arith.truncf %258 : vector<8x32xf32> to vector<8x32xbf16>
    %c0_118 = arith.constant 0 : index
    %c0_119 = arith.constant 0 : index
    %260 = vector.load %arg8[%c0_118, %c0_119] : memref<32x64xbf16, #tpu.memory_space<vmem>>, vector<32x64xbf16>
    %cst_120 = arith.constant dense<0.000000e+00> : vector<8x64xf32>
    %261 = tpu.matmul %259, %260, %cst_120 {dimension_numbers = #tpu.dot_dimension_numbers<[1], [0], [0], [1], [0, 0, 1, 1], [], []>} : vector<8x32xbf16>, vector<32x64xbf16>, vector<8x64xf32> -> vector<8x64xf32>
    %c0_121 = arith.constant 0 : index
    %c0_122 = arith.constant 0 : index
    %262 = vector.load %arg9[%c0_121, %c0_122] : memref<1x64xf32, #tpu.memory_space<vmem>>, vector<1x64xf32>
    %263 = vector.broadcast %262 : vector<1x64xf32> to vector<8x64xf32>
    %264 = arith.addf %261, %263 : vector<8x64xf32>
    %cst_123 = arith.constant 0.000000e+00 : f32
    %265 = vector.broadcast %cst_123 : f32 to vector<8x64xf32>
    %266 = arith.maximumf %264, %265 : vector<8x64xf32>
    %267 = arith.truncf %266 : vector<8x64xf32> to vector<8x64xbf16>
    %c0_124 = arith.constant 0 : index
    %c0_125 = arith.constant 0 : index
    %268 = vector.load %arg10[%c0_124, %c0_125] : memref<64x32xbf16, #tpu.memory_space<vmem>>, vector<64x32xbf16>
    %cst_126 = arith.constant dense<0.000000e+00> : vector<8x32xf32>
    %269 = tpu.matmul %267, %268, %cst_126 {dimension_numbers = #tpu.dot_dimension_numbers<[1], [0], [0], [1], [0, 0, 1, 1], [], []>} : vector<8x64xbf16>, vector<64x32xbf16>, vector<8x32xf32> -> vector<8x32xf32>
    %c0_127 = arith.constant 0 : index
    %c0_128 = arith.constant 0 : index
    %270 = vector.load %arg11[%c0_127, %c0_128] : memref<1x32xf32, #tpu.memory_space<vmem>>, vector<1x32xf32>
    %271 = vector.broadcast %270 : vector<1x32xf32> to vector<8x32xf32>
    %272 = arith.addf %269, %271 : vector<8x32xf32>
    %273 = arith.addf %258, %272 : vector<8x32xf32>
    %c0_129 = arith.constant 0 : index
    %c0_130 = arith.constant 0 : index
    %274 = vector.load %arg12[%c0_129, %c0_130] : memref<1x32xf32, #tpu.memory_space<vmem>>, vector<1x32xf32>
    %c0_131 = arith.constant 0 : index
    %c0_132 = arith.constant 0 : index
    %275 = vector.load %arg13[%c0_131, %c0_132] : memref<1x32xf32, #tpu.memory_space<vmem>>, vector<1x32xf32>
    %cst_133 = arith.constant dense<0.000000e+00> : vector<8xf32>
    %276 = vector.multi_reduction <add>, %273, %cst_133 [1] : vector<8x32xf32> to vector<8xf32>
    %277 = vector.shape_cast %276 : vector<8xf32> to vector<8x1xf32>
    %cst_134 = arith.constant 3.200000e+01 : f32
    %278 = vector.broadcast %cst_134 : f32 to vector<8x1xf32>
    %279 = arith.divf %277, %278 : vector<8x1xf32>
    %280 = vector.broadcast %279 : vector<8x1xf32> to vector<8x32xf32>
    %281 = arith.subf %273, %280 : vector<8x32xf32>
    %282 = arith.mulf %281, %281 : vector<8x32xf32>
    %cst_135 = arith.constant dense<0.000000e+00> : vector<8xf32>
    %283 = vector.multi_reduction <add>, %282, %cst_135 [1] : vector<8x32xf32> to vector<8xf32>
    %284 = vector.shape_cast %283 : vector<8xf32> to vector<8x1xf32>
    %cst_136 = arith.constant 3.200000e+01 : f32
    %285 = vector.broadcast %cst_136 : f32 to vector<8x1xf32>
    %286 = arith.divf %284, %285 : vector<8x1xf32>
    %cst_137 = arith.constant 9.99999974E-6 : f32
    %287 = vector.broadcast %cst_137 : f32 to vector<8x1xf32>
    %288 = arith.addf %286, %287 : vector<8x1xf32>
    %289 = math.rsqrt %288 : vector<8x1xf32>
    %290 = vector.broadcast %279 : vector<8x1xf32> to vector<8x32xf32>
    %291 = arith.subf %273, %290 : vector<8x32xf32>
    %292 = vector.broadcast %289 : vector<8x1xf32> to vector<8x32xf32>
    %293 = arith.mulf %291, %292 : vector<8x32xf32>
    %294 = vector.broadcast %274 : vector<1x32xf32> to vector<8x32xf32>
    %295 = arith.mulf %293, %294 : vector<8x32xf32>
    %296 = vector.broadcast %275 : vector<1x32xf32> to vector<8x32xf32>
    %297 = arith.addf %295, %296 : vector<8x32xf32>
    %298 = vector.shape_cast %297 : vector<8x32xf32> to vector<1x8x32xf32>
    %c0_138 = arith.constant 0 : index
    %c0_139 = arith.constant 0 : index
    %c0_140 = arith.constant 0 : index
    %299 = vector.load %arg14[%c0_138, %c0_139, %c0_140] : memref<1x8x32xf32, #tpu.memory_space<vmem>>, vector<1x8x32xf32>
    tpu.vector_store %arg14[%c0_138, %c0_139, %c0_140], %298 {strides = array<i32>} : memref<1x8x32xf32, #tpu.memory_space<vmem>>, vector<1x8x32xf32>,
    return
  }
  func.func @transform_0(%arg0: i32) -> (i32, i32, i32) {
    %c0_i32 = arith.constant 0 : i32
    %c0_i32_0 = arith.constant 0 : i32
    %c0_i32_1 = arith.constant 0 : i32
    return %arg0, %c0_i32, %c0_i32_0 : i32, i32, i32
  }
  func.func @transform_1(%arg0: i32) -> (i32, i32) {
    %c0_i32 = arith.constant 0 : i32
    %c0_i32_0 = arith.constant 0 : i32
    %c0_i32_1 = arith.constant 0 : i32
    return %c0_i32, %c0_i32_0 : i32, i32
  }
  func.func @transform_2(%arg0: i32) -> (i32, i32) {
    %c0_i32 = arith.constant 0 : i32
    %c0_i32_0 = arith.constant 0 : i32
    %c0_i32_1 = arith.constant 0 : i32
    return %c0_i32, %c0_i32_0 : i32, i32
  }
  func.func @transform_3(%arg0: i32) -> (i32, i32) {
    %c0_i32 = arith.constant 0 : i32
    %c0_i32_0 = arith.constant 0 : i32
    %c0_i32_1 = arith.constant 0 : i32
    return %c0_i32, %c0_i32_0 : i32, i32
  }
  func.func @transform_4(%arg0: i32) -> (i32, i32) {
    %c0_i32 = arith.constant 0 : i32
    %c0_i32_0 = arith.constant 0 : i32
    %c0_i32_1 = arith.constant 0 : i32
    return %c0_i32, %c0_i32_0 : i32, i32
  }
  func.func @transform_5(%arg0: i32) -> (i32, i32) {
    %c0_i32 = arith.constant 0 : i32
    %c0_i32_0 = arith.constant 0 : i32
    %c0_i32_1 = arith.constant 0 : i32
    return %c0_i32, %c0_i32_0 : i32, i32
  }
  func.func @transform_6(%arg0: i32) -> (i32, i32) {
    %c0_i32 = arith.constant 0 : i32
    %c0_i32_0 = arith.constant 0 : i32
    %c0_i32_1 = arith.constant 0 : i32
    return %c0_i32, %c0_i32_0 : i32, i32
  }
  func.func @transform_7(%arg0: i32) -> (i32, i32) {
    %c0_i32 = arith.constant 0 : i32
    %c0_i32_0 = arith.constant 0 : i32
    %c0_i32_1 = arith.constant 0 : i32
    return %c0_i32, %c0_i32_0 : i32, i32
  }
  func.func @transform_8(%arg0: i32) -> (i32, i32) {
    %c0_i32 = arith.constant 0 : i32
    %c0_i32_0 = arith.constant 0 : i32
    %c0_i32_1 = arith.constant 0 : i32
    return %c0_i32, %c0_i32_0 : i32, i32
  }
  func.func @transform_9(%arg0: i32) -> (i32, i32) {
    %c0_i32 = arith.constant 0 : i32
    %c0_i32_0 = arith.constant 0 : i32
    %c0_i32_1 = arith.constant 0 : i32
    return %c0_i32, %c0_i32_0 : i32, i32
  }
  func.func @transform_10(%arg0: i32) -> (i32, i32) {
    %c0_i32 = arith.constant 0 : i32
    %c0_i32_0 = arith.constant 0 : i32
    %c0_i32_1 = arith.constant 0 : i32
    return %c0_i32, %c0_i32_0 : i32, i32
  }
  func.func @transform_11(%arg0: i32) -> (i32, i32) {
    %c0_i32 = arith.constant 0 : i32
    %c0_i32_0 = arith.constant 0 : i32
    %c0_i32_1 = arith.constant 0 : i32
    return %c0_i32, %c0_i32_0 : i32, i32
  }
  func.func @transform_12(%arg0: i32) -> (i32, i32) {
    %c0_i32 = arith.constant 0 : i32
    %c0_i32_0 = arith.constant 0 : i32
    %c0_i32_1 = arith.constant 0 : i32
    return %c0_i32, %c0_i32_0 : i32, i32
  }
  func.func @transform_13(%arg0: i32) -> (i32, i32, i32) {
    %c0_i32 = arith.constant 0 : i32
    %c0_i32_0 = arith.constant 0 : i32
    %c0_i32_1 = arith.constant 0 : i32
    return %arg0, %c0_i32, %c0_i32_0 : i32, i32, i32
  }
}

</mosaic_0001>

<bundles_post_ra>
// kernel: tpu_custom_call.1
= control target key start
LH: loop header
LB: loop body
LE: loop exit
PB: predicated region body
PF: predicated region fallthrough
CT: control target
= control target key end

     0   :  { %18 = vsyncpa [#allocation4], 0  ;;  %s3227_s0 = inlined_call_operand.vmem [shape: f32[2,8,32], index: 0, kind: input, shape index: {}]   ;;  %s3228_s1 = inlined_call_operand.vmem [shape: bf16[32,96], index: 1, kind: input, shape index: {}]   ;;  %s3229_s2 = inlined_call_operand.vmem [shape: f32[1,96], index: 2, kind: input, shape index: {}]   ;;  %s3230_s3 = inlined_call_operand.vmem [shape: bf16[32,32], index: 3, kind: input, shape index: {}]   ;;  %s3231_s4 = inlined_call_operand.vmem [shape: f32[1,32], index: 4, kind: input, shape index: {}]   ;;  %s3232_s5 = inlined_call_operand.vmem [shape: f32[1,32], index: 5, kind: input, shape index: {}]   ;;  %s3233_s6 = inlined_call_operand.vmem [shape: f32[1,32], index: 6, kind: input, shape index: {}]   ;;  %s3234_s7 = inlined_call_operand.hbm [shape: bf16[32,64], index: 7, kind: input, shape index: {}]   ;;  %s3235_s8 = inlined_call_operand.vmem [shape: f32[1,64], index: 8, kind: input, shape index: {}]   ;;  %s3236_s9 = inlined_call_operand.vmem [shape: bf16[64,32], index: 9, kind: input, shape index: {}]   ;;  %s3237_s10 = inlined_call_operand.vmem [shape: f32[1,32], index: 10, kind: input, shape index: {}]   ;;  %s3238_s11 = inlined_call_operand.vmem [shape: f32[1,32], index: 11, kind: input, shape index: {}]   ;;  %s3239_s12 = inlined_call_operand.vmem [shape: f32[1,32], index: 12, kind: input, shape index: {}]   ;;  %s3240_s13 = inlined_call_operand.hbm [shape: f32[2,8,32], index: 13, kind: output, shape index: {}]  }
   0x1   :  { %19 = vsyncpa [#allocation5], 0 }
   0x2   :  { %21 = vsyncpa [#allocation5 + $0x1], 0  ;;  %s2765_s25 = smov 0   ;;  %s2767_s26 = smov 0  }
   0x3   :  { %s2769_s27 = smov 0   ;;  %s2771_s28 = smov 0  }
   0x4 LB: > { %3256 = sst [smem:[#allocation9_spill]] %s2669_s27  ;;  %s2786_s29 = sadd.s32 4294967295, %s2673_s28   ;;  %s2673_s28 = sphi %s2771_s28, %s3277_s28   ;;  %s2669_s27 = sphi %s2769_s27, %s3279_s27   ;;  %s2665_s26 = sphi %s2767_s26, %s3281_s26   ;;  %s2661_s25 = sphi %s2765_s25, %s3280_s25  }
   0x5   : > { %s2151_s30 = sadd.s32 4294967294, %s2673_s28   ;;  %s2790_s14 = sadd.s32 1, %s2673_s28  }
   0x6   : > { %3257 = sst [smem:[#allocation10_spill]] %s2790_s14  ;;  %s312_s15 = sadd.s32 1, %s2669_s27 }
   0x7   : > { %s309_s16 = ssub.s32 %s2673_s28, %s2790_s14  ;;  %p322_p0 = scmp.ne.s32.totalorder %s2669_s27, %s2665_s26 }
   0x8   : > { %p310_p1 = scmp.eq.s32.totalorder %s309_s16, 0  ;;  %p323_p2 = scmp.eq.s32.totalorder %s2786_s29, 1 }
   0x9   : > { %p328_p3 = scmp.ne.s32.totalorder %s2665_s26, %s2661_s25  ;;  %p329_p4 = scmp.eq.s32.totalorder %s2151_s30, 1 }
   0xa   : > { %s2801_s17 = scalar_select %p310_p1, %s2669_s27, %s312_s15  }
   0xb   : > { %p2803_p5 = por %p323_p2, %p322_p0  ;;  %p2807_p6 = por %p329_p4, %p328_p3 }
   0xc   : > { %3258 = sst [smem:[#allocation11_spill]] %s2801_s17  ;;  %p2152_p7 = scmp.ge.s32.totalorder %s2673_s28, 1 }
   0xd   : > { %s3259_s18 = scalar_select %p2803_p5, 1, 0 }
   0xe   : > { %s3260_s19 = scalar_select %p2807_p6, 1, 0 }
   0xf   : > { %p336_p8 = scmp.lt.s32.totalorder %s2673_s28, 3  ;;  %p3244_p9 = scmp.eq.s32.totalorder %s2786_s29, 0 }
  0x10   : > { %s2675_s21 = smov [#allocation3]   ;;  %s2579_s15 = scalar_lea.hbm %s3234_s7, 256 }
  0x11   : > { %p2814_p10 = pnand %p2152_p7, %p336_p8  ;;  %s366_s22 = sshll.u32 %s2675_s21, 4  ;;  %s367_s22 = int_to_ptr.vmem [resolvable:$true] %s366_s22 }
  0x12   : > { %p2580_p13 = scmp.ne.s32.totalorder %s3234_s7, %s2579_s15  ;;  %p2586_p3 = scmp.lt.u32.totalorder %s2579_s15, %s3234_s7 }
  0x13   : > { %s3261_s20 = scalar_select %p2814_p10, 1, 0 }
  0x14   : > { %p2457_p11 = pneg %p2814_p10 }
  0x16   : > { %p2822_p12 = pnand %p3244_p9, %p2457_p11 }
  0x18   : > { %p2581_p0 = pneg %p2822_p12 }
  0x1a   : > { %p2582_p1 = pnand %p2581_p0, %p2580_p13 }
  0x1c   : > { %p2583_p2 = pneg %p2582_p1 }
  0x1e   : > { %p2588_p4 = pnand %p2586_p3, %p2583_p2 }
  0x20   : > { %2591 = shalt.err (!%p2588_p4)
}
  0x21   : > { %s2592_s14 = scalar_lea.vmem %s367_s22, 256  ;;  %p2600_p9 = scmp.lt.s32.totalorder %s367_s22, %s367_s22 }
  0x22   : > { %p2593_p7 = scmp.ne.s32.totalorder %s367_s22, %s2592_s14  ;;  %p2601_p6 = scmp.lt.s32.totalorder %s2592_s14, %s2592_s14 }
  0x24   : > { %p2595_p8 = pnand %p2593_p7, %p2581_p0  ;;  %p2602_p5 = por %p2601_p6, %p2600_p9 }
  0x26   : > { %p2596_p11 = pneg %p2595_p8 }
  0x28   : > { %p2603_p10 = pnand %p2602_p5, %p2596_p11 }
  0x2a   : > { %2606 = shalt.err (!%p2603_p10)
}
  0x2b   : > { %s2676_s17 = smov 64   ;;  %s2677_s24 = smov 4  }
  0x2c   : > { %2460 = dma.hbm_to_vmem [thread:$0]  (!%p2822_p12), %s3234_s7, 256, %s367_s22, [#allocation4], %s2676_s17, %s2676_s17, %s2677_s24  }
  0x2d   : > { %p3263_p13 = scmp.ne.s32.totalorder %s3261_s20, 0 }
  0x2e   : > { %p3264_p1 = scmp.eq.s32.totalorder (!%p3263_p13), %s2786_s29, 0 }
  0x2f   : > { %404 = sbr.rel (%p3263_p13) target bundleno = 5169 (0x1431), region = 72 }
  0x36   : > { %2652 = dma.done.wait (%p3264_p1), [#allocation4], 256   ;;  %p3265_p0 = pmov %p3264_p1 }
  0x37   : > { %p447_p5 = scmp.lt.s32.totalorder %s2786_s29, 1  ;;  %v2678_v0 = vmov 0.0   ;;  %vm2679_vm0 = vmmov 0   ;;  %v2519_v1 = vld [vmem:[%s3228_s1] sm:$0xff]   ;;  %v2520_v2 = vld [vmem:[%s3228_s1 + $0x8] sm:$0xff]   ;;  %vm477_vm1 = vcmask 261120  }
  0x38   : > { %2654 = vsyncadd (%p3265_p0), [#allocation4], 4294967040  ;;  %2283 = vmatprep.subr.bf16.mxu1 %v2678_v0  ;;  %2287 = vmatprep.mubr.msk.bf16.mxu1 %vm2679_vm0, %v2678_v0  ;;  %v2877_v5 = vld [vmem:[%s3229_s2] ss:$0 sm:$0xff]  ;;  %s3252_s20 = smov 80   ;;  %s2683_s22 = smov 88  }
  0x39   : > { %s448_s27 = scalar_select %p447_p5, %s2786_s29, 1  ;;  %2297 = vmatprep.subr.bf16.mxu0 %v2678_v0  ;;  %2299 = vmatprep.mubr.msk.bf16.mxu0 %vm2679_vm0, %v2678_v0  ;;  %vm525_vm2 = vcmask 64512   ;;  %vm589_vm3 = vcmask 1043456   ;;  %vm748_vm4 = vcmask 130112   ;;  %vm864_vm5 = vcmask 195712  }
  0x3a   : > { %2284 = vmatpush3.bf16.msra.mxu1 %v2519_v1  ;;  %s2685_s15 = smov 112   ;;  %s2686_s21 = smov 104   ;;  %vm980_vm6 = vcmask 261312   ;;  %vm1189_vm7 = vcmask 523264  }
  0x3b   : > { %s2158_s14 = sshll.u32 %s448_s27, 3  ;;  %2285 = vmatprep.subr.bf16.mxu1 %v2678_v0  ;;  %s2680_s27 = smov 120  }
  0x3c   : > { %s450_s23 = scalar_lea.vmem %s3227_s0, %s2158_s14  ;;  %s2681_s14 = smov 96  }
  0x3d   : > { %v2865_v3 = vld [vmem:[%s450_s23] sm:$0xff]  ;;  %s3251_s23 = smov 72   ;;  %s3250_s17 = smov 56  }
  0x3e   : > { %v453_v4 = vpack.c.bf16 %v2865_v3, %v2865_v3  ;;  %2286 = vmatpush3.bf16.msra.mxu1 %v2520_v2  ;;  %s3249_s24 = smov 64   ;;  %s3248_s30 = smov 40  }
  0x3f   : > { %2291 = vmatprep.subr.bf16.mxu1 %v2678_v0  ;;  %s3247_s16 = smov 48   ;;  %p3275_p9 = scmp.ne.s32.totalorder %s3259_s18, 0 }
  0x41   : > { %2288 = vmatmul.mubr.msk.bf16.vlgmr.msra.gmra.mrb[0].mxu1 %vm477_vm1, %v453_v4 }
  0x42   : > { %2293 = vmatprep.mubr.msk.bf16.mxu1 %vm2679_vm0, %v2678_v0 }
 0x114   : > { %v515_v6 = vpop.f32.mrb[0].mxu1 }
 0x115   : > { %v516_v7 = vadd.f32 %v2877_v5, %v515_v6  ;;  %v2289_v8 = vpop.f32.mrb[1].mxu1 }
 0x116   : > { %v518_v9 = vpop.f32.mrb[2].mxu1 }
 0x117   : > { %v2880_v10 = vpack.c.bf16 %v516_v7, %v516_v7  ;;  %v2290_v11 = vpop.f32.mrb[3].mxu1 }
 0x119   : > { %634 = vrot.lane.b32.xlu1 %v2880_v10, %s2680_s27  ;;  %523 = vrot.lane.b32.xlu0 %v2880_v10, %s2681_s14 }
 0x11d   : > { %752 = vrot.lane.b32.xlu1 %v2880_v10, %s3252_s20  ;;  %636 = vrot.lane.b32.xlu0 %v2880_v10, %s2683_s22  ;;  %s3254_s20 = smov 16  }
 0x121   : > { %868 = vrot.lane.b32.xlu1 %v2880_v10, %s3251_s23  ;;  %750 = vrot.lane.b32.xlu0 %v2880_v10, %s2685_s15  ;;  %s3267_s23 = smov 72  }
 0x125   : > { %866 = vrot.lane.b32.xlu0 %v2880_v10, %s2686_s21 }
 0x18b   : > { %v524_v12 = vpop.permute.xlu0 %523  ;;  %v635_v15 = vpop.permute.xlu1 %634 }
 0x18c   : > { %v530_v13 = vsel %vm525_vm2, %v524_v12, 0 }
 0x18d   : > { %2292 = vmatpush3.bf16.xpose.msra.mxu1 %v530_v13 }
 0x18e   : > { %2303 = vmatprep.subr.bf16.mxu1 %v2678_v0 }
 0x18f   : > { %v637_v14 = vpop.permute.xlu0 %636  ;;  %v753_v17 = vpop.permute.xlu1 %752 }
 0x190   : > { %v642_v16 = vsel %vm525_vm2, %v637_v14, 0  ;;  %v758_v18 = vsel %vm525_vm2, %v753_v17, 0 }
 0x193   : > { %v869_v19 = vpop.permute.xlu1 %868  ;;  %v751_v20 = vpop.permute.xlu0 %750 }
 0x194   : > { %2294 = vmatmul.mubr.msk.bf16.vlgmr.msra.gmra.mrb[4].mxu1 %vm525_vm2, %v2880_v10  ;;  %v874_v21 = vsel %vm525_vm2, %v869_v19, 0 }
 0x195   : > { %2304 = vmatpush3.bf16.xpose.msra.mxu1 %v642_v16  ;;  %2305 = vmatprep.mubr.msk.bf16.mxu1 %vm2679_vm0, %v2678_v0 }
 0x196   : > { %2315 = vmatprep.subr.bf16.mxu1 %v2678_v0 }
 0x197   : > { %v867_v22 = vpop.permute.xlu0 %866 }
 0x19c   : > { %2306 = vmatmul.mubr.msk.bf16.vlgmr.msra.gmra.mrb[8].mxu1 %vm525_vm2, %v635_v15 }
 0x19d   : > { %2316 = vmatpush3.bf16.xpose.msra.mxu1 %v758_v18  ;;  %2317 = vmatprep.mubr.msk.bf16.mxu1 %vm2679_vm0, %v2678_v0 }
 0x19e   : > { %2327 = vmatprep.subr.bf16.mxu1 %v2678_v0 }
 0x1a4   : > { %2318 = vmatmul.mubr.msk.bf16.vlgmr.msra.gmra.mrb[12].mxu1 %vm525_vm2, %v751_v20 }
 0x1a5   : > { %2328 = vmatpush3.bf16.xpose.msra.mxu1 %v874_v21  ;;  %2329 = vmatprep.mubr.msk.bf16.mxu1 %vm2679_vm0, %v2678_v0 }
 0x1a6   : > { %2339 = vmatprep.subr.bf16.mxu1 %v2678_v0 }
 0x1ac   : > { %2330 = vmatmul.mubr.msk.bf16.vlgmr.msra.gmra.mrb[16].mxu1 %vm525_vm2, %v867_v22 }
 0x1ad   : > { %2343 = vmatprep.mubr.msk.bf16.mxu1 %vm2679_vm0, %v2678_v0 }
 0x267   : > { %v566_v23 = vpop.f32.mrb[4].mxu1 }
 0x268   : > { %v2295_v24 = vpop.f32.mrb[5].mxu1  ;;  %v572_v25 = vsel %vm525_vm2, %v566_v23, -inf }
 0x269   : > { %573 = vmax.xlane.f32.xlu1 %v572_v25  ;;  %v569_v26 = vpop.f32.mrb[6].mxu1 }
 0x26a   : > { %v2296_v27 = vpop.f32.mrb[7].mxu1 }
 0x26f   : > { %v678_v28 = vpop.f32.mrb[8].mxu1 }
 0x270   : > { %v2307_v29 = vpop.f32.mrb[9].mxu1  ;;  %v684_v30 = vsel %vm525_vm2, %v678_v28, -inf }
 0x271   : > { %685 = vmax.xlane.f32.xlu0 %v684_v30  ;;  %v681_v31 = vpop.f32.mrb[10].mxu1 }
 0x272   : > { %v2308_v32 = vpop.f32.mrb[11].mxu1 }
 0x277   : > { %v794_v33 = vpop.f32.mrb[12].mxu1 }
 0x278   : > { %v2319_v34 = vpop.f32.mrb[13].mxu1  ;;  %v800_v35 = vsel %vm525_vm2, %v794_v33, -inf }
 0x279   : > { %801 = vmax.xlane.f32.xlu0 %v800_v35  ;;  %v797_v36 = vpop.f32.mrb[14].mxu1  ;;  %v2521_v34 = vld [vmem:[%s3230_s3] sm:$0xff]   ;;  %v2522_v35 = vld [vmem:[%s3230_s3 + $0x8] sm:$0xff]  }
 0x27a   : > { %v2320_v37 = vpop.f32.mrb[15].mxu1  ;;  %2340 = vmatpush3.bf16.msra.mxu1 %v2521_v34 }
 0x27b   : > { %2341 = vmatprep.subr.bf16.mxu1 %v2678_v0 }
 0x27e   : > { %2342 = vmatpush3.bf16.msra.mxu1 %v2522_v35 }
 0x27f   : > { %v910_v38 = vpop.f32.mrb[16].mxu1  ;;  %2355 = vmatprep.subr.bf16.mxu1 %v2678_v0 }
 0x280   : > { %v2331_v39 = vpop.f32.mrb[17].mxu1  ;;  %v916_v40 = vsel %vm525_vm2, %v910_v38, -inf }
 0x281   : > { %917 = vmax.xlane.f32.xlu1 %v916_v40  ;;  %v913_v41 = vpop.f32.mrb[18].mxu1 }
 0x282   : > { %v2332_v42 = vpop.f32.mrb[19].mxu1 }
 0x2f6   : > { %v574_v43 = vpop.xlane.xlu1 %573 }
 0x2f7   : > { %v575_v44 = vsub.f32 %v566_v23, %v574_v43 }
 0x2f9   : > { %v576_v45 = vmul.f32 1.442695, %v575_v44 }
 0x2fb   : > { %2539 = vpow2.f32 %v576_v45 }
 0x2fe   : > { %v686_v46 = vpop.xlane.xlu0 %685 }
 0x2ff   : > { %v687_v47 = vsub.f32 %v678_v28, %v686_v46 }
 0x301   : > { %v688_v48 = vmul.f32 1.442695, %v687_v47 }
 0x303   : > { %2541 = vpow2.f32 %v688_v48 }
 0x305   : > { %v2540_v49 = vpop.eup %2539 }
 0x306   : > { %v802_v50 = vpop.xlane.xlu0 %801  ;;  %v578_v51 = vsel %vm525_vm2, %v2540_v49, 0.0 }
 0x307   : > { %v803_v52 = vsub.f32 %v794_v33, %v802_v50  ;;  %579 = vadd.xlane.f32.xlu0 %v578_v51 }
 0x309   : > { %v804_v53 = vmul.f32 1.442695, %v803_v52 }
 0x30b   : > { %2543 = vpow2.f32 %v804_v53 }
 0x30d   : > { %v2542_v54 = vpop.eup %2541 }
 0x30e   : > { %v690_v55 = vsel %vm525_vm2, %v2542_v54, 0.0  ;;  %v918_v58 = vpop.xlane.xlu1 %917 }
 0x30f   : > { %691 = vadd.xlane.f32.xlu1 %v690_v55  ;;  %v919_v59 = vsub.f32 %v910_v38, %v918_v58 }
 0x311   : > { %v920_v60 = vmul.f32 1.442695, %v919_v59 }
 0x313   : > { %2545 = vpow2.f32 %v920_v60 }
 0x315   : > { %v2544_v56 = vpop.eup %2543 }
 0x316   : > { %v806_v57 = vsel %vm525_vm2, %v2544_v56, 0.0 }
 0x317   : > { %807 = vadd.xlane.f32.xlu0 %v806_v57 }
 0x31d   : > { %v2546_v61 = vpop.eup %2545 }
 0x31e   : > { %v922_v62 = vsel %vm525_vm2, %v2546_v61, 0.0 }
 0x320   : > { %696 = vrot.lane.b32.xlu1 %v2880_v10, %s3250_s17  ;;  %s444_s17 = sand.u32 1, %s2665_s26  }
 0x32d   : > { %584 = vrot.lane.b32.xlu0 %v2880_v10, %s3249_s24  ;;  %s3253_s24 = smov 24  }
 0x331   : > { %928 = vrot.lane.b32.xlu0 %v2880_v10, %s3248_s30  ;;  %s3266_s30 = smov 80  }
 0x344   : > { %923 = vadd.xlane.f32.xlu1 %v922_v62  ;;  %v2523_v62 = vld [vmem:[#allocation3] sm:$0xff]  }
 0x355   : > { %812 = vrot.lane.b32.xlu1 %v2880_v10, %s3247_s16  ;;  %s3255_s16 = smov 8  }
 0x394   : > { %v580_v63 = vpop.xlane.xlu0 %579 }
 0x395   : > { %2547 = vrcp.f32 %v580_v63  ;;  %v2524_v63 = vld [vmem:[#allocation3 + $0x8] sm:$0xff]  }
 0x39c   : > { %v692_v1 = vpop.xlane.xlu1 %691 }
 0x39d   : > { %2549 = vrcp.f32 %v692_v1  ;;  %v2526_v1 = vld [vmem:[%s3236_s9 + $0x8] sm:$0xff]  }
 0x39f   : > { %v2548_v2 = vpop.eup %2547 }
 0x3a0   : > { %v582_v6 = vmul.f32 %v2548_v2, %v2540_v49  ;;  %v697_v9 = vpop.permute.xlu1 %696  ;;  %v2974_v49 = vld [vmem:[%s3231_s4] ss:$0 sm:$0xff] }
 0x3a1   : > { %v702_v13 = vsel %vm589_vm3, %v697_v9, 0 }
 0x3a2   : > { %v583_v11 = vpack.c.bf16 %v582_v6, %v582_v6 }
 0x3a4   : > { %v808_v4 = vpop.xlane.xlu0 %807 }
 0x3a5   : > { %2551 = vrcp.f32 %v808_v4 }
 0x3a7   : > { %v2550_v12 = vpop.eup %2549 }
 0x3a8   : > { %v585_v7 = vpop.permute.xlu0 %584  ;;  %v694_v10 = vmul.f32 %v2550_v12, %v2542_v54 }
 0x3a9   : > { %v591_v8 = vsel %vm589_vm3, %v585_v7, 0 }
 0x3aa   : > { %2298 = vmatpush3.bf16.msra.mxu0 %v591_v8  ;;  %v695_v14 = vpack.c.bf16 %v694_v10, %v694_v10  ;;  %v2993_v8 = vld [vmem:[%s3232_s5] ss:$0 sm:$0xff] }
 0x3ab   : > { %2309 = vmatprep.subr.bf16.mxu0 %v2678_v0 }
 0x3ac   : > { %v929_v20 = vpop.permute.xlu0 %928 }
 0x3ad   : > { %2300 = vmatmul.mubr.msk.bf16.vlgmr.msra.gmra.mrb[0].mxu0 %vm525_vm2, %v583_v11  ;;  %v934_v22 = vsel %vm589_vm3, %v929_v20, 0  ;;  %v2998_v11 = vld [vmem:[%s3233_s6] ss:$0 sm:$0xff] }
 0x3ae   : > { %2310 = vmatpush3.bf16.msra.mxu0 %v702_v13  ;;  %2311 = vmatprep.mubr.msk.bf16.mxu0 %vm2679_vm0, %v2678_v0 }
 0x3af   : > { %2321 = vmatprep.subr.bf16.mxu0 %v2678_v0  ;;  %v2552_v15 = vpop.eup %2551 }
 0x3b0   : > { %v810_v17 = vmul.f32 %v2552_v15, %v2544_v56  ;;  %v2528_v15 = vld [vmem:[%s3236_s9 + $0x18] sm:$0xff]  }
 0x3b2   : > { %v811_v21 = vpack.c.bf16 %v810_v17, %v810_v17 }
 0x3b5   : > { %2312 = vmatmul.mubr.msk.bf16.vlgmr.msra.gmra.mrb[4].mxu0 %vm525_vm2, %v695_v14  ;;  %v2527_v14 = vld [vmem:[%s3236_s9 + $0x10] sm:$0xff]  }
 0x3b6   : > { %2323 = vmatprep.mubr.msk.bf16.mxu0 %vm2679_vm0, %v2678_v0 }
 0x3d1   : > { %v924_v16 = vpop.xlane.xlu1 %923 }
 0x3d2   : > { %2553 = vrcp.f32 %v924_v16  ;;  %v3016_v16 = vld [vmem:[%s3235_s8] ss:$0 sm:$0xff] }
 0x3d5   : > { %v813_v18 = vpop.permute.xlu1 %812 }
 0x3d6   : > { %v818_v19 = vsel %vm589_vm3, %v813_v18, 0 }
 0x3d7   : > { %2322 = vmatpush3.bf16.msra.mxu0 %v818_v19 }
 0x3d8   : > { %2333 = vmatprep.subr.bf16.mxu0 %v2678_v0 }
 0x3da   : > { %2324 = vmatmul.mubr.msk.bf16.vlgmr.msra.gmra.mrb[8].mxu0 %vm525_vm2, %v811_v21 }
 0x3db   : > { %2334 = vmatpush3.bf16.msra.mxu0 %v934_v22  ;;  %2335 = vmatprep.mubr.msk.bf16.mxu0 %vm2679_vm0, %v2678_v0 }
 0x3dc   : > { %v2554_v23 = vpop.eup %2553  ;;  %2347 = vmatprep.subr.bf16.mxu0 %v2678_v0 }
 0x3dd   : > { %v926_v24 = vmul.f32 %v2554_v23, %v2546_v61 }
 0x3df   : > { %v927_v25 = vpack.c.bf16 %v926_v24, %v926_v24  ;;  %v3025_v24 = vld [vmem:[%s3237_s10] ss:$0 sm:$0xff] }
 0x3e2   : > { %2336 = vmatmul.mubr.msk.bf16.vlgmr.msra.gmra.mrb[12].mxu0 %vm525_vm2, %v927_v25 }
 0x3e3   : > { %2351 = vmatprep.mubr.msk.bf16.mxu0 %vm2679_vm0, %v2678_v0  ;;  %2348 = vmatpush3.bf16.msra.mxu0 %v2523_v62 }
 0x3e4   : > { %2349 = vmatprep.subr.bf16.mxu0 %v2678_v0 }
 0x3e7   : > { %2350 = vmatpush3.bf16.msra.mxu0 %v2524_v63 }
 0x3e8   : > { %2367 = vmatprep.subr.bf16.mxu0 %v2678_v0 }
 0x480   : > { %v627_v26 = vpop.f32.mrb[0].mxu0 }
 0x481   : > { %633 = vst.msk [vmem:[#allocation2] sm:$0xff] %vm525_vm2, %v627_v26  ;;  %v2301_v27 = vpop.f32.mrb[1].mxu0 }
 0x482   : > { %v630_v28 = vpop.f32.mrb[2].mxu0 }
 0x483   : > { %v2302_v29 = vpop.f32.mrb[3].mxu0 }
 0x488   : > { %v738_v30 = vpop.f32.mrb[4].mxu0 }
 0x489   : > { %745 = vrot.lane.b32.xlu1 %v738_v30, %s3255_s16  ;;  %v2313_v31 = vpop.f32.mrb[5].mxu0 }
 0x48a   : > { %v741_v32 = vpop.f32.mrb[6].mxu0 }
 0x48b   : > { %v2314_v33 = vpop.f32.mrb[7].mxu0 }
 0x4ad   : > { %v854_v36 = vpop.f32.mrb[8].mxu0 }
 0x4ae   : > { %861 = vrot.lane.b32.xlu0 %v854_v36, %s3254_s20  ;;  %v2325_v37 = vpop.f32.mrb[9].mxu0  ;;  %s2694_s20 = smov [#allocation6]  }
 0x4af   : > { %v857_v38 = vpop.f32.mrb[10].mxu0  ;;  %v2529_v37 = vld [vmem:[%s3228_s1] sm:$0xff]   ;;  %s2611_s16 = sshll.u32 %s2694_s20, 4  ;;  %s2612_s16 = int_to_ptr.vmem [resolvable:$false] %s2611_s16 }
 0x4b0   : > { %v2326_v39 = vpop.f32.mrb[11].mxu0  ;;  %v2530_v38 = vld [vmem:[%s3228_s1 + $0x8] sm:$0xff]  }
 0x4b5   : > { %v970_v40 = vpop.f32.mrb[12].mxu0 }
 0x4b6   : > { %977 = vrot.lane.b32.xlu1 %v970_v40, %s3253_s24  ;;  %v2337_v41 = vpop.f32.mrb[13].mxu0  ;;  %s2067_s24 = scalar_lea.sflag [#allocation5], %s444_s17 }
 0x4b7   : > { %v973_v42 = vpop.f32.mrb[14].mxu0 }
 0x4b8   : > { %v2338_v43 = vpop.f32.mrb[15].mxu0 }
 0x4b9   : > { %v3041_v43 = vld [vmem:[%s3238_s11] ss:$0 sm:$0xff] }
 0x4fb   : > { %v746_v44 = vpop.permute.xlu1 %745 }
 0x4fc   : > { %749 = vst.msk [vmem:[#allocation2] sm:$0xff] %vm748_vm4, %v746_v44 }
 0x520   : > { %v862_v45 = vpop.permute.xlu0 %861 }
 0x521   : > { %865 = vst.msk [vmem:[#allocation2] sm:$0xff] %vm864_vm5, %v862_v45  ;;  %v3046_v45 = vld [vmem:[%s3239_s12] ss:$0 sm:$0xff] }
 0x528   : > { %v978_v46 = vpop.permute.xlu1 %977 }
 0x529   : > { %981 = vst.msk [vmem:[#allocation2] sm:$0xff] %vm980_vm6, %v978_v46 }
 0x530   : > { %v982_v47 = vld [vmem:[#allocation2] sm:$0xff] }
 0x531   : > { %v983_v48 = vpack.c.bf16 %v982_v47, %v982_v47 }
 0x533   : > { %2344 = vmatmul.mubr.msk.bf16.vlgmr.msra.gmra.mrb[20].mxu1 %vm477_vm1, %v983_v48 }
 0x534   : > { %2363 = vmatprep.mubr.msk.bf16.mxu1 %vm2679_vm0, %v2678_v0 }
 0x606   : > { %v1044_v50 = vpop.f32.mrb[20].mxu1 }
 0x607   : > { %v1045_v51 = vadd.f32 %v2974_v49, %v1044_v50  ;;  %v2345_v52 = vpop.f32.mrb[21].mxu1 }
 0x608   : > { %v1047_v53 = vpop.f32.mrb[22].mxu1 }
 0x609   : > { %v2346_v54 = vpop.f32.mrb[23].mxu1  ;;  %v1050_v55 = vadd.f32 %v1045_v51, %v2865_v3  ;;  %v2525_v3 = vld [vmem:[%s3236_s9] sm:$0xff]  }
 0x60a   : > { %2356 = vmatpush3.bf16.msra.mxu1 %v2525_v3 }
 0x60b   : > { %v1053_v56 = vsel %vm477_vm1, %v1050_v55, 0.0  ;;  %2357 = vmatprep.subr.bf16.mxu1 %v2678_v0 }
 0x60c   : > { %1054 = vadd.xlane.f32.xlu0 %v1053_v56 }
 0x60e   : > { %2358 = vmatpush3.bf16.msra.mxu1 %v2526_v1 }
 0x60f   : > { %2359 = vmatprep.subr.bf16.mxu1 %v2678_v0 }
 0x612   : > { %2360 = vmatpush3.bf16.msra.mxu1 %v2527_v14 }
 0x613   : > { %2361 = vmatprep.subr.bf16.mxu1 %v2678_v0 }
 0x616   : > { %2362 = vmatpush3.bf16.msra.mxu1 %v2528_v15 }
 0x617   : > { %2381 = vmatprep.subr.bf16.mxu1 %v2678_v0 }
 0x699   : > { %v1055_v57 = vpop.xlane.xlu0 %1054 }
 0x69a   : > { %v1057_v58 = vmul.f32 0.03125, %v1055_v57 }
 0x69c   : > { %v1058_v59 = vsub.f32 %v1050_v55, %v1057_v58 }
 0x69e   : > { %v1059_v60 = vmul.f32 %v1058_v59, %v1058_v59 }
 0x6a0   : > { %v1060_v61 = vsel %vm477_vm1, %v1059_v60, 0.0 }
 0x6a1   : > { %1061 = vadd.xlane.f32.xlu1 %v1060_v61 }
 0x72e   : > { %v1062_v2 = vpop.xlane.xlu1 %1061 }
 0x72f   : > { %v1063_v4 = vmul.f32 0.03125, %v1062_v2 }
 0x731   : > { %v1064_v6 = vadd.f32 1e-05, %v1063_v4 }
 0x733   : > { %2555 = vrsqrt.f32 %v1064_v6 }
 0x73d   : > { %v2556_v7 = vpop.eup %2555 }
 0x73e   : > { %v1066_v9 = vmul.f32 %v2556_v7, %v1058_v59 }
 0x740   : > { %v1073_v12 = vmul.f32 %v2993_v8, %v1066_v9 }
 0x742   : > { %v1080_v13 = vadd.f32 %v2998_v11, %v1073_v12 }
 0x744   : > { %v1081_v10 = vpack.c.bf16 %v1080_v13, %v1080_v13 }
 0x746   : > { %2352 = vmatmul.mubr.msk.bf16.vlgmr.msra.gmra.mrb[16].mxu0 %vm477_vm1, %v1081_v10 }
 0x747   : > { %2371 = vmatprep.mubr.msk.bf16.mxu0 %vm2679_vm0, %v2678_v0  ;;  %2368 = vmatpush3.bf16.msra.mxu0 %v2529_v37 }
 0x748   : > { %2369 = vmatprep.subr.bf16.mxu0 %v2678_v0 }
 0x74b   : > { %2370 = vmatpush3.bf16.msra.mxu0 %v2530_v38 }
 0x74c   : > { %2375 = vmatprep.subr.bf16.mxu0 %v2678_v0 }
 0x819   : > { %v1142_v17 = vpop.f32.mrb[16].mxu0 }
 0x81a   : > { %v1143_v18 = vadd.f32 %v3016_v16, %v1142_v17  ;;  %v2353_v19 = vpop.f32.mrb[17].mxu0 }
 0x81b   : > { %v1145_v20 = vpop.f32.mrb[18].mxu0 }
 0x81c   : > { %v1148_v21 = vmax.f32 %v1143_v18, 0.0  ;;  %v2354_v22 = vpop.f32.mrb[19].mxu0 }
 0x81e   : > { %v1149_v23 = vpack.c.bf16 %v1148_v21, %v1148_v21 }
 0x820   : > { %2364 = vmatmul.mubr.msk.bf16.vlgmr.msra.gmra.mrb[24].mxu1 %vm1189_vm7, %v1149_v23 }
 0x821   : > { %2383 = vmatprep.mubr.msk.bf16.mxu1 %vm2679_vm0, %v2678_v0 }
 0x8f3   : > { %v1227_v25 = vpop.f32.mrb[24].mxu1 }
 0x8f4   : > { %v1228_v26 = vadd.f32 %v3025_v24, %v1227_v25  ;;  %v2365_v27 = vpop.f32.mrb[25].mxu1 }
 0x8f5   : > { %v1230_v28 = vpop.f32.mrb[26].mxu1 }
 0x8f6   : > { %v2366_v29 = vpop.f32.mrb[27].mxu1  ;;  %v1233_v30 = vadd.f32 %v1228_v26, %v1080_v13 }
 0x8f8   : > { %v1236_v31 = vsel %vm477_vm1, %v1233_v30, 0.0 }
 0x8f9   : > { %1237 = vadd.xlane.f32.xlu0 %v1236_v31 }
 0x986   : > { %v1238_v32 = vpop.xlane.xlu0 %1237 }
 0x987   : > { %v1239_v33 = vmul.f32 0.03125, %v1238_v32 }
 0x989   : > { %v1240_v34 = vsub.f32 %v1233_v30, %v1239_v33 }
 0x98b   : > { %v1241_v35 = vmul.f32 %v1240_v34, %v1240_v34 }
 0x98d   : > { %v1242_v36 = vsel %vm477_vm1, %v1241_v35, 0.0 }
 0x98e   : > { %1243 = vadd.xlane.f32.xlu0 %v1242_v36 }
 0xa1b   : > { %v1244_v39 = vpop.xlane.xlu0 %1243 }
 0xa1c   : > { %v1245_v40 = vmul.f32 0.03125, %v1244_v39 }
 0xa1e   : > { %v1246_v41 = vadd.f32 1e-05, %v1245_v40 }
 0xa20   : > { %2557 = vrsqrt.f32 %v1246_v41 }
 0xa2a   : > { %v2558_v42 = vpop.eup %2557 }
 0xa2b   : > { %v1248_v44 = vmul.f32 %v2558_v42, %v1240_v34 }
 0xa2d   : > { %v1255_v46 = vmul.f32 %v3041_v43, %v1248_v44 }
 0xa2f   : > { %v3050_v47 = vadd.f32 %v3046_v45, %v1255_v46 }
 0xa31   : > { %v1263_v48 = vpack.c.bf16 %v3050_v47, %v3050_v47 }
 0xa33   : > { %2372 = vmatmul.mubr.msk.bf16.vlgmr.msra.gmra.mrb[20].mxu0 %vm477_vm1, %v1263_v48 }
 0xa34   : > { %2377 = vmatprep.mubr.msk.bf16.mxu0 %vm2679_vm0, %v2678_v0 }
 0xb06   : > { %v1324_v50 = vpop.f32.mrb[20].mxu0 }
 0xb07   : > { %v1325_v51 = vadd.f32 %v2877_v5, %v1324_v50  ;;  %v2373_v52 = vpop.f32.mrb[21].mxu0 }
 0xb08   : > { %v1327_v53 = vpop.f32.mrb[22].mxu0 }
 0xb09   : > { %v3058_v54 = vpack.c.bf16 %v1325_v51, %v1325_v51  ;;  %v2374_v55 = vpop.f32.mrb[23].mxu0 }
 0xb0b   : > { %1443 = vrot.lane.b32.xlu0 %v3058_v54, %s2683_s22  ;;  %1332 = vrot.lane.b32.xlu1 %v3058_v54, %s2681_s14  ;;  %s3269_s14 = smov 64   ;;  %s3270_s22 = smov 40  }
 0xb0f   : > { %1556 = vrot.lane.b32.xlu0 %v3058_v54, %s2685_s15  ;;  %1441 = vrot.lane.b32.xlu1 %v3058_v54, %s2680_s27  ;;  %s3268_s27 = smov 56   ;;  %s3271_s15 = smov 48  }
 0xb13   : > { %1671 = vrot.lane.b32.xlu0 %v3058_v54, %s2686_s21  ;;  %1558 = vrot.lane.b32.xlu1 %v3058_v54, %s3266_s30  ;;  %s3272_s21 = smov 8   ;;  %s3273_s30 = smov 16  }
 0xb17   : > { %1673 = vrot.lane.b32.xlu1 %v3058_v54, %s3267_s23  ;;  %s3274_s23 = smov 24  }
 0xb7d   : > { %v1333_v5 = vpop.permute.xlu1 %1332  ;;  %v1444_v57 = vpop.permute.xlu0 %1443 }
 0xb7e   : > { %v1338_v56 = vsel %vm525_vm2, %v1333_v5, 0  ;;  %v1449_v59 = vsel %vm525_vm2, %v1444_v57, 0 }
 0xb7f   : > { %2376 = vmatpush3.bf16.xpose.msra.mxu0 %v1338_v56 }
 0xb80   : > { %2387 = vmatprep.subr.bf16.mxu0 %v2678_v0 }
 0xb81   : > { %v1442_v58 = vpop.permute.xlu1 %1441  ;;  %v1557_v63 = vpop.permute.xlu0 %1556 }
 0xb85   : > { %v1559_v60 = vpop.permute.xlu1 %1558  ;;  %v1672_v1 = vpop.permute.xlu0 %1671 }
 0xb86   : > { %2378 = vmatmul.mubr.msk.bf16.vlgmr.msra.gmra.mrb[24].mxu0 %vm525_vm2, %v3058_v54  ;;  %v1564_v61 = vsel %vm525_vm2, %v1559_v60, 0 }
 0xb87   : > { %2388 = vmatpush3.bf16.xpose.msra.mxu0 %v1449_v59  ;;  %2389 = vmatprep.mubr.msk.bf16.mxu0 %vm2679_vm0, %v2678_v0 }
 0xb88   : > { %2399 = vmatprep.subr.bf16.mxu0 %v2678_v0 }
 0xb89   : > { %v1674_v62 = vpop.permute.xlu1 %1673 }
 0xb8a   : > { %v1679_v3 = vsel %vm525_vm2, %v1674_v62, 0 }
 0xb8e   : > { %2390 = vmatmul.mubr.msk.bf16.vlgmr.msra.gmra.mrb[28].mxu0 %vm525_vm2, %v1442_v58 }
 0xb8f   : > { %2400 = vmatpush3.bf16.xpose.msra.mxu0 %v1564_v61  ;;  %2401 = vmatprep.mubr.msk.bf16.mxu0 %vm2679_vm0, %v2678_v0 }
 0xb90   : > { %2411 = vmatprep.subr.bf16.mxu0 %v2678_v0 }
 0xb96   : > { %2402 = vmatmul.mubr.msk.bf16.vlgmr.msra.gmra.mrb[32].mxu0 %vm525_vm2, %v1557_v63 }
 0xb97   : > { %2412 = vmatpush3.bf16.xpose.msra.mxu0 %v1679_v3  ;;  %2413 = vmatprep.mubr.msk.bf16.mxu0 %vm2679_vm0, %v2678_v0 }
 0xb98   : > { %2423 = vmatprep.subr.bf16.mxu0 %v2678_v0 }
 0xb9e   : > { %2414 = vmatmul.mubr.msk.bf16.vlgmr.msra.gmra.mrb[36].mxu0 %vm525_vm2, %v1672_v1 }
 0xb9f   : > { %2427 = vmatprep.mubr.msk.bf16.mxu0 %vm2679_vm0, %v2678_v0 }
 0xc59   : > { %v1374_v2 = vpop.f32.mrb[24].mxu0 }
 0xc5a   : > { %v2379_v4 = vpop.f32.mrb[25].mxu0  ;;  %v1380_v6 = vsel %vm525_vm2, %v1374_v2, -inf }
 0xc5b   : > { %1381 = vmax.xlane.f32.xlu1 %v1380_v6  ;;  %v1377_v7 = vpop.f32.mrb[26].mxu0 }
 0xc5c   : > { %v2380_v9 = vpop.f32.mrb[27].mxu0 }
 0xc61   : > { %v1485_v12 = vpop.f32.mrb[28].mxu0 }
 0xc62   : > { %v2391_v13 = vpop.f32.mrb[29].mxu0  ;;  %v1491_v10 = vsel %vm525_vm2, %v1485_v12, -inf }
 0xc63   : > { %1492 = vmax.xlane.f32.xlu0 %v1491_v10  ;;  %v1488_v14 = vpop.f32.mrb[30].mxu0 }
 0xc64   : > { %v2392_v15 = vpop.f32.mrb[31].mxu0 }
 0xc69   : > { %v1600_v17 = vpop.f32.mrb[32].mxu0 }
 0xc6a   : > { %v2403_v18 = vpop.f32.mrb[33].mxu0  ;;  %v1606_v19 = vsel %vm525_vm2, %v1600_v17, -inf }
 0xc6b   : > { %1607 = vmax.xlane.f32.xlu0 %v1606_v19  ;;  %v1603_v20 = vpop.f32.mrb[34].mxu0 }
 0xc6c   : > { %v2404_v21 = vpop.f32.mrb[35].mxu0 }
 0xc71   : > { %v1715_v22 = vpop.f32.mrb[36].mxu0 }
 0xc72   : > { %v2415_v23 = vpop.f32.mrb[37].mxu0  ;;  %v1721_v25 = vsel %vm525_vm2, %v1715_v22, -inf }
 0xc73   : > { %1722 = vmax.xlane.f32.xlu1 %v1721_v25  ;;  %v1718_v26 = vpop.f32.mrb[38].mxu0  ;;  %v2531_v25 = vld [vmem:[%s3230_s3] sm:$0xff]  }
 0xc74   : > { %v2416_v27 = vpop.f32.mrb[39].mxu0  ;;  %2424 = vmatpush3.bf16.msra.mxu0 %v2531_v25  ;;  %v2532_v26 = vld [vmem:[%s3230_s3 + $0x8] sm:$0xff]  }
 0xc75   : > { %2425 = vmatprep.subr.bf16.mxu0 %v2678_v0 }
 0xc78   : > { %2426 = vmatpush3.bf16.msra.mxu0 %v2532_v26 }
 0xc79   : > { %2439 = vmatprep.subr.bf16.mxu0 %v2678_v0 }
 0xce8   : > { %v1382_v28 = vpop.xlane.xlu1 %1381 }
 0xce9   : > { %v1383_v29 = vsub.f32 %v1374_v2, %v1382_v28 }
 0xceb   : > { %v1384_v30 = vmul.f32 1.442695, %v1383_v29 }
 0xced   : > { %2559 = vpow2.f32 %v1384_v30 }
 0xcf0   : > { %v1493_v31 = vpop.xlane.xlu0 %1492 }
 0xcf1   : > { %v1494_v32 = vsub.f32 %v1485_v12, %v1493_v31 }
 0xcf3   : > { %v1495_v33 = vmul.f32 1.442695, %v1494_v32 }
 0xcf5   : > { %2561 = vpow2.f32 %v1495_v33 }
 0xcf7   : > { %v2560_v34 = vpop.eup %2559 }
 0xcf8   : > { %v1608_v35 = vpop.xlane.xlu0 %1607  ;;  %v1386_v36 = vsel %vm525_vm2, %v2560_v34, 0.0 }
 0xcf9   : > { %v1609_v37 = vsub.f32 %v1600_v17, %v1608_v35  ;;  %1387 = vadd.xlane.f32.xlu0 %v1386_v36 }
 0xcfb   : > { %v1610_v38 = vmul.f32 1.442695, %v1609_v37 }
 0xcfd   : > { %2563 = vpow2.f32 %v1610_v38 }
 0xcff   : > { %v2562_v39 = vpop.eup %2561 }
 0xd00   : > { %v1497_v40 = vsel %vm525_vm2, %v2562_v39, 0.0  ;;  %v1723_v44 = vpop.xlane.xlu1 %1722 }
 0xd01   : > { %1498 = vadd.xlane.f32.xlu1 %v1497_v40  ;;  %v1724_v46 = vsub.f32 %v1715_v22, %v1723_v44 }
 0xd03   : > { %v1725_v48 = vmul.f32 1.442695, %v1724_v46 }
 0xd05   : > { %2565 = vpow2.f32 %v1725_v48 }
 0xd07   : > { %v2564_v41 = vpop.eup %2563 }
 0xd08   : > { %v1612_v42 = vsel %vm525_vm2, %v2564_v41, 0.0 }
 0xd09   : > { %1613 = vadd.xlane.f32.xlu0 %v1612_v42 }
 0xd0f   : > { %v2566_v50 = vpop.eup %2565 }
 0xd10   : > { %v1727_v51 = vsel %vm525_vm2, %v2566_v50, 0.0 }
 0xd12   : > { %1503 = vrot.lane.b32.xlu1 %v3058_v54, %s3268_s27 }
 0xd1f   : > { %1392 = vrot.lane.b32.xlu0 %v3058_v54, %s3269_s14 }
 0xd23   : > { %1733 = vrot.lane.b32.xlu0 %v3058_v54, %s3270_s22 }
 0xd36   : > { %1728 = vadd.xlane.f32.xlu1 %v1727_v51 }
 0xd47   : > { %1618 = vrot.lane.b32.xlu1 %v3058_v54, %s3271_s15 }
 0xd86   : > { %v1388_v52 = vpop.xlane.xlu0 %1387 }
 0xd87   : > { %2567 = vrcp.f32 %v1388_v52 }
 0xd8e   : > { %v1499_v53 = vpop.xlane.xlu1 %1498 }
 0xd8f   : > { %2569 = vrcp.f32 %v1499_v53 }
 0xd91   : > { %v2568_v55 = vpop.eup %2567 }
 0xd92   : > { %v1390_v56 = vmul.f32 %v2568_v55, %v2560_v34  ;;  %v1504_v59 = vpop.permute.xlu1 %1503 }
 0xd93   : > { %v1509_v62 = vsel %vm589_vm3, %v1504_v59, 0 }
 0xd94   : > { %v1391_v60 = vpack.c.bf16 %v1390_v56, %v1390_v56  ;;  %v2533_v56 = vld [vmem:[#allocation3] sm:$0xff]  }
 0xd96   : > { %v1614_v5 = vpop.xlane.xlu0 %1613 }
 0xd97   : > { %2571 = vrcp.f32 %v1614_v5 }
 0xd99   : > { %v2570_v61 = vpop.eup %2569 }
 0xd9a   : > { %v1393_v57 = vpop.permute.xlu0 %1392  ;;  %v1501_v54 = vmul.f32 %v2570_v61, %v2562_v39 }
 0xd9b   : > { %v1398_v58 = vsel %vm589_vm3, %v1393_v57, 0  ;;  %v2536_v57 = vld [vmem:[%s3236_s9 + $0x8] sm:$0xff]  }
 0xd9c   : > { %2382 = vmatpush3.bf16.msra.mxu1 %v1398_v58  ;;  %v1502_v63 = vpack.c.bf16 %v1501_v54, %v1501_v54 }
 0xd9d   : > { %2393 = vmatprep.subr.bf16.mxu1 %v2678_v0 }
 0xd9e   : > { %v1734_v7 = vpop.permute.xlu0 %1733 }
 0xd9f   : > { %2384 = vmatmul.mubr.msk.bf16.vlgmr.msra.gmra.mrb[28].mxu1 %vm525_vm2, %v1391_v60  ;;  %v1739_v12 = vsel %vm589_vm3, %v1734_v7, 0 }
 0xda0   : > { %2394 = vmatpush3.bf16.msra.mxu1 %v1509_v62  ;;  %2395 = vmatprep.mubr.msk.bf16.mxu1 %vm2679_vm0, %v2678_v0 }
 0xda1   : > { %2405 = vmatprep.subr.bf16.mxu1 %v2678_v0  ;;  %v2572_v3 = vpop.eup %2571 }
 0xda2   : > { %v1616_v2 = vmul.f32 %v2572_v3, %v2564_v41 }
 0xda4   : > { %v1617_v9 = vpack.c.bf16 %v1616_v2, %v1616_v2  ;;  %v2538_v2 = vld [vmem:[%s3236_s9 + $0x18] sm:$0xff]  }
 0xda7   : > { %2396 = vmatmul.mubr.msk.bf16.vlgmr.msra.gmra.mrb[32].mxu1 %vm525_vm2, %v1502_v63 }
 0xda8   : > { %2407 = vmatprep.mubr.msk.bf16.mxu1 %vm2679_vm0, %v2678_v0 }
 0xdc3   : > { %v1729_v1 = vpop.xlane.xlu1 %1728 }
 0xdc4   : > { %2573 = vrcp.f32 %v1729_v1  ;;  %v2537_v1 = vld [vmem:[%s3236_s9 + $0x10] sm:$0xff]  }
 0xdc7   : > { %v1619_v4 = vpop.permute.xlu1 %1618 }
 0xdc8   : > { %v1624_v6 = vsel %vm589_vm3, %v1619_v4, 0 }
 0xdc9   : > { %2406 = vmatpush3.bf16.msra.mxu1 %v1624_v6 }
 0xdca   : > { %2417 = vmatprep.subr.bf16.mxu1 %v2678_v0 }
 0xdcc   : > { %2408 = vmatmul.mubr.msk.bf16.vlgmr.msra.gmra.mrb[36].mxu1 %vm525_vm2, %v1617_v9 }
 0xdcd   : > { %2418 = vmatpush3.bf16.msra.mxu1 %v1739_v12  ;;  %2419 = vmatprep.mubr.msk.bf16.mxu1 %vm2679_vm0, %v2678_v0 }
 0xdce   : > { %v2574_v13 = vpop.eup %2573  ;;  %2431 = vmatprep.subr.bf16.mxu1 %v2678_v0 }
 0xdcf   : > { %v1731_v10 = vmul.f32 %v2574_v13, %v2566_v50 }
 0xdd1   : > { %v1732_v14 = vpack.c.bf16 %v1731_v10, %v1731_v10 }
 0xdd4   : > { %2420 = vmatmul.mubr.msk.bf16.vlgmr.msra.gmra.mrb[40].mxu1 %vm525_vm2, %v1732_v14 }
 0xdd5   : > { %2435 = vmatprep.mubr.msk.bf16.mxu1 %vm2679_vm0, %v2678_v0  ;;  %2432 = vmatpush3.bf16.msra.mxu1 %v2533_v56 }
 0xdd6   : > { %2433 = vmatprep.subr.bf16.mxu1 %v2678_v0 }
 0xe72   : > { %v1434_v15 = vpop.f32.mrb[28].mxu1 }
 0xe73   : > { %1440 = vst.msk [vmem:[#allocation2] sm:$0xff] %vm525_vm2, %v1434_v15  ;;  %v2385_v17 = vpop.f32.mrb[29].mxu1 }
 0xe74   : > { %v1437_v18 = vpop.f32.mrb[30].mxu1 }
 0xe75   : > { %v2386_v19 = vpop.f32.mrb[31].mxu1 }
 0xe7a   : > { %v1545_v20 = vpop.f32.mrb[32].mxu1 }
 0xe7b   : > { %1552 = vrot.lane.b32.xlu1 %v1545_v20, %s3272_s21  ;;  %v2397_v21 = vpop.f32.mrb[33].mxu1 }
 0xe7c   : > { %v1548_v22 = vpop.f32.mrb[34].mxu1 }
 0xe7d   : > { %v2398_v23 = vpop.f32.mrb[35].mxu1 }
 0xe9f   : > { %v1660_v27 = vpop.f32.mrb[36].mxu1 }
 0xea0   : > { %1667 = vrot.lane.b32.xlu0 %v1660_v27, %s3273_s30  ;;  %v2409_v28 = vpop.f32.mrb[37].mxu1  ;;  %s2157_s30 = sshll.u32 %s444_s17, 3 }
 0xea1   : > { %v1663_v29 = vpop.f32.mrb[38].mxu1  ;;  %s446_s27 = scalar_lea.vmem [#allocation6], %s2157_s30  ;;  %s2613_s30 = scalar_lea.vmem %s2612_s16, 256 }
 0xea2   : > { %v2410_v30 = vpop.f32.mrb[39].mxu1  ;;  %s2080_s14 = sshll.u32 %s446_s27, 4  ;;  %s3186_s14 = int_to_ptr.vmem [resolvable:$true] %s2080_s14 }
 0xea3   : > { %p2614_p2 = scmp.lt.s32.totalorder %s3186_s14, %s2612_s16 }
 0xea7   : > { %v1775_v31 = vpop.f32.mrb[40].mxu1 }
 0xea8   : > { %1782 = vrot.lane.b32.xlu1 %v1775_v31, %s3274_s23  ;;  %v2421_v32 = vpop.f32.mrb[41].mxu1  ;;  %s2220_s23 = sshll.u32 %s2786_s29, 7  ;;  %s2607_s29 = scalar_lea.vmem %s3186_s14, 128 }
 0xea9   : > { %v1778_v33 = vpop.f32.mrb[42].mxu1  ;;  %s3184_s21 = scalar_lea.hbm %s3240_s13, %s2220_s23  ;;  %p2608_p6 = scmp.ne.s32.totalorder %s3186_s14, %s2607_s29 }
 0xeaa   : > { %v2422_v34 = vpop.f32.mrb[43].mxu1  ;;  %p2615_p3 = scmp.lt.s32.totalorder %s2613_s30, %s2607_s29 }
 0xeab   : > { %p2609_p10 = pnand %p2608_p6, %p3275_p9 }
 0xeac   : > { %p2616_p4 = por %p2615_p3, %p2614_p2 }
 0xead   : > { %p2610_p12 = pneg %p2609_p10 }
 0xeaf   : > { %p2617_p7 = pnand %p2616_p4, %p2610_p12 }
 0xeed   : > { %v1553_v35 = vpop.permute.xlu1 %1552 }
 0xeee   : > { %1555 = vst.msk [vmem:[#allocation2] sm:$0xff] %vm748_vm4, %v1553_v35 }
 0xf12   : > { %v1668_v36 = vpop.permute.xlu0 %1667 }
 0xf13   : > { %1670 = vst.msk [vmem:[#allocation2] sm:$0xff] %vm864_vm5, %v1668_v36 }
 0xf1a   : > { %v1783_v37 = vpop.permute.xlu1 %1782 }
 0xf1b   : > { %1785 = vst.msk [vmem:[#allocation2] sm:$0xff] %vm980_vm6, %v1783_v37 }
 0xf22   : > { %v1786_v38 = vld [vmem:[#allocation2] sm:$0xff] }
 0xf23   : > { %v1787_v39 = vpack.c.bf16 %v1786_v38, %v1786_v38 }
 0xf25   : > { %2428 = vmatmul.mubr.msk.bf16.vlgmr.msra.gmra.mrb[40].mxu0 %vm477_vm1, %v1787_v39 }
 0xf26   : > { %2447 = vmatprep.mubr.msk.bf16.mxu0 %vm2679_vm0, %v2678_v0 }
 0xff8   : > { %v1848_v40 = vpop.f32.mrb[40].mxu0 }
 0xff9   : > { %v1849_v41 = vadd.f32 %v2974_v49, %v1848_v40  ;;  %v2429_v42 = vpop.f32.mrb[41].mxu0  ;;  %v2534_v49 = vld [vmem:[#allocation3 + $0x8] sm:$0xff]  }
 0xffa   : > { %v1851_v44 = vpop.f32.mrb[42].mxu0  ;;  %2434 = vmatpush3.bf16.msra.mxu1 %v2534_v49 }
 0xffb   : > { %v2430_v46 = vpop.f32.mrb[43].mxu0  ;;  %v1854_v48 = vadd.f32 %v1849_v41, %v3050_v47  ;;  %v2535_v47 = vld [vmem:[%s3236_s9] sm:$0xff]  }
 0xffc   : > { %2440 = vmatpush3.bf16.msra.mxu0 %v2535_v47 }
 0xffd   : > { %v1857_v50 = vsel %vm477_vm1, %v1854_v48, 0.0  ;;  %2441 = vmatprep.subr.bf16.mxu0 %v2678_v0 }
 0xffe   : > { %1858 = vadd.xlane.f32.xlu0 %v1857_v50 }
0x1000   : > { %2442 = vmatpush3.bf16.msra.mxu0 %v2536_v57 }
0x1001   : > { %2443 = vmatprep.subr.bf16.mxu0 %v2678_v0 }
0x1004   : > { %2444 = vmatpush3.bf16.msra.mxu0 %v2537_v1 }
0x1005   : > { %2445 = vmatprep.subr.bf16.mxu0 %v2678_v0 }
0x1008   : > { %2446 = vmatpush3.bf16.msra.mxu0 %v2538_v2 }
0x108b   : > { %v1859_v51 = vpop.xlane.xlu0 %1858 }
0x108c   : > { %v1860_v52 = vmul.f32 0.03125, %v1859_v51 }
0x108e   : > { %v1861_v53 = vsub.f32 %v1854_v48, %v1860_v52 }
0x1090   : > { %v1862_v55 = vmul.f32 %v1861_v53, %v1861_v53 }
0x1092   : > { %v1863_v5 = vsel %vm477_vm1, %v1862_v55, 0.0 }
0x1093   : > { %1864 = vadd.xlane.f32.xlu1 %v1863_v5 }
0x1120   : > { %v1865_v58 = vpop.xlane.xlu1 %1864 }
0x1121   : > { %v1866_v59 = vmul.f32 0.03125, %v1865_v58 }
0x1123   : > { %v1867_v60 = vadd.f32 1e-05, %v1866_v59 }
0x1125   : > { %2575 = vrsqrt.f32 %v1867_v60 }
0x112f   : > { %v2576_v61 = vpop.eup %2575 }
0x1130   : > { %v1869_v62 = vmul.f32 %v2576_v61, %v1861_v53 }
0x1132   : > { %v1876_v54 = vmul.f32 %v2993_v8, %v1869_v62 }
0x1134   : > { %v1883_v63 = vadd.f32 %v2998_v11, %v1876_v54 }
0x1136   : > { %v1884_v3 = vpack.c.bf16 %v1883_v63, %v1883_v63 }
0x1138   : > { %2436 = vmatmul.mubr.msk.bf16.vlgmr.msra.gmra.mrb[44].mxu1 %vm477_vm1, %v1884_v3 }
0x120b   : > { %v1945_v4 = vpop.f32.mrb[44].mxu1 }
0x120c   : > { %v1946_v8 = vadd.f32 %v3016_v16, %v1945_v4  ;;  %v2437_v6 = vpop.f32.mrb[45].mxu1 }
0x120d   : > { %v1948_v11 = vpop.f32.mrb[46].mxu1 }
0x120e   : > { %v1951_v7 = vmax.f32 %v1946_v8, 0.0  ;;  %v2438_v9 = vpop.f32.mrb[47].mxu1 }
0x1210   : > { %v1952_v12 = vpack.c.bf16 %v1951_v7, %v1951_v7 }
0x1212   : > { %2448 = vmatmul.mubr.msk.bf16.vlgmr.msra.gmra.mrb[44].mxu0 %vm1189_vm7, %v1952_v12 }
0x12e5   : > { %v2029_v13 = vpop.f32.mrb[44].mxu0 }
0x12e6   : > { %v2030_v10 = vadd.f32 %v3025_v24, %v2029_v13  ;;  %v2449_v14 = vpop.f32.mrb[45].mxu0 }
0x12e7   : > { %v2032_v0 = vpop.f32.mrb[46].mxu0 }
0x12e8   : > { %v2450_v15 = vpop.f32.mrb[47].mxu0  ;;  %v2035_v17 = vadd.f32 %v2030_v10, %v1883_v63 }
0x12ea   : > { %v2038_v18 = vsel %vm477_vm1, %v2035_v17, 0.0 }
0x12eb   : > { %2039 = vadd.xlane.f32.xlu0 %v2038_v18 }
0x1378   : > { %v2040_v16 = vpop.xlane.xlu0 %2039 }
0x1379   : > { %v2041_v19 = vmul.f32 0.03125, %v2040_v16 }
0x137b   : > { %v2042_v20 = vsub.f32 %v2035_v17, %v2041_v19 }
0x137d   : > { %v2043_v21 = vmul.f32 %v2042_v20, %v2042_v20 }
0x137f   : > { %v2044_v22 = vsel %vm477_vm1, %v2043_v21, 0.0 }
0x1380   : > { %2045 = vadd.xlane.f32.xlu0 %v2044_v22 }
0x140d   : > { %v2046_v23 = vpop.xlane.xlu0 %2045 }
0x140e   : > { %v2047_v25 = vmul.f32 0.03125, %v2046_v23 }
0x1410   : > { %v2048_v26 = vadd.f32 1e-05, %v2047_v25 }
0x1412   : > { %2577 = vrsqrt.f32 %v2048_v26 }
0x141c   : > { %v2578_v24 = vpop.eup %2577 }
0x141d   : > { %v2050_v27 = vmul.f32 %v2578_v24, %v2042_v20 }
0x141f   : > { %v2057_v28 = vmul.f32 %v3041_v43, %v2050_v27 }
0x1421   : > { %v2064_v29 = vadd.f32 %v3046_v45, %v2057_v28 }
0x1423   : > { %2065 = vst.msk [vmem:[%s446_s27] sm:$0xff] %vm477_vm1, %v2064_v29 }
0x1424   : > { %2620 = shalt.err (!%p2617_p7)
}
0x1425   : > { %s2621_s17 = scalar_lea.hbm %s3184_s21, 128  ;;  %s2625_s22 = scalar_lea.hbm %s3240_s13, 256 }
0x1426   : > { %p2622_p8 = scmp.ne.s32.totalorder %s3184_s21, %s2621_s17  ;;  %p2626_p1 = scmp.lt.u32.totalorder %s3184_s21, %s3240_s13 }
0x1427   : > { %p2627_p0 = scmp.lt.u32.totalorder %s2625_s22, %s2621_s17  ;;  %p2629_p6 = scmp.lt.u32.totalorder %s2621_s17, %s3184_s21 }
0x1428   : > { %p2623_p11 = pnand %p2622_p8, %p3275_p9 }
0x1429   : > { %p2628_p5 = por %p2627_p0, %p2626_p1 }
0x142a   : > { %p2624_p13 = pneg %p2623_p11 }
0x142b   : > { %p2630_p10 = por %p2629_p6, %p2628_p5 }
0x142d   : > { %p2631_p12 = pnand %p2630_p10, %p2624_p13 }
0x142f   : > { %2634 = shalt.err (!%p2631_p12)
}
0x1430   : > { %2455 = dma.vmem_to_hbm [thread:$0]  (%p3275_p9), %s3186_s14, 128, %s3184_s21, %s2067_s24  }
0x1431 PF: > { %p2467_p2 = scmp.ge.s32.totalorder %s2673_s28, 2  ;;  %s2092_s29 = sand.u32 1, %s2661_s25  }
0x1432   : > { %p3276_p3 = scmp.ne.s32.totalorder %s3260_s19, 0  ;;  %s2093_s16 = scalar_lea.sflag [#allocation5], %s2092_s29 }
0x1434   : > { %p2462_p4 = pnand %p2467_p2, %p3276_p3 }
0x1436   : > { %2656 = dma.done.wait (!%p2462_p4), %s2093_s16, 128  }
0x1437   : > { %2658 = vsyncadd (!%p2462_p4), %s2093_s16, 4294967168  ;;  %s3277_s28 = sld [smem:[#allocation10_spill]]  ;;  %s3278_s30 = sld [smem:[#allocation9_spill]] }
0x1438   : > { %s3279_s27 = sld [smem:[#allocation11_spill]]  ;;  %s3280_s25 = smov %s2665_s26 }
0x143d   : > { %p24_p7 = scmp.ge.s32.totalorder %s3277_s28, 4   ;;  %s3281_s26 = smov %s3278_s30 }
0x143f   :  { %26 = sbr.rel (!%p24_p7) target bundleno = 4 (0x4), region = 112 }
0x1446   :  { %2098 = vsyncpa [#allocation4], 1 }
0x1447   :  { %2100 = vsyncpa [#allocation4 + $0x1], 1 }
0x1448   :  { %2101 = vsyncpa [#allocation5], 1 }
0x1449   :  { %2103 = vsyncpa [#allocation5 + $0x1], 1 }

// kernel: tpu_custom_call.1
= control target key start
LH: loop header
LB: loop body
LE: loop exit
PB: predicated region body
PF: predicated region fallthrough
CT: control target
= control target key end

     0   :  { %18 = vsyncpa [#allocation4], 0  ;;  %s3227_s0 = inlined_call_operand.vmem [shape: f32[2,8,32], index: 0, kind: input, shape index: {}]   ;;  %s3228_s1 = inlined_call_operand.vmem [shape: bf16[32,96], index: 1, kind: input, shape index: {}]   ;;  %s3229_s2 = inlined_call_operand.vmem [shape: f32[1,96], index: 2, kind: input, shape index: {}]   ;;  %s3230_s3 = inlined_call_operand.vmem [shape: bf16[32,32], index: 3, kind: input, shape index: {}]   ;;  %s3231_s4 = inlined_call_operand.vmem [shape: f32[1,32], index: 4, kind: input, shape index: {}]   ;;  %s3232_s5 = inlined_call_operand.vmem [shape: f32[1,32], index: 5, kind: input, shape index: {}]   ;;  %s3233_s6 = inlined_call_operand.vmem [shape: f32[1,32], index: 6, kind: input, shape index: {}]   ;;  %s3234_s7 = inlined_call_operand.hbm [shape: bf16[32,64], index: 7, kind: input, shape index: {}]   ;;  %s3235_s8 = inlined_call_operand.vmem [shape: f32[1,64], index: 8, kind: input, shape index: {}]   ;;  %s3236_s9 = inlined_call_operand.vmem [shape: bf16[64,32], index: 9, kind: input, shape index: {}]   ;;  %s3237_s10 = inlined_call_operand.vmem [shape: f32[1,32], index: 10, kind: input, shape index: {}]   ;;  %s3238_s11 = inlined_call_operand.vmem [shape: f32[1,32], index: 11, kind: input, shape index: {}]   ;;  %s3239_s12 = inlined_call_operand.vmem [shape: f32[1,32], index: 12, kind: input, shape index: {}]   ;;  %s3240_s13 = inlined_call_operand.hbm [shape: f32[2,8,32], index: 13, kind: output, shape index: {}]  }
   0x1   :  { %19 = vsyncpa [#allocation5], 0 }
   0x2   :  { %21 = vsyncpa [#allocation5 + $0x1], 0  ;;  %s2765_s25 = smov 0   ;;  %s2767_s26 = smov 0  }
   0x3   :  { %s2769_s27 = smov 0   ;;  %s2771_s28 = smov 0  }
   0x4 LB: > { %3256 = sst [smem:[#allocation9_spill]] %s2669_s27  ;;  %s2786_s29 = sadd.s32 4294967295, %s2673_s28   ;;  %s2673_s28 = sphi %s2771_s28, %s3277_s28   ;;  %s2669_s27 = sphi %s2769_s27, %s3279_s27   ;;  %s2665_s26 = sphi %s2767_s26, %s3281_s26   ;;  %s2661_s25 = sphi %s2765_s25, %s3280_s25  }
   0x5   : > { %s2151_s30 = sadd.s32 4294967294, %s2673_s28   ;;  %s2790_s14 = sadd.s32 1, %s2673_s28  }
   0x6   : > { %3257 = sst [smem:[#allocation10_spill]] %s2790_s14  ;;  %s312_s15 = sadd.s32 1, %s2669_s27 }
   0x7   : > { %s309_s16 = ssub.s32 %s2673_s28, %s2790_s14  ;;  %p322_p0 = scmp.ne.s32.totalorder %s2669_s27, %s2665_s26 }
   0x8   : > { %p310_p1 = scmp.eq.s32.totalorder %s309_s16, 0  ;;  %p323_p2 = scmp.eq.s32.totalorder %s2786_s29, 1 }
   0x9   : > { %p328_p3 = scmp.ne.s32.totalorder %s2665_s26, %s2661_s25  ;;  %p329_p4 = scmp.eq.s32.totalorder %s2151_s30, 1 }
   0xa   : > { %s2801_s17 = scalar_select %p310_p1, %s2669_s27, %s312_s15  }
   0xb   : > { %p2803_p5 = por %p323_p2, %p322_p0  ;;  %p2807_p6 = por %p329_p4, %p328_p3 }
   0xc   : > { %3258 = sst [smem:[#allocation11_spill]] %s2801_s17  ;;  %p2152_p7 = scmp.ge.s32.totalorder %s2673_s28, 1 }
   0xd   : > { %s3259_s18 = scalar_select %p2803_p5, 1, 0 }
   0xe   : > { %s3260_s19 = scalar_select %p2807_p6, 1, 0 }
   0xf   : > { %p336_p8 = scmp.lt.s32.totalorder %s2673_s28, 3  ;;  %p3244_p9 = scmp.eq.s32.totalorder %s2786_s29, 0 }
  0x10   : > { %s2675_s21 = smov [#allocation3]   ;;  %s2579_s15 = scalar_lea.hbm %s3234_s7, 256 }
  0x11   : > { %p2814_p10 = pnand %p2152_p7, %p336_p8  ;;  %s366_s22 = sshll.u32 %s2675_s21, 4  ;;  %s367_s22 = int_to_ptr.vmem [resolvable:$true] %s366_s22 }
  0x12   : > { %p2580_p13 = scmp.ne.s32.totalorder %s3234_s7, %s2579_s15  ;;  %p2586_p3 = scmp.lt.u32.totalorder %s2579_s15, %s3234_s7 }
  0x13   : > { %s3261_s20 = scalar_select %p2814_p10, 1, 0 }
  0x14   : > { %p2457_p11 = pneg %p2814_p10 }
  0x16   : > { %p2822_p12 = pnand %p3244_p9, %p2457_p11 }
  0x18   : > { %p2581_p0 = pneg %p2822_p12 }
  0x1a   : > { %p2582_p1 = pnand %p2581_p0, %p2580_p13 }
  0x1c   : > { %p2583_p2 = pneg %p2582_p1 }
  0x1e   : > { %p2588_p4 = pnand %p2586_p3, %p2583_p2 }
  0x20   : > { %2591 = shalt.err (!%p2588_p4)
}
  0x21   : > { %s2592_s14 = scalar_lea.vmem %s367_s22, 256  ;;  %p2600_p9 = scmp.lt.s32.totalorder %s367_s22, %s367_s22 }
  0x22   : > { %p2593_p7 = scmp.ne.s32.totalorder %s367_s22, %s2592_s14  ;;  %p2601_p6 = scmp.lt.s32.totalorder %s2592_s14, %s2592_s14 }
  0x24   : > { %p2595_p8 = pnand %p2593_p7, %p2581_p0  ;;  %p2602_p5 = por %p2601_p6, %p2600_p9 }
  0x26   : > { %p2596_p11 = pneg %p2595_p8 }
  0x28   : > { %p2603_p10 = pnand %p2602_p5, %p2596_p11 }
  0x2a   : > { %2606 = shalt.err (!%p2603_p10)
}
  0x2b   : > { %s2676_s17 = smov 64   ;;  %s2677_s24 = smov 4  }
  0x2c   : > { %2460 = dma.hbm_to_vmem [thread:$0]  (!%p2822_p12), %s3234_s7, 256, %s367_s22, [#allocation4], %s2676_s17, %s2676_s17, %s2677_s24  }
  0x2d   : > { %p3263_p13 = scmp.ne.s32.totalorder %s3261_s20, 0 }
  0x2e   : > { %p3264_p1 = scmp.eq.s32.totalorder (!%p3263_p13), %s2786_s29, 0 }
  0x2f   : > { %404 = sbr.rel (%p3263_p13) target bundleno = 5169 (0x1431), region = 72 }
  0x36   : > { %2652 = dma.done.wait (%p3264_p1), [#allocation4], 256   ;;  %p3265_p0 = pmov %p3264_p1 }
  0x37   : > { %p447_p5 = scmp.lt.s32.totalorder %s2786_s29, 1  ;;  %v2678_v0 = vmov 0.0   ;;  %vm2679_vm0 = vmmov 0   ;;  %v2519_v1 = vld [vmem:[%s3228_s1] sm:$0xff]   ;;  %v2520_v2 = vld [vmem:[%s3228_s1 + $0x8] sm:$0xff]   ;;  %vm477_vm1 = vcmask 261120  }
  0x38   : > { %2654 = vsyncadd (%p3265_p0), [#allocation4], 4294967040  ;;  %2283 = vmatprep.subr.bf16.mxu1 %v2678_v0  ;;  %2287 = vmatprep.mubr.msk.bf16.mxu1 %vm2679_vm0, %v2678_v0  ;;  %v2877_v5 = vld [vmem:[%s3229_s2] ss:$0 sm:$0xff]  ;;  %s3252_s20 = smov 80   ;;  %s2683_s22 = smov 88  }
  0x39   : > { %s448_s27 = scalar_select %p447_p5, %s2786_s29, 1  ;;  %2297 = vmatprep.subr.bf16.mxu0 %v2678_v0  ;;  %2299 = vmatprep.mubr.msk.bf16.mxu0 %vm2679_vm0, %v2678_v0  ;;  %vm525_vm2 = vcmask 64512   ;;  %vm589_vm3 = vcmask 1043456   ;;  %vm748_vm4 = vcmask 130112   ;;  %vm864_vm5 = vcmask 195712  }
  0x3a   : > { %2284 = vmatpush3.bf16.msra.mxu1 %v2519_v1  ;;  %s2685_s15 = smov 112   ;;  %s2686_s21 = smov 104   ;;  %vm980_vm6 = vcmask 261312   ;;  %vm1189_vm7 = vcmask 523264  }
  0x3b   : > { %s2158_s14 = sshll.u32 %s448_s27, 3  ;;  %2285 = vmatprep.subr.bf16.mxu1 %v2678_v0  ;;  %s2680_s27 = smov 120  }
  0x3c   : > { %s450_s23 = scalar_lea.vmem %s3227_s0, %s2158_s14  ;;  %s2681_s14 = smov 96  }
  0x3d   : > { %v2865_v3 = vld [vmem:[%s450_s23] sm:$0xff]  ;;  %s3251_s23 = smov 72   ;;  %s3250_s17 = smov 56  }
  0x3e   : > { %v453_v4 = vpack.c.bf16 %v2865_v3, %v2865_v3  ;;  %2286 = vmatpush3.bf16.msra.mxu1 %v2520_v2  ;;  %s3249_s24 = smov 64   ;;  %s3248_s30 = smov 40  }
  0x3f   : > { %2291 = vmatprep.subr.bf16.mxu1 %v2678_v0  ;;  %s3247_s16 = smov 48   ;;  %p3275_p9 = scmp.ne.s32.totalorder %s3259_s18, 0 }
  0x41   : > { %2288 = vmatmul.mubr.msk.bf16.vlgmr.msra.gmra.mrb[0].mxu1 %vm477_vm1, %v453_v4 }
  0x42   : > { %2293 = vmatprep.mubr.msk.bf16.mxu1 %vm2679_vm0, %v2678_v0 }
 0x114   : > { %v515_v6 = vpop.f32.mrb[0].mxu1 }
 0x115   : > { %v516_v7 = vadd.f32 %v2877_v5, %v515_v6  ;;  %v2289_v8 = vpop.f32.mrb[1].mxu1 }
 0x116   : > { %v518_v9 = vpop.f32.mrb[2].mxu1 }
 0x117   : > { %v2880_v10 = vpack.c.bf16 %v516_v7, %v516_v7  ;;  %v2290_v11 = vpop.f32.mrb[3].mxu1 }
 0x119   : > { %634 = vrot.lane.b32.xlu1 %v2880_v10, %s2680_s27  ;;  %523 = vrot.lane.b32.xlu0 %v2880_v10, %s2681_s14 }
 0x11d   : > { %752 = vrot.lane.b32.xlu1 %v2880_v10, %s3252_s20  ;;  %636 = vrot.lane.b32.xlu0 %v2880_v10, %s2683_s22  ;;  %s3254_s20 = smov 16  }
 0x121   : > { %868 = vrot.lane.b32.xlu1 %v2880_v10, %s3251_s23  ;;  %750 = vrot.lane.b32.xlu0 %v2880_v10, %s2685_s15  ;;  %s3267_s23 = smov 72  }
 0x125   : > { %866 = vrot.lane.b32.xlu0 %v2880_v10, %s2686_s21 }
 0x18b   : > { %v524_v12 = vpop.permute.xlu0 %523  ;;  %v635_v15 = vpop.permute.xlu1 %634 }
 0x18c   : > { %v530_v13 = vsel %vm525_vm2, %v524_v12, 0 }
 0x18d   : > { %2292 = vmatpush3.bf16.xpose.msra.mxu1 %v530_v13 }
 0x18e   : > { %2303 = vmatprep.subr.bf16.mxu1 %v2678_v0 }
 0x18f   : > { %v637_v14 = vpop.permute.xlu0 %636  ;;  %v753_v17 = vpop.permute.xlu1 %752 }
 0x190   : > { %v642_v16 = vsel %vm525_vm2, %v637_v14, 0  ;;  %v758_v18 = vsel %vm525_vm2, %v753_v17, 0 }
 0x193   : > { %v869_v19 = vpop.permute.xlu1 %868  ;;  %v751_v20 = vpop.permute.xlu0 %750 }
 0x194   : > { %2294 = vmatmul.mubr.msk.bf16.vlgmr.msra.gmra.mrb[4].mxu1 %vm525_vm2, %v2880_v10  ;;  %v874_v21 = vsel %vm525_vm2, %v869_v19, 0 }
 0x195   : > { %2304 = vmatpush3.bf16.xpose.msra.mxu1 %v642_v16  ;;  %2305 = vmatprep.mubr.msk.bf16.mxu1 %vm2679_vm0, %v2678_v0 }
 0x196   : > { %2315 = vmatprep.subr.bf16.mxu1 %v2678_v0 }
 0x197   : > { %v867_v22 = vpop.permute.xlu0 %866 }
 0x19c   : > { %2306 = vmatmul.mubr.msk.bf16.vlgmr.msra.gmra.mrb[8].mxu1 %vm525_vm2, %v635_v15 }
 0x19d   : > { %2316 = vmatpush3.bf16.xpose.msra.mxu1 %v758_v18  ;;  %2317 = vmatprep.mubr.msk.bf16.mxu1 %vm2679_vm0, %v2678_v0 }
 0x19e   : > { %2327 = vmatprep.subr.bf16.mxu1 %v2678_v0 }
 0x1a4   : > { %2318 = vmatmul.mubr.msk.bf16.vlgmr.msra.gmra.mrb[12].mxu1 %vm525_vm2, %v751_v20 }
 0x1a5   : > { %2328 = vmatpush3.bf16.xpose.msra.mxu1 %v874_v21  ;;  %2329 = vmatprep.mubr.msk.bf16.mxu1 %vm2679_vm0, %v2678_v0 }
 0x1a6   : > { %2339 = vmatprep.subr.bf16.mxu1 %v2678_v0 }
 0x1ac   : > { %2330 = vmatmul.mubr.msk.bf16.vlgmr.msra.gmra.mrb[16].mxu1 %vm525_vm2, %v867_v22 }
 0x1ad   : > { %2343 = vmatprep.mubr.msk.bf16.mxu1 %vm2679_vm0, %v2678_v0 }
 0x267   : > { %v566_v23 = vpop.f32.mrb[4].mxu1 }
 0x268   : > { %v2295_v24 = vpop.f32.mrb[5].mxu1  ;;  %v572_v25 = vsel %vm525_vm2, %v566_v23, -inf }
 0x269   : > { %573 = vmax.xlane.f32.xlu1 %v572_v25  ;;  %v569_v26 = vpop.f32.mrb[6].mxu1 }
 0x26a   : > { %v2296_v27 = vpop.f32.mrb[7].mxu1 }
 0x26f   : > { %v678_v28 = vpop.f32.mrb[8].mxu1 }
 0x270   : > { %v2307_v29 = vpop.f32.mrb[9].mxu1  ;;  %v684_v30 = vsel %vm525_vm2, %v678_v28, -inf }
 0x271   : > { %685 = vmax.xlane.f32.xlu0 %v684_v30  ;;  %v681_v31 = vpop.f32.mrb[10].mxu1 }
 0x272   : > { %v2308_v32 = vpop.f32.mrb[11].mxu1 }
 0x277   : > { %v794_v33 = vpop.f32.mrb[12].mxu1 }
 0x278   : > { %v2319_v34 = vpop.f32.mrb[13].mxu1  ;;  %v800_v35 = vsel %vm525_vm2, %v794_v33, -inf }
 0x279   : > { %801 = vmax.xlane.f32.xlu0 %v800_v35  ;;  %v797_v36 = vpop.f32.mrb[14].mxu1  ;;  %v2521_v34 = vld [vmem:[%s3230_s3] sm:$0xff]   ;;  %v2522_v35 = vld [vmem:[%s3230_s3 + $0x8] sm:$0xff]  }
 0x27a   : > { %v2320_v37 = vpop.f32.mrb[15].mxu1  ;;  %2340 = vmatpush3.bf16.msra.mxu1 %v2521_v34 }
 0x27b   : > { %2341 = vmatprep.subr.bf16.mxu1 %v2678_v0 }
 0x27e   : > { %2342 = vmatpush3.bf16.msra.mxu1 %v2522_v35 }
 0x27f   : > { %v910_v38 = vpop.f32.mrb[16].mxu1  ;;  %2355 = vmatprep.subr.bf16.mxu1 %v2678_v0 }
 0x280   : > { %v2331_v39 = vpop.f32.mrb[17].mxu1  ;;  %v916_v40 = vsel %vm525_vm2, %v910_v38, -inf }
 0x281   : > { %917 = vmax.xlane.f32.xlu1 %v916_v40  ;;  %v913_v41 = vpop.f32.mrb[18].mxu1 }
 0x282   : > { %v2332_v42 = vpop.f32.mrb[19].mxu1 }
 0x2f6   : > { %v574_v43 = vpop.xlane.xlu1 %573 }
 0x2f7   : > { %v575_v44 = vsub.f32 %v566_v23, %v574_v43 }
 0x2f9   : > { %v576_v45 = vmul.f32 1.442695, %v575_v44 }
 0x2fb   : > { %2539 = vpow2.f32 %v576_v45 }
 0x2fe   : > { %v686_v46 = vpop.xlane.xlu0 %685 }
 0x2ff   : > { %v687_v47 = vsub.f32 %v678_v28, %v686_v46 }
 0x301   : > { %v688_v48 = vmul.f32 1.442695, %v687_v47 }
 0x303   : > { %2541 = vpow2.f32 %v688_v48 }
 0x305   : > { %v2540_v49 = vpop.eup %2539 }
 0x306   : > { %v802_v50 = vpop.xlane.xlu0 %801  ;;  %v578_v51 = vsel %vm525_vm2, %v2540_v49, 0.0 }
 0x307   : > { %v803_v52 = vsub.f32 %v794_v33, %v802_v50  ;;  %579 = vadd.xlane.f32.xlu0 %v578_v51 }
 0x309   : > { %v804_v53 = vmul.f32 1.442695, %v803_v52 }
 0x30b   : > { %2543 = vpow2.f32 %v804_v53 }
 0x30d   : > { %v2542_v54 = vpop.eup %2541 }
 0x30e   : > { %v690_v55 = vsel %vm525_vm2, %v2542_v54, 0.0  ;;  %v918_v58 = vpop.xlane.xlu1 %917 }
 0x30f   : > { %691 = vadd.xlane.f32.xlu1 %v690_v55  ;;  %v919_v59 = vsub.f32 %v910_v38, %v918_v58 }
 0x311   : > { %v920_v60 = vmul.f32 1.442695, %v919_v59 }
 0x313   : > { %2545 = vpow2.f32 %v920_v60 }
 0x315   : > { %v2544_v56 = vpop.eup %2543 }
 0x316   : > { %v806_v57 = vsel %vm525_vm2, %v2544_v56, 0.0 }
 0x317   : > { %807 = vadd.xlane.f32.xlu0 %v806_v57 }
 0x31d   : > { %v2546_v61 = vpop.eup %2545 }
 0x31e   : > { %v922_v62 = vsel %vm525_vm2, %v2546_v61, 0.0 }
 0x320   : > { %696 = vrot.lane.b32.xlu1 %v2880_v10, %s3250_s17  ;;  %s444_s17 = sand.u32 1, %s2665_s26  }
 0x32d   : > { %584 = vrot.lane.b32.xlu0 %v2880_v10, %s3249_s24  ;;  %s3253_s24 = smov 24  }
 0x331   : > { %928 = vrot.lane.b32.xlu0 %v2880_v10, %s3248_s30  ;;  %s3266_s30 = smov 80  }
 0x344   : > { %923 = vadd.xlane.f32.xlu1 %v922_v62  ;;  %v2523_v62 = vld [vmem:[#allocation3] sm:$0xff]  }
 0x355   : > { %812 = vrot.lane.b32.xlu1 %v2880_v10, %s3247_s16  ;;  %s3255_s16 = smov 8  }
 0x394   : > { %v580_v63 = vpop.xlane.xlu0 %579 }
 0x395   : > { %2547 = vrcp.f32 %v580_v63  ;;  %v2524_v63 = vld [vmem:[#allocation3 + $0x8] sm:$0xff]  }
 0x39c   : > { %v692_v1 = vpop.xlane.xlu1 %691 }
 0x39d   : > { %2549 = vrcp.f32 %v692_v1  ;;  %v2526_v1 = vld [vmem:[%s3236_s9 + $0x8] sm:$0xff]  }
 0x39f   : > { %v2548_v2 = vpop.eup %2547 }
 0x3a0   : > { %v582_v6 = vmul.f32 %v2548_v2, %v2540_v49  ;;  %v697_v9 = vpop.permute.xlu1 %696  ;;  %v2974_v49 = vld [vmem:[%s3231_s4] ss:$0 sm:$0xff] }
 0x3a1   : > { %v702_v13 = vsel %vm589_vm3, %v697_v9, 0 }
 0x3a2   : > { %v583_v11 = vpack.c.bf16 %v582_v6, %v582_v6 }
 0x3a4   : > { %v808_v4 = vpop.xlane.xlu0 %807 }
 0x3a5   : > { %2551 = vrcp.f32 %v808_v4 }
 0x3a7   : > { %v2550_v12 = vpop.eup %2549 }
 0x3a8   : > { %v585_v7 = vpop.permute.xlu0 %584  ;;  %v694_v10 = vmul.f32 %v2550_v12, %v2542_v54 }
 0x3a9   : > { %v591_v8 = vsel %vm589_vm3, %v585_v7, 0 }
 0x3aa   : > { %2298 = vmatpush3.bf16.msra.mxu0 %v591_v8  ;;  %v695_v14 = vpack.c.bf16 %v694_v10, %v694_v10  ;;  %v2993_v8 = vld [vmem:[%s3232_s5] ss:$0 sm:$0xff] }
 0x3ab   : > { %2309 = vmatprep.subr.bf16.mxu0 %v2678_v0 }
 0x3ac   : > { %v929_v20 = vpop.permute.xlu0 %928 }
 0x3ad   : > { %2300 = vmatmul.mubr.msk.bf16.vlgmr.msra.gmra.mrb[0].mxu0 %vm525_vm2, %v583_v11  ;;  %v934_v22 = vsel %vm589_vm3, %v929_v20, 0  ;;  %v2998_v11 = vld [vmem:[%s3233_s6] ss:$0 sm:$0xff] }
 0x3ae   : > { %2310 = vmatpush3.bf16.msra.mxu0 %v702_v13  ;;  %2311 = vmatprep.mubr.msk.bf16.mxu0 %vm2679_vm0, %v2678_v0 }
 0x3af   : > { %2321 = vmatprep.subr.bf16.mxu0 %v2678_v0  ;;  %v2552_v15 = vpop.eup %2551 }
 0x3b0   : > { %v810_v17 = vmul.f32 %v2552_v15, %v2544_v56  ;;  %v2528_v15 = vld [vmem:[%s3236_s9 + $0x18] sm:$0xff]  }
 0x3b2   : > { %v811_v21 = vpack.c.bf16 %v810_v17, %v810_v17 }
 0x3b5   : > { %2312 = vmatmul.mubr.msk.bf16.vlgmr.msra.gmra.mrb[4].mxu0 %vm525_vm2, %v695_v14  ;;  %v2527_v14 = vld [vmem:[%s3236_s9 + $0x10] sm:$0xff]  }
 0x3b6   : > { %2323 = vmatprep.mubr.msk.bf16.mxu0 %vm2679_vm0, %v2678_v0 }
 0x3d1   : > { %v924_v16 = vpop.xlane.xlu1 %923 }
 0x3d2   : > { %2553 = vrcp.f32 %v924_v16  ;;  %v3016_v16 = vld [vmem:[%s3235_s8] ss:$0 sm:$0xff] }
 0x3d5   : > { %v813_v18 = vpop.permute.xlu1 %812 }
 0x3d6   : > { %v818_v19 = vsel %vm589_vm3, %v813_v18, 0 }
 0x3d7   : > { %2322 = vmatpush3.bf16.msra.mxu0 %v818_v19 }
 0x3d8   : > { %2333 = vmatprep.subr.bf16.mxu0 %v2678_v0 }
 0x3da   : > { %2324 = vmatmul.mubr.msk.bf16.vlgmr.msra.gmra.mrb[8].mxu0 %vm525_vm2, %v811_v21 }
 0x3db   : > { %2334 = vmatpush3.bf16.msra.mxu0 %v934_v22  ;;  %2335 = vmatprep.mubr.msk.bf16.mxu0 %vm2679_vm0, %v2678_v0 }
 0x3dc   : > { %v2554_v23 = vpop.eup %2553  ;;  %2347 = vmatprep.subr.bf16.mxu0 %v2678_v0 }
 0x3dd   : > { %v926_v24 = vmul.f32 %v2554_v23, %v2546_v61 }
 0x3df   : > { %v927_v25 = vpack.c.bf16 %v926_v24, %v926_v24  ;;  %v3025_v24 = vld [vmem:[%s3237_s10] ss:$0 sm:$0xff] }
 0x3e2   : > { %2336 = vmatmul.mubr.msk.bf16.vlgmr.msra.gmra.mrb[12].mxu0 %vm525_vm2, %v927_v25 }
 0x3e3   : > { %2351 = vmatprep.mubr.msk.bf16.mxu0 %vm2679_vm0, %v2678_v0  ;;  %2348 = vmatpush3.bf16.msra.mxu0 %v2523_v62 }
 0x3e4   : > { %2349 = vmatprep.subr.bf16.mxu0 %v2678_v0 }
 0x3e7   : > { %2350 = vmatpush3.bf16.msra.mxu0 %v2524_v63 }
 0x3e8   : > { %2367 = vmatprep.subr.bf16.mxu0 %v2678_v0 }
 0x480   : > { %v627_v26 = vpop.f32.mrb[0].mxu0 }
 0x481   : > { %633 = vst.msk [vmem:[#allocation2] sm:$0xff] %vm525_vm2, %v627_v26  ;;  %v2301_v27 = vpop.f32.mrb[1].mxu0 }
 0x482   : > { %v630_v28 = vpop.f32.mrb[2].mxu0 }
 0x483   : > { %v2302_v29 = vpop.f32.mrb[3].mxu0 }
 0x488   : > { %v738_v30 = vpop.f32.mrb[4].mxu0 }
 0x489   : > { %745 = vrot.lane.b32.xlu1 %v738_v30, %s3255_s16  ;;  %v2313_v31 = vpop.f32.mrb[5].mxu0 }
 0x48a   : > { %v741_v32 = vpop.f32.mrb[6].mxu0 }
 0x48b   : > { %v2314_v33 = vpop.f32.mrb[7].mxu0 }
 0x4ad   : > { %v854_v36 = vpop.f32.mrb[8].mxu0 }
 0x4ae   : > { %861 = vrot.lane.b32.xlu0 %v854_v36, %s3254_s20  ;;  %v2325_v37 = vpop.f32.mrb[9].mxu0  ;;  %s2694_s20 = smov [#allocation6]  }
 0x4af   : > { %v857_v38 = vpop.f32.mrb[10].mxu0  ;;  %v2529_v37 = vld [vmem:[%s3228_s1] sm:$0xff]   ;;  %s2611_s16 = sshll.u32 %s2694_s20, 4  ;;  %s2612_s16 = int_to_ptr.vmem [resolvable:$false] %s2611_s16 }
 0x4b0   : > { %v2326_v39 = vpop.f32.mrb[11].mxu0  ;;  %v2530_v38 = vld [vmem:[%s3228_s1 + $0x8] sm:$0xff]  }
 0x4b5   : > { %v970_v40 = vpop.f32.mrb[12].mxu0 }
 0x4b6   : > { %977 = vrot.lane.b32.xlu1 %v970_v40, %s3253_s24  ;;  %v2337_v41 = vpop.f32.mrb[13].mxu0  ;;  %s2067_s24 = scalar_lea.sflag [#allocation5], %s444_s17 }
 0x4b7   : > { %v973_v42 = vpop.f32.mrb[14].mxu0 }
 0x4b8   : > { %v2338_v43 = vpop.f32.mrb[15].mxu0 }
 0x4b9   : > { %v3041_v43 = vld [vmem:[%s3238_s11] ss:$0 sm:$0xff] }
 0x4fb   : > { %v746_v44 = vpop.permute.xlu1 %745 }
 0x4fc   : > { %749 = vst.msk [vmem:[#allocation2] sm:$0xff] %vm748_vm4, %v746_v44 }
 0x520   : > { %v862_v45 = vpop.permute.xlu0 %861 }
 0x521   : > { %865 = vst.msk [vmem:[#allocation2] sm:$0xff] %vm864_vm5, %v862_v45  ;;  %v3046_v45 = vld [vmem:[%s3239_s12] ss:$0 sm:$0xff] }
 0x528   : > { %v978_v46 = vpop.permute.xlu1 %977 }
 0x529   : > { %981 = vst.msk [vmem:[#allocation2] sm:$0xff] %vm980_vm6, %v978_v46 }
 0x530   : > { %v982_v47 = vld [vmem:[#allocation2] sm:$0xff] }
 0x531   : > { %v983_v48 = vpack.c.bf16 %v982_v47, %v982_v47 }
 0x533   : > { %2344 = vmatmul.mubr.msk.bf16.vlgmr.msra.gmra.mrb[20].mxu1 %vm477_vm1, %v983_v48 }
 0x534   : > { %2363 = vmatprep.mubr.msk.bf16.mxu1 %vm2679_vm0, %v2678_v0 }
 0x606   : > { %v1044_v50 = vpop.f32.mrb[20].mxu1 }
 0x607   : > { %v1045_v51 = vadd.f32 %v2974_v49, %v1044_v50  ;;  %v2345_v52 = vpop.f32.mrb[21].mxu1 }
 0x608   : > { %v1047_v53 = vpop.f32.mrb[22].mxu1 }
 0x609   : > { %v2346_v54 = vpop.f32.mrb[23].mxu1  ;;  %v1050_v55 = vadd.f32 %v1045_v51, %v2865_v3  ;;  %v2525_v3 = vld [vmem:[%s3236_s9] sm:$0xff]  }
 0x60a   : > { %2356 = vmatpush3.bf16.msra.mxu1 %v2525_v3 }
 0x60b   : > { %v1053_v56 = vsel %vm477_vm1, %v1050_v55, 0.0  ;;  %2357 = vmatprep.subr.bf16.mxu1 %v2678_v0 }
 0x60c   : > { %1054 = vadd.xlane.f32.xlu0 %v1053_v56 }
 0x60e   : > { %2358 = vmatpush3.bf16.msra.mxu1 %v2526_v1 }
 0x60f   : > { %2359 = vmatprep.subr.bf16.mxu1 %v2678_v0 }
 0x612   : > { %2360 = vmatpush3.bf16.msra.mxu1 %v2527_v14 }
 0x613   : > { %2361 = vmatprep.subr.bf16.mxu1 %v2678_v0 }
 0x616   : > { %2362 = vmatpush3.bf16.msra.mxu1 %v2528_v15 }
 0x617   : > { %2381 = vmatprep.subr.bf16.mxu1 %v2678_v0 }
 0x699   : > { %v1055_v57 = vpop.xlane.xlu0 %1054 }
 0x69a   : > { %v1057_v58 = vmul.f32 0.03125, %v1055_v57 }
 0x69c   : > { %v1058_v59 = vsub.f32 %v1050_v55, %v1057_v58 }
 0x69e   : > { %v1059_v60 = vmul.f32 %v1058_v59, %v1058_v59 }
 0x6a0   : > { %v1060_v61 = vsel %vm477_vm1, %v1059_v60, 0.0 }
 0x6a1   : > { %1061 = vadd.xlane.f32.xlu1 %v1060_v61 }
 0x72e   : > { %v1062_v2 = vpop.xlane.xlu1 %1061 }
 0x72f   : > { %v1063_v4 = vmul.f32 0.03125, %v1062_v2 }
 0x731   : > { %v1064_v6 = vadd.f32 1e-05, %v1063_v4 }
 0x733   : > { %2555 = vrsqrt.f32 %v1064_v6 }
 0x73d   : > { %v2556_v7 = vpop.eup %2555 }
 0x73e   : > { %v1066_v9 = vmul.f32 %v2556_v7, %v1058_v59 }
 0x740   : > { %v1073_v12 = vmul.f32 %v2993_v8, %v1066_v9 }
 0x742   : > { %v1080_v13 = vadd.f32 %v2998_v11, %v1073_v12 }
 0x744   : > { %v1081_v10 = vpack.c.bf16 %v1080_v13, %v1080_v13 }
 0x746   : > { %2352 = vmatmul.mubr.msk.bf16.vlgmr.msra.gmra.mrb[16].mxu0 %vm477_vm1, %v1081_v10 }
 0x747   : > { %2371 = vmatprep.mubr.msk.bf16.mxu0 %vm2679_vm0, %v2678_v0  ;;  %2368 = vmatpush3.bf16.msra.mxu0 %v2529_v37 }
 0x748   : > { %2369 = vmatprep.subr.bf16.mxu0 %v2678_v0 }
 0x74b   : > { %2370 = vmatpush3.bf16.msra.mxu0 %v2530_v38 }
 0x74c   : > { %2375 = vmatprep.subr.bf16.mxu0 %v2678_v0 }
 0x819   : > { %v1142_v17 = vpop.f32.mrb[16].mxu0 }
 0x81a   : > { %v1143_v18 = vadd.f32 %v3016_v16, %v1142_v17  ;;  %v2353_v19 = vpop.f32.mrb[17].mxu0 }
 0x81b   : > { %v1145_v20 = vpop.f32.mrb[18].mxu0 }
 0x81c   : > { %v1148_v21 = vmax.f32 %v1143_v18, 0.0  ;;  %v2354_v22 = vpop.f32.mrb[19].mxu0 }
 0x81e   : > { %v1149_v23 = vpack.c.bf16 %v1148_v21, %v1148_v21 }
 0x820   : > { %2364 = vmatmul.mubr.msk.bf16.vlgmr.msra.gmra.mrb[24].mxu1 %vm1189_vm7, %v1149_v23 }
 0x821   : > { %2383 = vmatprep.mubr.msk.bf16.mxu1 %vm2679_vm0, %v2678_v0 }
 0x8f3   : > { %v1227_v25 = vpop.f32.mrb[24].mxu1 }
 0x8f4   : > { %v1228_v26 = vadd.f32 %v3025_v24, %v1227_v25  ;;  %v2365_v27 = vpop.f32.mrb[25].mxu1 }
 0x8f5   : > { %v1230_v28 = vpop.f32.mrb[26].mxu1 }
 0x8f6   : > { %v2366_v29 = vpop.f32.mrb[27].mxu1  ;;  %v1233_v30 = vadd.f32 %v1228_v26, %v1080_v13 }
 0x8f8   : > { %v1236_v31 = vsel %vm477_vm1, %v1233_v30, 0.0 }
 0x8f9   : > { %1237 = vadd.xlane.f32.xlu0 %v1236_v31 }
 0x986   : > { %v1238_v32 = vpop.xlane.xlu0 %1237 }
 0x987   : > { %v1239_v33 = vmul.f32 0.03125, %v1238_v32 }
 0x989   : > { %v1240_v34 = vsub.f32 %v1233_v30, %v1239_v33 }
 0x98b   : > { %v1241_v35 = vmul.f32 %v1240_v34, %v1240_v34 }
 0x98d   : > { %v1242_v36 = vsel %vm477_vm1, %v1241_v35, 0.0 }
 0x98e   : > { %1243 = vadd.xlane.f32.xlu0 %v1242_v36 }
 0xa1b   : > { %v1244_v39 = vpop.xlane.xlu0 %1243 }
 0xa1c   : > { %v1245_v40 = vmul.f32 0.03125, %v1244_v39 }
 0xa1e   : > { %v1246_v41 = vadd.f32 1e-05, %v1245_v40 }
 0xa20   : > { %2557 = vrsqrt.f32 %v1246_v41 }
 0xa2a   : > { %v2558_v42 = vpop.eup %2557 }
 0xa2b   : > { %v1248_v44 = vmul.f32 %v2558_v42, %v1240_v34 }
 0xa2d   : > { %v1255_v46 = vmul.f32 %v3041_v43, %v1248_v44 }
 0xa2f   : > { %v3050_v47 = vadd.f32 %v3046_v45, %v1255_v46 }
 0xa31   : > { %v1263_v48 = vpack.c.bf16 %v3050_v47, %v3050_v47 }
 0xa33   : > { %2372 = vmatmul.mubr.msk.bf16.vlgmr.msra.gmra.mrb[20].mxu0 %vm477_vm1, %v1263_v48 }
 0xa34   : > { %2377 = vmatprep.mubr.msk.bf16.mxu0 %vm2679_vm0, %v2678_v0 }
 0xb06   : > { %v1324_v50 = vpop.f32.mrb[20].mxu0 }
 0xb07   : > { %v1325_v51 = vadd.f32 %v2877_v5, %v1324_v50  ;;  %v2373_v52 = vpop.f32.mrb[21].mxu0 }
 0xb08   : > { %v1327_v53 = vpop.f32.mrb[22].mxu0 }
 0xb09   : > { %v3058_v54 = vpack.c.bf16 %v1325_v51, %v1325_v51  ;;  %v2374_v55 = vpop.f32.mrb[23].mxu0 }
 0xb0b   : > { %1443 = vrot.lane.b32.xlu0 %v3058_v54, %s2683_s22  ;;  %1332 = vrot.lane.b32.xlu1 %v3058_v54, %s2681_s14  ;;  %s3269_s14 = smov 64   ;;  %s3270_s22 = smov 40  }
 0xb0f   : > { %1556 = vrot.lane.b32.xlu0 %v3058_v54, %s2685_s15  ;;  %1441 = vrot.lane.b32.xlu1 %v3058_v54, %s2680_s27  ;;  %s3268_s27 = smov 56   ;;  %s3271_s15 = smov 48  }
 0xb13   : > { %1671 = vrot.lane.b32.xlu0 %v3058_v54, %s2686_s21  ;;  %1558 = vrot.lane.b32.xlu1 %v3058_v54, %s3266_s30  ;;  %s3272_s21 = smov 8   ;;  %s3273_s30 = smov 16  }
 0xb17   : > { %1673 = vrot.lane.b32.xlu1 %v3058_v54, %s3267_s23  ;;  %s3274_s23 = smov 24  }
 0xb7d   : > { %v1333_v5 = vpop.permute.xlu1 %1332  ;;  %v1444_v57 = vpop.permute.xlu0 %1443 }
 0xb7e   : > { %v1338_v56 = vsel %vm525_vm2, %v1333_v5, 0  ;;  %v1449_v59 = vsel %vm525_vm2, %v1444_v57, 0 }
 0xb7f   : > { %2376 = vmatpush3.bf16.xpose.msra.mxu0 %v1338_v56 }
 0xb80   : > { %2387 = vmatprep.subr.bf16.mxu0 %v2678_v0 }
 0xb81   : > { %v1442_v58 = vpop.permute.xlu1 %1441  ;;  %v1557_v63 = vpop.permute.xlu0 %1556 }
 0xb85   : > { %v1559_v60 = vpop.permute.xlu1 %1558  ;;  %v1672_v1 = vpop.permute.xlu0 %1671 }
 0xb86   : > { %2378 = vmatmul.mubr.msk.bf16.vlgmr.msra.gmra.mrb[24].mxu0 %vm525_vm2, %v3058_v54  ;;  %v1564_v61 = vsel %vm525_vm2, %v1559_v60, 0 }
 0xb87   : > { %2388 = vmatpush3.bf16.xpose.msra.mxu0 %v1449_v59  ;;  %2389 = vmatprep.mubr.msk.bf16.mxu0 %vm2679_vm0, %v2678_v0 }
 0xb88   : > { %2399 = vmatprep.subr.bf16.mxu0 %v2678_v0 }
 0xb89   : > { %v1674_v62 = vpop.permute.xlu1 %1673 }
 0xb8a   : > { %v1679_v3 = vsel %vm525_vm2, %v1674_v62, 0 }
 0xb8e   : > { %2390 = vmatmul.mubr.msk.bf16.vlgmr.msra.gmra.mrb[28].mxu0 %vm525_vm2, %v1442_v58 }
 0xb8f   : > { %2400 = vmatpush3.bf16.xpose.msra.mxu0 %v1564_v61  ;;  %2401 = vmatprep.mubr.msk.bf16.mxu0 %vm2679_vm0, %v2678_v0 }
 0xb90   : > { %2411 = vmatprep.subr.bf16.mxu0 %v2678_v0 }
 0xb96   : > { %2402 = vmatmul.mubr.msk.bf16.vlgmr.msra.gmra.mrb[32].mxu0 %vm525_vm2, %v1557_v63 }
 0xb97   : > { %2412 = vmatpush3.bf16.xpose.msra.mxu0 %v1679_v3  ;;  %2413 = vmatprep.mubr.msk.bf16.mxu0 %vm2679_vm0, %v2678_v0 }
 0xb98   : > { %2423 = vmatprep.subr.bf16.mxu0 %v2678_v0 }
 0xb9e   : > { %2414 = vmatmul.mubr.msk.bf16.vlgmr.msra.gmra.mrb[36].mxu0 %vm525_vm2, %v1672_v1 }
 0xb9f   : > { %2427 = vmatprep.mubr.msk.bf16.mxu0 %vm2679_vm0, %v2678_v0 }
 0xc59   : > { %v1374_v2 = vpop.f32.mrb[24].mxu0 }
 0xc5a   : > { %v2379_v4 = vpop.f32.mrb[25].mxu0  ;;  %v1380_v6 = vsel %vm525_vm2, %v1374_v2, -inf }
 0xc5b   : > { %1381 = vmax.xlane.f32.xlu1 %v1380_v6  ;;  %v1377_v7 = vpop.f32.mrb[26].mxu0 }
 0xc5c   : > { %v2380_v9 = vpop.f32.mrb[27].mxu0 }
 0xc61   : > { %v1485_v12 = vpop.f32.mrb[28].mxu0 }
 0xc62   : > { %v2391_v13 = vpop.f32.mrb[29].mxu0  ;;  %v1491_v10 = vsel %vm525_vm2, %v1485_v12, -inf }
 0xc63   : > { %1492 = vmax.xlane.f32.xlu0 %v1491_v10  ;;  %v1488_v14 = vpop.f32.mrb[30].mxu0 }
 0xc64   : > { %v2392_v15 = vpop.f32.mrb[31].mxu0 }
 0xc69   : > { %v1600_v17 = vpop.f32.mrb[32].mxu0 }
 0xc6a   : > { %v2403_v18 = vpop.f32.mrb[33].mxu0  ;;  %v1606_v19 = vsel %vm525_vm2, %v1600_v17, -inf }
 0xc6b   : > { %1607 = vmax.xlane.f32.xlu0 %v1606_v19  ;;  %v1603_v20 = vpop.f32.mrb[34].mxu0 }
 0xc6c   : > { %v2404_v21 = vpop.f32.mrb[35].mxu0 }
 0xc71   : > { %v1715_v22 = vpop.f32.mrb[36].mxu0 }
 0xc72   : > { %v2415_v23 = vpop.f32.mrb[37].mxu0  ;;  %v1721_v25 = vsel %vm525_vm2, %v1715_v22, -inf }
 0xc73   : > { %1722 = vmax.xlane.f32.xlu1 %v1721_v25  ;;  %v1718_v26 = vpop.f32.mrb[38].mxu0  ;;  %v2531_v25 = vld [vmem:[%s3230_s3] sm:$0xff]  }
 0xc74   : > { %v2416_v27 = vpop.f32.mrb[39].mxu0  ;;  %2424 = vmatpush3.bf16.msra.mxu0 %v2531_v25  ;;  %v2532_v26 = vld [vmem:[%s3230_s3 + $0x8] sm:$0xff]  }
 0xc75   : > { %2425 = vmatprep.subr.bf16.mxu0 %v2678_v0 }
 0xc78   : > { %2426 = vmatpush3.bf16.msra.mxu0 %v2532_v26 }
 0xc79   : > { %2439 = vmatprep.subr.bf16.mxu0 %v2678_v0 }
 0xce8   : > { %v1382_v28 = vpop.xlane.xlu1 %1381 }
 0xce9   : > { %v1383_v29 = vsub.f32 %v1374_v2, %v1382_v28 }
 0xceb   : > { %v1384_v30 = vmul.f32 1.442695, %v1383_v29 }
 0xced   : > { %2559 = vpow2.f32 %v1384_v30 }
 0xcf0   : > { %v1493_v31 = vpop.xlane.xlu0 %1492 }
 0xcf1   : > { %v1494_v32 = vsub.f32 %v1485_v12, %v1493_v31 }
 0xcf3   : > { %v1495_v33 = vmul.f32 1.442695, %v1494_v32 }
 0xcf5   : > { %2561 = vpow2.f32 %v1495_v33 }
 0xcf7   : > { %v2560_v34 = vpop.eup %2559 }
 0xcf8   : > { %v1608_v35 = vpop.xlane.xlu0 %1607  ;;  %v1386_v36 = vsel %vm525_vm2, %v2560_v34, 0.0 }
 0xcf9   : > { %v1609_v37 = vsub.f32 %v1600_v17, %v1608_v35  ;;  %1387 = vadd.xlane.f32.xlu0 %v1386_v36 }
 0xcfb   : > { %v1610_v38 = vmul.f32 1.442695, %v1609_v37 }
 0xcfd   : > { %2563 = vpow2.f32 %v1610_v38 }
 0xcff   : > { %v2562_v39 = vpop.eup %2561 }
 0xd00   : > { %v1497_v40 = vsel %vm525_vm2, %v2562_v39, 0.0  ;;  %v1723_v44 = vpop.xlane.xlu1 %1722 }
 0xd01   : > { %1498 = vadd.xlane.f32.xlu1 %v1497_v40  ;;  %v1724_v46 = vsub.f32 %v1715_v22, %v1723_v44 }
 0xd03   : > { %v1725_v48 = vmul.f32 1.442695, %v1724_v46 }
 0xd05   : > { %2565 = vpow2.f32 %v1725_v48 }
 0xd07   : > { %v2564_v41 = vpop.eup %2563 }
 0xd08   : > { %v1612_v42 = vsel %vm525_vm2, %v2564_v41, 0.0 }
 0xd09   : > { %1613 = vadd.xlane.f32.xlu0 %v1612_v42 }
 0xd0f   : > { %v2566_v50 = vpop.eup %2565 }
 0xd10   : > { %v1727_v51 = vsel %vm525_vm2, %v2566_v50, 0.0 }
 0xd12   : > { %1503 = vrot.lane.b32.xlu1 %v3058_v54, %s3268_s27 }
 0xd1f   : > { %1392 = vrot.lane.b32.xlu0 %v3058_v54, %s3269_s14 }
 0xd23   : > { %1733 = vrot.lane.b32.xlu0 %v3058_v54, %s3270_s22 }
 0xd36   : > { %1728 = vadd.xlane.f32.xlu1 %v1727_v51 }
 0xd47   : > { %1618 = vrot.lane.b32.xlu1 %v3058_v54, %s3271_s15 }
 0xd86   : > { %v1388_v52 = vpop.xlane.xlu0 %1387 }
 0xd87   : > { %2567 = vrcp.f32 %v1388_v52 }
 0xd8e   : > { %v1499_v53 = vpop.xlane.xlu1 %1498 }
 0xd8f   : > { %2569 = vrcp.f32 %v1499_v53 }
 0xd91   : > { %v2568_v55 = vpop.eup %2567 }
 0xd92   : > { %v1390_v56 = vmul.f32 %v2568_v55, %v2560_v34  ;;  %v1504_v59 = vpop.permute.xlu1 %1503 }
 0xd93   : > { %v1509_v62 = vsel %vm589_vm3, %v1504_v59, 0 }
 0xd94   : > { %v1391_v60 = vpack.c.bf16 %v1390_v56, %v1390_v56  ;;  %v2533_v56 = vld [vmem:[#allocation3] sm:$0xff]  }
 0xd96   : > { %v1614_v5 = vpop.xlane.xlu0 %1613 }
 0xd97   : > { %2571 = vrcp.f32 %v1614_v5 }
 0xd99   : > { %v2570_v61 = vpop.eup %2569 }
 0xd9a   : > { %v1393_v57 = vpop.permute.xlu0 %1392  ;;  %v1501_v54 = vmul.f32 %v2570_v61, %v2562_v39 }
 0xd9b   : > { %v1398_v58 = vsel %vm589_vm3, %v1393_v57, 0  ;;  %v2536_v57 = vld [vmem:[%s3236_s9 + $0x8] sm:$0xff]  }
 0xd9c   : > { %2382 = vmatpush3.bf16.msra.mxu1 %v1398_v58  ;;  %v1502_v63 = vpack.c.bf16 %v1501_v54, %v1501_v54 }
 0xd9d   : > { %2393 = vmatprep.subr.bf16.mxu1 %v2678_v0 }
 0xd9e   : > { %v1734_v7 = vpop.permute.xlu0 %1733 }
 0xd9f   : > { %2384 = vmatmul.mubr.msk.bf16.vlgmr.msra.gmra.mrb[28].mxu1 %vm525_vm2, %v1391_v60  ;;  %v1739_v12 = vsel %vm589_vm3, %v1734_v7, 0 }
 0xda0   : > { %2394 = vmatpush3.bf16.msra.mxu1 %v1509_v62  ;;  %2395 = vmatprep.mubr.msk.bf16.mxu1 %vm2679_vm0, %v2678_v0 }
 0xda1   : > { %2405 = vmatprep.subr.bf16.mxu1 %v2678_v0  ;;  %v2572_v3 = vpop.eup %2571 }
 0xda2   : > { %v1616_v2 = vmul.f32 %v2572_v3, %v2564_v41 }
 0xda4   : > { %v1617_v9 = vpack.c.bf16 %v1616_v2, %v1616_v2  ;;  %v2538_v2 = vld [vmem:[%s3236_s9 + $0x18] sm:$0xff]  }
 0xda7   : > { %2396 = vmatmul.mubr.msk.bf16.vlgmr.msra.gmra.mrb[32].mxu1 %vm525_vm2, %v1502_v63 }
 0xda8   : > { %2407 = vmatprep.mubr.msk.bf16.mxu1 %vm2679_vm0, %v2678_v0 }
 0xdc3   : > { %v1729_v1 = vpop.xlane.xlu1 %1728 }
 0xdc4   : > { %2573 = vrcp.f32 %v1729_v1  ;;  %v2537_v1 = vld [vmem:[%s3236_s9 + $0x10] sm:$0xff]  }
 0xdc7   : > { %v1619_v4 = vpop.permute.xlu1 %1618 }
 0xdc8   : > { %v1624_v6 = vsel %vm589_vm3, %v1619_v4, 0 }
 0xdc9   : > { %2406 = vmatpush3.bf16.msra.mxu1 %v1624_v6 }
 0xdca   : > { %2417 = vmatprep.subr.bf16.mxu1 %v2678_v0 }
 0xdcc   : > { %2408 = vmatmul.mubr.msk.bf16.vlgmr.msra.gmra.mrb[36].mxu1 %vm525_vm2, %v1617_v9 }
 0xdcd   : > { %2418 = vmatpush3.bf16.msra.mxu1 %v1739_v12  ;;  %2419 = vmatprep.mubr.msk.bf16.mxu1 %vm2679_vm0, %v2678_v0 }
 0xdce   : > { %v2574_v13 = vpop.eup %2573  ;;  %2431 = vmatprep.subr.bf16.mxu1 %v2678_v0 }
 0xdcf   : > { %v1731_v10 = vmul.f32 %v2574_v13, %v2566_v50 }
 0xdd1   : > { %v1732_v14 = vpack.c.bf16 %v1731_v10, %v1731_v10 }
 0xdd4   : > { %2420 = vmatmul.mubr.msk.bf16.vlgmr.msra.gmra.mrb[40].mxu1 %vm525_vm2, %v1732_v14 }
 0xdd5   : > { %2435 = vmatprep.mubr.msk.bf16.mxu1 %vm2679_vm0, %v2678_v0  ;;  %2432 = vmatpush3.bf16.msra.mxu1 %v2533_v56 }
 0xdd6   : > { %2433 = vmatprep.subr.bf16.mxu1 %v2678_v0 }
 0xe72   : > { %v1434_v15 = vpop.f32.mrb[28].mxu1 }
 0xe73   : > { %1440 = vst.msk [vmem:[#allocation2] sm:$0xff] %vm525_vm2, %v1434_v15  ;;  %v2385_v17 = vpop.f32.mrb[29].mxu1 }
 0xe74   : > { %v1437_v18 = vpop.f32.mrb[30].mxu1 }
 0xe75   : > { %v2386_v19 = vpop.f32.mrb[31].mxu1 }
 0xe7a   : > { %v1545_v20 = vpop.f32.mrb[32].mxu1 }
 0xe7b   : > { %1552 = vrot.lane.b32.xlu1 %v1545_v20, %s3272_s21  ;;  %v2397_v21 = vpop.f32.mrb[33].mxu1 }
 0xe7c   : > { %v1548_v22 = vpop.f32.mrb[34].mxu1 }
 0xe7d   : > { %v2398_v23 = vpop.f32.mrb[35].mxu1 }
 0xe9f   : > { %v1660_v27 = vpop.f32.mrb[36].mxu1 }
 0xea0   : > { %1667 = vrot.lane.b32.xlu0 %v1660_v27, %s3273_s30  ;;  %v2409_v28 = vpop.f32.mrb[37].mxu1  ;;  %s2157_s30 = sshll.u32 %s444_s17, 3 }
 0xea1   : > { %v1663_v29 = vpop.f32.mrb[38].mxu1  ;;  %s446_s27 = scalar_lea.vmem [#allocation6], %s2157_s30  ;;  %s2613_s30 = scalar_lea.vmem %s2612_s16, 256 }
 0xea2   : > { %v2410_v30 = vpop.f32.mrb[39].mxu1  ;;  %s2080_s14 = sshll.u32 %s446_s27, 4  ;;  %s3186_s14 = int_to_ptr.vmem [resolvable:$true] %s2080_s14 }
 0xea3   : > { %p2614_p2 = scmp.lt.s32.totalorder %s3186_s14, %s2612_s16 }
 0xea7   : > { %v1775_v31 = vpop.f32.mrb[40].mxu1 }
 0xea8   : > { %1782 = vrot.lane.b32.xlu1 %v1775_v31, %s3274_s23  ;;  %v2421_v32 = vpop.f32.mrb[41].mxu1  ;;  %s2220_s23 = sshll.u32 %s2786_s29, 7  ;;  %s2607_s29 = scalar_lea.vmem %s3186_s14, 128 }
 0xea9   : > { %v1778_v33 = vpop.f32.mrb[42].mxu1  ;;  %s3184_s21 = scalar_lea.hbm %s3240_s13, %s2220_s23  ;;  %p2608_p6 = scmp.ne.s32.totalorder %s3186_s14, %s2607_s29 }
 0xeaa   : > { %v2422_v34 = vpop.f32.mrb[43].mxu1  ;;  %p2615_p3 = scmp.lt.s32.totalorder %s2613_s30, %s2607_s29 }
 0xeab   : > { %p2609_p10 = pnand %p2608_p6, %p3275_p9 }
 0xeac   : > { %p2616_p4 = por %p2615_p3, %p2614_p2 }
 0xead   : > { %p2610_p12 = pneg %p2609_p10 }
 0xeaf   : > { %p2617_p7 = pnand %p2616_p4, %p2610_p12 }
 0xeed   : > { %v1553_v35 = vpop.permute.xlu1 %1552 }
 0xeee   : > { %1555 = vst.msk [vmem:[#allocation2] sm:$0xff] %vm748_vm4, %v1553_v35 }
 0xf12   : > { %v1668_v36 = vpop.permute.xlu0 %1667 }
 0xf13   : > { %1670 = vst.msk [vmem:[#allocation2] sm:$0xff] %vm864_vm5, %v1668_v36 }
 0xf1a   : > { %v1783_v37 = vpop.permute.xlu1 %1782 }
 0xf1b   : > { %1785 = vst.msk [vmem:[#allocation2] sm:$0xff] %vm980_vm6, %v1783_v37 }
 0xf22   : > { %v1786_v38 = vld [vmem:[#allocation2] sm:$0xff] }
 0xf23   : > { %v1787_v39 = vpack.c.bf16 %v1786_v38, %v1786_v38 }
 0xf25   : > { %2428 = vmatmul.mubr.msk.bf16.vlgmr.msra.gmra.mrb[40].mxu0 %vm477_vm1, %v1787_v39 }
 0xf26   : > { %2447 = vmatprep.mubr.msk.bf16.mxu0 %vm2679_vm0, %v2678_v0 }
 0xff8   : > { %v1848_v40 = vpop.f32.mrb[40].mxu0 }
 0xff9   : > { %v1849_v41 = vadd.f32 %v2974_v49, %v1848_v40  ;;  %v2429_v42 = vpop.f32.mrb[41].mxu0  ;;  %v2534_v49 = vld [vmem:[#allocation3 + $0x8] sm:$0xff]  }
 0xffa   : > { %v1851_v44 = vpop.f32.mrb[42].mxu0  ;;  %2434 = vmatpush3.bf16.msra.mxu1 %v2534_v49 }
 0xffb   : > { %v2430_v46 = vpop.f32.mrb[43].mxu0  ;;  %v1854_v48 = vadd.f32 %v1849_v41, %v3050_v47  ;;  %v2535_v47 = vld [vmem:[%s3236_s9] sm:$0xff]  }
 0xffc   : > { %2440 = vmatpush3.bf16.msra.mxu0 %v2535_v47 }
 0xffd   : > { %v1857_v50 = vsel %vm477_vm1, %v1854_v48, 0.0  ;;  %2441 = vmatprep.subr.bf16.mxu0 %v2678_v0 }
 0xffe   : > { %1858 = vadd.xlane.f32.xlu0 %v1857_v50 }
0x1000   : > { %2442 = vmatpush3.bf16.msra.mxu0 %v2536_v57 }
0x1001   : > { %2443 = vmatprep.subr.bf16.mxu0 %v2678_v0 }
0x1004   : > { %2444 = vmatpush3.bf16.msra.mxu0 %v2537_v1 }
0x1005   : > { %2445 = vmatprep.subr.bf16.mxu0 %v2678_v0 }
0x1008   : > { %2446 = vmatpush3.bf16.msra.mxu0 %v2538_v2 }
0x108b   : > { %v1859_v51 = vpop.xlane.xlu0 %1858 }
0x108c   : > { %v1860_v52 = vmul.f32 0.03125, %v1859_v51 }
0x108e   : > { %v1861_v53 = vsub.f32 %v1854_v48, %v1860_v52 }
0x1090   : > { %v1862_v55 = vmul.f32 %v1861_v53, %v1861_v53 }
0x1092   : > { %v1863_v5 = vsel %vm477_vm1, %v1862_v55, 0.0 }
0x1093   : > { %1864 = vadd.xlane.f32.xlu1 %v1863_v5 }
0x1120   : > { %v1865_v58 = vpop.xlane.xlu1 %1864 }
0x1121   : > { %v1866_v59 = vmul.f32 0.03125, %v1865_v58 }
0x1123   : > { %v1867_v60 = vadd.f32 1e-05, %v1866_v59 }
0x1125   : > { %2575 = vrsqrt.f32 %v1867_v60 }
0x112f   : > { %v2576_v61 = vpop.eup %2575 }
0x1130   : > { %v1869_v62 = vmul.f32 %v2576_v61, %v1861_v53 }
0x1132   : > { %v1876_v54 = vmul.f32 %v2993_v8, %v1869_v62 }
0x1134   : > { %v1883_v63 = vadd.f32 %v2998_v11, %v1876_v54 }
0x1136   : > { %v1884_v3 = vpack.c.bf16 %v1883_v63, %v1883_v63 }
0x1138   : > { %2436 = vmatmul.mubr.msk.bf16.vlgmr.msra.gmra.mrb[44].mxu1 %vm477_vm1, %v1884_v3 }
0x120b   : > { %v1945_v4 = vpop.f32.mrb[44].mxu1 }
0x120c   : > { %v1946_v8 = vadd.f32 %v3016_v16, %v1945_v4  ;;  %v2437_v6 = vpop.f32.mrb[45].mxu1 }
0x120d   : > { %v1948_v11 = vpop.f32.mrb[46].mxu1 }
0x120e   : > { %v1951_v7 = vmax.f32 %v1946_v8, 0.0  ;;  %v2438_v9 = vpop.f32.mrb[47].mxu1 }
0x1210   : > { %v1952_v12 = vpack.c.bf16 %v1951_v7, %v1951_v7 }
0x1212   : > { %2448 = vmatmul.mubr.msk.bf16.vlgmr.msra.gmra.mrb[44].mxu0 %vm1189_vm7, %v1952_v12 }
0x12e5   : > { %v2029_v13 = vpop.f32.mrb[44].mxu0 }
0x12e6   : > { %v2030_v10 = vadd.f32 %v3025_v24, %v2029_v13  ;;  %v2449_v14 = vpop.f32.mrb[45].mxu0 }
0x12e7   : > { %v2032_v0 = vpop.f32.mrb[46].mxu0 }
0x12e8   : > { %v2450_v15 = vpop.f32.mrb[47].mxu0  ;;  %v2035_v17 = vadd.f32 %v2030_v10, %v1883_v63 }
0x12ea   : > { %v2038_v18 = vsel %vm477_vm1, %v2035_v17, 0.0 }
0x12eb   : > { %2039 = vadd.xlane.f32.xlu0 %v2038_v18 }
0x1378   : > { %v2040_v16 = vpop.xlane.xlu0 %2039 }
0x1379   : > { %v2041_v19 = vmul.f32 0.03125, %v2040_v16 }
0x137b   : > { %v2042_v20 = vsub.f32 %v2035_v17, %v2041_v19 }
0x137d   : > { %v2043_v21 = vmul.f32 %v2042_v20, %v2042_v20 }
0x137f   : > { %v2044_v22 = vsel %vm477_vm1, %v2043_v21, 0.0 }
0x1380   : > { %2045 = vadd.xlane.f32.xlu0 %v2044_v22 }
0x140d   : > { %v2046_v23 = vpop.xlane.xlu0 %2045 }
0x140e   : > { %v2047_v25 = vmul.f32 0.03125, %v2046_v23 }
0x1410   : > { %v2048_v26 = vadd.f32 1e-05, %v2047_v25 }
0x1412   : > { %2577 = vrsqrt.f32 %v2048_v26 }
0x141c   : > { %v2578_v24 = vpop.eup %2577 }
0x141d   : > { %v2050_v27 = vmul.f32 %v2578_v24, %v2042_v20 }
0x141f   : > { %v2057_v28 = vmul.f32 %v3041_v43, %v2050_v27 }
0x1421   : > { %v2064_v29 = vadd.f32 %v3046_v45, %v2057_v28 }
0x1423   : > { %2065 = vst.msk [vmem:[%s446_s27] sm:$0xff] %vm477_vm1, %v2064_v29 }
0x1424   : > { %2620 = shalt.err (!%p2617_p7)
}
0x1425   : > { %s2621_s17 = scalar_lea.hbm %s3184_s21, 128  ;;  %s2625_s22 = scalar_lea.hbm %s3240_s13, 256 }
0x1426   : > { %p2622_p8 = scmp.ne.s32.totalorder %s3184_s21, %s2621_s17  ;;  %p2626_p1 = scmp.lt.u32.totalorder %s3184_s21, %s3240_s13 }
0x1427   : > { %p2627_p0 = scmp.lt.u32.totalorder %s2625_s22, %s2621_s17  ;;  %p2629_p6 = scmp.lt.u32.totalorder %s2621_s17, %s3184_s21 }
0x1428   : > { %p2623_p11 = pnand %p2622_p8, %p3275_p9 }
0x1429   : > { %p2628_p5 = por %p2627_p0, %p2626_p1 }
0x142a   : > { %p2624_p13 = pneg %p2623_p11 }
0x142b   : > { %p2630_p10 = por %p2629_p6, %p2628_p5 }
0x142d   : > { %p2631_p12 = pnand %p2630_p10, %p2624_p13 }
0x142f   : > { %2634 = shalt.err (!%p2631_p12)
}
0x1430   : > { %2455 = dma.vmem_to_hbm [thread:$0]  (%p3275_p9), %s3186_s14, 128, %s3184_s21, %s2067_s24  }
0x1431 PF: > { %p2467_p2 = scmp.ge.s32.totalorder %s2673_s28, 2  ;;  %s2092_s29 = sand.u32 1, %s2661_s25  }
0x1432   : > { %p3276_p3 = scmp.ne.s32.totalorder %s3260_s19, 0  ;;  %s2093_s16 = scalar_lea.sflag [#allocation5], %s2092_s29 }
0x1434   : > { %p2462_p4 = pnand %p2467_p2, %p3276_p3 }
0x1436   : > { %2656 = dma.done.wait (!%p2462_p4), %s2093_s16, 128  }
0x1437   : > { %2658 = vsyncadd (!%p2462_p4), %s2093_s16, 4294967168  ;;  %s3277_s28 = sld [smem:[#allocation10_spill]]  ;;  %s3278_s30 = sld [smem:[#allocation9_spill]] }
0x1438   : > { %s3279_s27 = sld [smem:[#allocation11_spill]]  ;;  %s3280_s25 = smov %s2665_s26 }
0x143d   : > { %p24_p7 = scmp.ge.s32.totalorder %s3277_s28, 4   ;;  %s3281_s26 = smov %s3278_s30 }
0x143f   :  { %26 = sbr.rel (!%p24_p7) target bundleno = 4 (0x4), region = 112 }
0x1446   :  { %2098 = vsyncpa [#allocation4], 1 }
0x1447   :  { %2100 = vsyncpa [#allocation4 + $0x1], 1 }
0x1448   :  { %2101 = vsyncpa [#allocation5], 1 }
0x1449   :  { %2103 = vsyncpa [#allocation5 + $0x1], 1 }

</bundles_post_ra>
